<compile_context>
chip_gen: v6e
topology: v6e:2x2x1
jax: 0.10.0
libtpu: 0.0.40
codegen_flags: <defaults>
</compile_context>

<pallas_src>
import functools

import jax
import jax.numpy as jnp
import numpy as np
from jax import lax
from jax.experimental import pallas as pl
from jax.experimental.pallas import tpu as pltpu


# Contraction pattern for the input projection (rhs-transposed, i.e. the same
# pattern flash attention uses for q @ k^T):
#   (width, n) . (tb, n)^T -> (width, tb)
_NT = (((1,), (1,)), ((), ()))


# ---------------------------------------------------------------------------
# Fused kernel: whole INN forward on one batch-major (tb, n) tile.
#   UP :  x <- x + m(y)      m : (n-d) -> d
#   LOW:  y <- y + m(x)      m : d -> (n-d)
#   m is an _FCNet: sigmoid(Linear) -> [sigmoid(Linear)]*nsublayers
#                   -> sigmoid(Linear)
# Weights are zero-padded host-side to full n on both the input and output
# side of each FCNet, so the kernel only ever touches full tiles; the correct
# half is selected with a per-layer lane mask on the residual add.
# ---------------------------------------------------------------------------
def _inn_kernel(*refs, d, n, nsublayers, parities, fast_sigmoid, matmul_dtype):
    it = iter(refs)
    xy_ref = next(it)
    w_in = next(it)
    b_in = next(it)
    if nsublayers > 0:
        w_hid = next(it)
        b_hid = next(it)
    else:
        w_hid = b_hid = None
    w_out = next(it)
    b_out = next(it)
    out_ref = next(it)

    def sigmoid(v):
        if fast_sigmoid:
            # exp on the EUP + approximate reciprocal on the EUP (keeps the
            # otherwise-idle EUP slot busy, avoids a VPU divide sequence).
            return pl.reciprocal(1.0 + jnp.exp(-v), approx=True)
        return jax.nn.sigmoid(v)

    xy = xy_ref[...].astype(jnp.float32)                  # (tb, n) batch-major

    # Per-half lane masks for the residual update, built once per tile.
    col = lax.broadcasted_iota(jnp.int32, (1, n), 1)
    mask_up = (col < d).astype(jnp.float32)               # update x half
    mask_low = 1.0 - mask_up                               # update y half

    for li, ul in enumerate(parities):                    # static unroll
        act = xy.astype(matmul_dtype)
        # (width, n) . (tb, n)^T -> (width, tb): batch rides the lanes.
        h = sigmoid(
            lax.dot_general(w_in[li], act, _NT,
                            preferred_element_type=jnp.float32)
            + b_in[li])
        for s in range(nsublayers):                        # static unroll
            h = sigmoid(
                jnp.dot(w_hid[li, s], h.astype(matmul_dtype),
                        preferred_element_type=jnp.float32)
                + b_hid[li, s])
        # (tb, width) . (width, n) -> (tb, n) full-width delta, batch-major.
        delta = sigmoid(
            jnp.dot(jnp.transpose(h).astype(matmul_dtype), w_out[li],
                    preferred_element_type=jnp.float32)
            + b_out[li])
        mask = mask_up if ul == 'up' else mask_low
        xy = xy + mask * delta                             # full-tile VPU add

    out_ref[...] = xy.astype(out_ref.dtype)                # one full-block store


# ---------------------------------------------------------------------------
# Host-side packing: zero-pad each FCNet to read / write the full n-wide state
# and stack all coupling layers (identical shapes regardless of parity).
# ---------------------------------------------------------------------------
def _pack_params(layers, n, d, nsublayers, matmul_dtype):
    W_in, B_in, W_hid, B_hid, W_out, B_out = [], [], [], [], [], []
    for ul, (w_in, b_in, w_hid, b_hid, w_out, b_out) in layers:
        indim, width = w_in.shape
        outdim = w_out.shape[1]
        in_off = d if ul == 'up' else 0    # 'up' reads the y half, 'low' the x half
        out_off = 0 if ul == 'up' else d   # 'up' writes the x half, 'low' the y half

        wi = jnp.zeros((width, n), jnp.float32)
        wi = wi.at[:, in_off:in_off + indim].set(w_in.T)          # (width, n)
        wo = jnp.zeros((width, n), jnp.float32)
        wo = wo.at[:, out_off:out_off + outdim].set(w_out)        # (width, n)
        bo = jnp.zeros((1, n), jnp.float32)
        bo = bo.at[:, out_off:out_off + outdim].set(b_out)        # (1, n)

        W_in.append(wi)
        B_in.append(b_in.reshape(width, 1))                       # (width, 1)
        W_out.append(wo)
        B_out.append(bo)
        if nsublayers > 0:
            W_hid.append(jnp.swapaxes(w_hid, -1, -2))             # (L, width, width)
            B_hid.append(jnp.swapaxes(b_hid, -1, -2))             # (L, width, 1)

    arrs = [jnp.stack(W_in).astype(matmul_dtype), jnp.stack(B_in)]
    if nsublayers > 0:
        arrs += [jnp.stack(W_hid).astype(matmul_dtype), jnp.stack(B_hid)]
    arrs += [jnp.stack(W_out).astype(matmul_dtype), jnp.stack(B_out)]
    return arrs


def _round_up(x, m):
    return (x + m - 1) // m * m


def inn_forward(xy, layers, *, d, nsublayers, tb=512,
                matmul_dtype=jnp.float32, fast_sigmoid=False):
    """Fused INN forward. xy: (B, n) f32. Returns (B, n)."""
    B, n = xy.shape
    nlayers = len(layers)
    parities = tuple(ul for ul, _ in layers)
    width = layers[0][1][0].shape[1]

    # Batch tile: multiple of 128 (lane-dense hidden activations), no bigger
    # than the 128-rounded batch.  Ragged tail -> Pallas partial last block.
    tb = max(128, min(_round_up(tb, 128), _round_up(B, 128)))
    num_tiles = pl.cdiv(B, tb)

    weight_arrs = _pack_params(layers, n, d, nsublayers, matmul_dtype)

    act_spec_in = pl.BlockSpec((tb, n), lambda i: (i, 0))
    act_spec_out = pl.BlockSpec((tb, n), lambda i: (i, 0))
    # Weight blocks are grid-invariant (constant index map), fetched once.
    w_specs = [pl.BlockSpec(a.shape, lambda i, _nd=a.ndim: (0,) * _nd)
               for a in weight_arrs]

    # Advisory cost estimate (uses the zero-padded n-wide in/out dims).
    flops_per_sample = nlayers * (2 * n * width
                                  + 2 * nsublayers * width * width
                                  + 2 * width * n)
    trans_per_sample = nlayers * (width * (1 + nsublayers) + n)
    bytes_accessed = 2 * B * n * xy.dtype.itemsize + sum(
        int(a.size) * a.dtype.itemsize for a in weight_arrs)
    cost = pl.CostEstimate(flops=int(flops_per_sample * B),
                           transcendentals=int(trans_per_sample * B),
                           bytes_accessed=int(bytes_accessed))

    kernel = functools.partial(_inn_kernel, d=d, n=n, nsublayers=nsublayers,
                               parities=parities, fast_sigmoid=fast_sigmoid,
                               matmul_dtype=matmul_dtype)

    return pl.pallas_call(
        kernel,
        out_shape=jax.ShapeDtypeStruct((B, n), xy.dtype),
        grid=(num_tiles,),
        in_specs=[act_spec_in] + w_specs,
        out_specs=act_spec_out,
        compiler_params=pltpu.CompilerParams(
            dimension_semantics=("parallel",)),
        cost_estimate=cost,
    )(xy, *weight_arrs)


# ---------------------------------------------------------------------------
# Deterministic parameter init (PyTorch-style uniform(-1/sqrt(fan_in)))
# ---------------------------------------------------------------------------
def init_fcnet(key, indim, outdim, nsublayers, width):
    n_lin = 2 + nsublayers
    keys = jax.random.split(key, 2 * n_lin)

    def lin(kw, kb, fi, fo):
        bound = 1.0 / np.sqrt(fi)
        w = jax.random.uniform(kw, (fi, fo), jnp.float32, -bound, bound)
        b = jax.random.uniform(kb, (1, fo), jnp.float32, -bound, bound)
        return w, b

    w_in, b_in = lin(keys[0], keys[1], indim, width)
    if nsublayers > 0:
        w_hid_l, b_hid_l = [], []
        for l in range(nsublayers):
            w, b = lin(keys[2 + 2 * l], keys[3 + 2 * l], width, width)
            w_hid_l.append(w)
            b_hid_l.append(b)
        w_hid = jnp.stack(w_hid_l)                        # (L, width, width)
        b_hid = jnp.stack(b_hid_l)                        # (L, 1, width)
    else:
        w_hid, b_hid = None, None                         # never allocated / DMA'd
    w_out, b_out = lin(keys[2 + 2 * nsublayers], keys[3 + 2 * nsublayers],
                       width, outdim)
    return (w_in, b_in, w_hid, b_hid, w_out, b_out)


def init_inn(key, n, d, nlayers, nsublayers, width):
    """Alternating UP / LOW layers starting with UP (matches INN.__init__, vp=True)."""
    layers = []
    ul = 'up'
    keys = jax.random.split(key, nlayers)
    for i in range(nlayers):
        if ul == 'up':
            layers.append(('up', init_fcnet(keys[i], n - d, d, nsublayers, width)))
        else:
            layers.append(('low', init_fcnet(keys[i], d, n - d, nsublayers, width)))
        ul = 'low' if ul == 'up' else 'up'
    return layers


# ---------------------------------------------------------------------------
# Pure-JAX reference (correctness check)
# ---------------------------------------------------------------------------
def _fcnet_ref(x, params, nsublayers):
    w_in, b_in, w_hid, b_hid, w_out, b_out = params
    h = jax.nn.sigmoid(x @ w_in + b_in)
    for l in range(nsublayers):
        h = jax.nn.sigmoid(h @ w_hid[l] + b_hid[l])
    return jax.nn.sigmoid(h @ w_out + b_out)


def inn_forward_ref(xy, layers, *, d, nsublayers):
    out = xy
    for ul, params in layers:
        x, y = out[:, :d], out[:, d:]
        if ul == 'up':
            out = jnp.concatenate([x + _fcnet_ref(y, params, nsublayers), y], axis=1)
        else:
            out = jnp.concatenate([x, y + _fcnet_ref(x, params, nsublayers)], axis=1)
    return out


if __name__ == "__main__":
    # Small shapes consistent with the module: n = total dim, d = split dim.
    # B chosen so the kernel exercises a 2-step grid plus a ragged final tile.
    B, n, d = 1000, 8, 4
    nlayers, nsublayers, width = 2, 1, 32

    key = jax.random.PRNGKey(0)
    k_x, k_p = jax.random.split(key)
    xy = jax.random.normal(k_x, (B, n), jnp.float32)

    layers = init_inn(k_p, n, d, nlayers, nsublayers, width)
    ref = inn_forward_ref(xy, layers, d=d, nsublayers=nsublayers)

    # f32 path (reference-matching numerics).
    out = inn_forward(xy, layers, d=d, nsublayers=nsublayers, tb=512)
    out = jax.block_until_ready(out)
    np.testing.assert_allclose(np.asarray(out), np.asarray(ref),
                               rtol=1e-4, atol=1e-4)

    # Fast path: bf16 MXU operands (f32 accumulation) + EUP sigmoid.
    out_fast = inn_forward(xy, layers, d=d, nsublayers=nsublayers, tb=512,
                           matmul_dtype=jnp.bfloat16, fast_sigmoid=True)
    out_fast = jax.block_until_ready(out_fast)
    np.testing.assert_allclose(np.asarray(out_fast), np.asarray(ref),
                               rtol=5e-2, atol=5e-2)

    print("KERNEL_OK")
</pallas_src>

<mosaic_0001>
module attributes {stable_mosaic.version = 11 : i64} {
  func.func @_inn_kernel(%arg0: i32, %arg1: memref<512x8xf32, #tpu.memory_space<vmem>>, %arg2: memref<2x32x8xf32, #tpu.memory_space<vmem>>, %arg3: memref<2x32x1xf32, #tpu.memory_space<vmem>>, %arg4: memref<2x1x32x32xf32, #tpu.memory_space<vmem>>, %arg5: memref<2x1x32x1xf32, #tpu.memory_space<vmem>>, %arg6: memref<2x32x8xf32, #tpu.memory_space<vmem>>, %arg7: memref<2x1x8xf32, #tpu.memory_space<vmem>>, %arg8: memref<512x8xf32, #tpu.memory_space<vmem>>) attributes {dimension_semantics = [#tpu.dimension_semantics<parallel>], iteration_bounds = array<i64: 2>, scalar_prefetch = 0 : i64, scratch_operands = 0 : i64, tpu.core_type = #tpu.core_type<tc>, window_params = [{transform_indices = @transform_0, window_bounds = array<i64: 512, 8>}, {pipeline_mode = #tpu.pipeline_mode<synchronous>, transform_indices = @transform_1, window_bounds = array<i64: 2, 32, 8>}, {pipeline_mode = #tpu.pipeline_mode<synchronous>, transform_indices = @transform_2, window_bounds = array<i64: 2, 32, 1>}, {pipeline_mode = #tpu.pipeline_mode<synchronous>, transform_indices = @transform_3, window_bounds = array<i64: 2, 1, 32, 32>}, {pipeline_mode = #tpu.pipeline_mode<synchronous>, transform_indices = @transform_4, window_bounds = array<i64: 2, 1, 32, 1>}, {pipeline_mode = #tpu.pipeline_mode<synchronous>, transform_indices = @transform_5, window_bounds = array<i64: 2, 32, 8>}, {pipeline_mode = #tpu.pipeline_mode<synchronous>, transform_indices = @transform_6, window_bounds = array<i64: 2, 1, 8>}, {transform_indices = @transform_7, window_bounds = array<i64: 512, 8>}]} {
    %c0 = arith.constant 0 : index
    %c0_0 = arith.constant 0 : index
    %0 = vector.load %arg1[%c0, %c0_0] : memref<512x8xf32, #tpu.memory_space<vmem>>, vector<512x8xf32>
    %1 = tpu.iota {dimensions = array<i32: 1>} : vector<1x8xi32>
    %c4_i32 = arith.constant 4 : i32
    %2 = vector.broadcast %c4_i32 : i32 to vector<1x8xi32>
    %3 = arith.cmpi slt, %1, %2 : vector<1x8xi32>
    %4 = arith.extui %3 : vector<1x8xi1> to vector<1x8xi32>
    %5 = arith.sitofp %4 : vector<1x8xi32> to vector<1x8xf32>
    %cst = arith.constant 1.000000e+00 : f32
    %6 = vector.broadcast %cst : f32 to vector<1x8xf32>
    %7 = arith.subf %6, %5 : vector<1x8xf32>
    %c0_1 = arith.constant 0 : index
    %c0_2 = arith.constant 0 : index
    %c0_3 = arith.constant 0 : index
    %8 = vector.load %arg2[%c0_1, %c0_2, %c0_3] : memref<2x32x8xf32, #tpu.memory_space<vmem>>, vector<1x32x8xf32>
    %9 = vector.shape_cast %8 : vector<1x32x8xf32> to vector<32x8xf32>
    %cst_4 = arith.constant dense<0.000000e+00> : vector<32x512xf32>
    %10 = tpu.matmul %9, %0, %cst_4 {dimension_numbers = #tpu.dot_dimension_numbers<[1], [1], [0], [0], [0, 0, 1, 0], [], []>} : vector<32x8xf32>, vector<512x8xf32>, vector<32x512xf32> -> vector<32x512xf32>
    %c0_5 = arith.constant 0 : index
    %c0_6 = arith.constant 0 : index
    %c0_7 = arith.constant 0 : index
    %11 = vector.load %arg3[%c0_5, %c0_6, %c0_7] : memref<2x32x1xf32, #tpu.memory_space<vmem>>, vector<1x32x1xf32>
    %12 = vector.shape_cast %11 : vector<1x32x1xf32> to vector<32x1xf32>
    %13 = vector.broadcast %12 : vector<32x1xf32> to vector<32x512xf32>
    %14 = arith.addf %10, %13 : vector<32x512xf32>
    %15 = arith.negf %14 : vector<32x512xf32>
    %16 = math.exp %15 : vector<32x512xf32>
    %cst_8 = arith.constant 1.000000e+00 : f32
    %17 = vector.broadcast %cst_8 : f32 to vector<32x512xf32>
    %18 = arith.addf %17, %16 : vector<32x512xf32>
    %19 = arith.divf %17, %18 : vector<32x512xf32>
    %c0_9 = arith.constant 0 : index
    %c0_10 = arith.constant 0 : index
    %c0_11 = arith.constant 0 : index
    %c0_12 = arith.constant 0 : index
    %20 = vector.load %arg4[%c0_9, %c0_10, %c0_11, %c0_12] : memref<2x1x32x32xf32, #tpu.memory_space<vmem>>, vector<1x1x32x32xf32>
    %21 = vector.shape_cast %20 : vector<1x1x32x32xf32> to vector<32x32xf32>
    %cst_13 = arith.constant dense<0.000000e+00> : vector<32x512xf32>
    %22 = tpu.matmul %21, %19, %cst_13 {dimension_numbers = #tpu.dot_dimension_numbers<[1], [0], [0], [1], [0, 0, 1, 1], [], []>} : vector<32x32xf32>, vector<32x512xf32>, vector<32x512xf32> -> vector<32x512xf32>
    %c0_14 = arith.constant 0 : index
    %c0_15 = arith.constant 0 : index
    %c0_16 = arith.constant 0 : index
    %c0_17 = arith.constant 0 : index
    %23 = vector.load %arg5[%c0_14, %c0_15, %c0_16, %c0_17] : memref<2x1x32x1xf32, #tpu.memory_space<vmem>>, vector<1x1x32x1xf32>
    %24 = vector.shape_cast %23 : vector<1x1x32x1xf32> to vector<32x1xf32>
    %25 = vector.broadcast %24 : vector<32x1xf32> to vector<32x512xf32>
    %26 = arith.addf %22, %25 : vector<32x512xf32>
    %27 = arith.negf %26 : vector<32x512xf32>
    %28 = math.exp %27 : vector<32x512xf32>
    %cst_18 = arith.constant 1.000000e+00 : f32
    %29 = vector.broadcast %cst_18 : f32 to vector<32x512xf32>
    %30 = arith.addf %29, %28 : vector<32x512xf32>
    %31 = arith.divf %29, %30 : vector<32x512xf32>
    %32 = tpu.transpose %31, [1, 0] : vector<32x512xf32> -> vector<512x32xf32>
    %c0_19 = arith.constant 0 : index
    %c0_20 = arith.constant 0 : index
    %c0_21 = arith.constant 0 : index
    %33 = vector.load %arg6[%c0_19, %c0_20, %c0_21] : memref<2x32x8xf32, #tpu.memory_space<vmem>>, vector<1x32x8xf32>
    %34 = vector.shape_cast %33 : vector<1x32x8xf32> to vector<32x8xf32>
    %cst_22 = arith.constant dense<0.000000e+00> : vector<512x8xf32>
    %35 = tpu.matmul %32, %34, %cst_22 {dimension_numbers = #tpu.dot_dimension_numbers<[1], [0], [0], [1], [0, 0, 1, 1], [], []>} : vector<512x32xf32>, vector<32x8xf32>, vector<512x8xf32> -> vector<512x8xf32>
    %c0_23 = arith.constant 0 : index
    %c0_24 = arith.constant 0 : index
    %c0_25 = arith.constant 0 : index
    %36 = vector.load %arg7[%c0_23, %c0_24, %c0_25] : memref<2x1x8xf32, #tpu.memory_space<vmem>>, vector<1x1x8xf32>
    %37 = vector.shape_cast %36 : vector<1x1x8xf32> to vector<1x8xf32>
    %38 = vector.broadcast %37 : vector<1x8xf32> to vector<512x8xf32>
    %39 = arith.addf %35, %38 : vector<512x8xf32>
    %40 = arith.negf %39 : vector<512x8xf32>
    %41 = math.exp %40 : vector<512x8xf32>
    %cst_26 = arith.constant 1.000000e+00 : f32
    %42 = vector.broadcast %cst_26 : f32 to vector<512x8xf32>
    %43 = arith.addf %42, %41 : vector<512x8xf32>
    %44 = arith.divf %42, %43 : vector<512x8xf32>
    %45 = vector.broadcast %5 : vector<1x8xf32> to vector<512x8xf32>
    %46 = arith.mulf %45, %44 : vector<512x8xf32>
    %47 = arith.addf %0, %46 : vector<512x8xf32>
    %c1 = arith.constant 1 : index
    %c0_27 = arith.constant 0 : index
    %c0_28 = arith.constant 0 : index
    %48 = vector.load %arg2[%c1, %c0_27, %c0_28] : memref<2x32x8xf32, #tpu.memory_space<vmem>>, vector<1x32x8xf32>
    %49 = vector.shape_cast %48 : vector<1x32x8xf32> to vector<32x8xf32>
    %cst_29 = arith.constant dense<0.000000e+00> : vector<32x512xf32>
    %50 = tpu.matmul %49, %47, %cst_29 {dimension_numbers = #tpu.dot_dimension_numbers<[1], [1], [0], [0], [0, 0, 1, 0], [], []>} : vector<32x8xf32>, vector<512x8xf32>, vector<32x512xf32> -> vector<32x512xf32>
    %c1_30 = arith.constant 1 : index
    %c0_31 = arith.constant 0 : index
    %c0_32 = arith.constant 0 : index
    %51 = vector.load %arg3[%c1_30, %c0_31, %c0_32] : memref<2x32x1xf32, #tpu.memory_space<vmem>>, vector<1x32x1xf32>
    %52 = vector.shape_cast %51 : vector<1x32x1xf32> to vector<32x1xf32>
    %53 = vector.broadcast %52 : vector<32x1xf32> to vector<32x512xf32>
    %54 = arith.addf %50, %53 : vector<32x512xf32>
    %55 = arith.negf %54 : vector<32x512xf32>
    %56 = math.exp %55 : vector<32x512xf32>
    %cst_33 = arith.constant 1.000000e+00 : f32
    %57 = vector.broadcast %cst_33 : f32 to vector<32x512xf32>
    %58 = arith.addf %57, %56 : vector<32x512xf32>
    %59 = arith.divf %57, %58 : vector<32x512xf32>
    %c1_34 = arith.constant 1 : index
    %c0_35 = arith.constant 0 : index
    %c0_36 = arith.constant 0 : index
    %c0_37 = arith.constant 0 : index
    %60 = vector.load %arg4[%c1_34, %c0_35, %c0_36, %c0_37] : memref<2x1x32x32xf32, #tpu.memory_space<vmem>>, vector<1x1x32x32xf32>
    %61 = vector.shape_cast %60 : vector<1x1x32x32xf32> to vector<32x32xf32>
    %cst_38 = arith.constant dense<0.000000e+00> : vector<32x512xf32>
    %62 = tpu.matmul %61, %59, %cst_38 {dimension_numbers = #tpu.dot_dimension_numbers<[1], [0], [0], [1], [0, 0, 1, 1], [], []>} : vector<32x32xf32>, vector<32x512xf32>, vector<32x512xf32> -> vector<32x512xf32>
    %c1_39 = arith.constant 1 : index
    %c0_40 = arith.constant 0 : index
    %c0_41 = arith.constant 0 : index
    %c0_42 = arith.constant 0 : index
    %63 = vector.load %arg5[%c1_39, %c0_40, %c0_41, %c0_42] : memref<2x1x32x1xf32, #tpu.memory_space<vmem>>, vector<1x1x32x1xf32>
    %64 = vector.shape_cast %63 : vector<1x1x32x1xf32> to vector<32x1xf32>
    %65 = vector.broadcast %64 : vector<32x1xf32> to vector<32x512xf32>
    %66 = arith.addf %62, %65 : vector<32x512xf32>
    %67 = arith.negf %66 : vector<32x512xf32>
    %68 = math.exp %67 : vector<32x512xf32>
    %cst_43 = arith.constant 1.000000e+00 : f32
    %69 = vector.broadcast %cst_43 : f32 to vector<32x512xf32>
    %70 = arith.addf %69, %68 : vector<32x512xf32>
    %71 = arith.divf %69, %70 : vector<32x512xf32>
    %72 = tpu.transpose %71, [1, 0] : vector<32x512xf32> -> vector<512x32xf32>
    %c1_44 = arith.constant 1 : index
    %c0_45 = arith.constant 0 : index
    %c0_46 = arith.constant 0 : index
    %73 = vector.load %arg6[%c1_44, %c0_45, %c0_46] : memref<2x32x8xf32, #tpu.memory_space<vmem>>, vector<1x32x8xf32>
    %74 = vector.shape_cast %73 : vector<1x32x8xf32> to vector<32x8xf32>
    %cst_47 = arith.constant dense<0.000000e+00> : vector<512x8xf32>
    %75 = tpu.matmul %72, %74, %cst_47 {dimension_numbers = #tpu.dot_dimension_numbers<[1], [0], [0], [1], [0, 0, 1, 1], [], []>} : vector<512x32xf32>, vector<32x8xf32>, vector<512x8xf32> -> vector<512x8xf32>
    %c1_48 = arith.constant 1 : index
    %c0_49 = arith.constant 0 : index
    %c0_50 = arith.constant 0 : index
    %76 = vector.load %arg7[%c1_48, %c0_49, %c0_50] : memref<2x1x8xf32, #tpu.memory_space<vmem>>, vector<1x1x8xf32>
    %77 = vector.shape_cast %76 : vector<1x1x8xf32> to vector<1x8xf32>
    %78 = vector.broadcast %77 : vector<1x8xf32> to vector<512x8xf32>
    %79 = arith.addf %75, %78 : vector<512x8xf32>
    %80 = arith.negf %79 : vector<512x8xf32>
    %81 = math.exp %80 : vector<512x8xf32>
    %cst_51 = arith.constant 1.000000e+00 : f32
    %82 = vector.broadcast %cst_51 : f32 to vector<512x8xf32>
    %83 = arith.addf %82, %81 : vector<512x8xf32>
    %84 = arith.divf %82, %83 : vector<512x8xf32>
    %85 = vector.broadcast %7 : vector<1x8xf32> to vector<512x8xf32>
    %86 = arith.mulf %85, %84 : vector<512x8xf32>
    %87 = arith.addf %47, %86 : vector<512x8xf32>
    %c0_52 = arith.constant 0 : index
    %c0_53 = arith.constant 0 : index
    %88 = vector.load %arg8[%c0_52, %c0_53] : memref<512x8xf32, #tpu.memory_space<vmem>>, vector<512x8xf32>
    tpu.vector_store %arg8[%c0_52, %c0_53], %87 {strides = array<i32>} : memref<512x8xf32, #tpu.memory_space<vmem>>, vector<512x8xf32>,
    return
  }
  func.func @transform_0(%arg0: i32) -> (i32, i32) {
    %c0_i32 = arith.constant 0 : i32
    %c0_i32_0 = arith.constant 0 : i32
    return %arg0, %c0_i32 : i32, i32
  }
  func.func @transform_1(%arg0: i32) -> (i32, i32, i32) {
    %c0_i32 = arith.constant 0 : i32
    %c0_i32_0 = arith.constant 0 : i32
    %c0_i32_1 = arith.constant 0 : i32
    %c0_i32_2 = arith.constant 0 : i32
    return %c0_i32, %c0_i32_0, %c0_i32_1 : i32, i32, i32
  }
  func.func @transform_2(%arg0: i32) -> (i32, i32, i32) {
    %c0_i32 = arith.constant 0 : i32
    %c0_i32_0 = arith.constant 0 : i32
    %c0_i32_1 = arith.constant 0 : i32
    %c0_i32_2 = arith.constant 0 : i32
    return %c0_i32, %c0_i32_0, %c0_i32_1 : i32, i32, i32
  }
  func.func @transform_3(%arg0: i32) -> (i32, i32, i32, i32) {
    %c0_i32 = arith.constant 0 : i32
    %c0_i32_0 = arith.constant 0 : i32
    %c0_i32_1 = arith.constant 0 : i32
    %c0_i32_2 = arith.constant 0 : i32
    %c0_i32_3 = arith.constant 0 : i32
    return %c0_i32, %c0_i32_0, %c0_i32_1, %c0_i32_2 : i32, i32, i32, i32
  }
  func.func @transform_4(%arg0: i32) -> (i32, i32, i32, i32) {
    %c0_i32 = arith.constant 0 : i32
    %c0_i32_0 = arith.constant 0 : i32
    %c0_i32_1 = arith.constant 0 : i32
    %c0_i32_2 = arith.constant 0 : i32
    %c0_i32_3 = arith.constant 0 : i32
    return %c0_i32, %c0_i32_0, %c0_i32_1, %c0_i32_2 : i32, i32, i32, i32
  }
  func.func @transform_5(%arg0: i32) -> (i32, i32, i32) {
    %c0_i32 = arith.constant 0 : i32
    %c0_i32_0 = arith.constant 0 : i32
    %c0_i32_1 = arith.constant 0 : i32
    %c0_i32_2 = arith.constant 0 : i32
    return %c0_i32, %c0_i32_0, %c0_i32_1 : i32, i32, i32
  }
  func.func @transform_6(%arg0: i32) -> (i32, i32, i32) {
    %c0_i32 = arith.constant 0 : i32
    %c0_i32_0 = arith.constant 0 : i32
    %c0_i32_1 = arith.constant 0 : i32
    %c0_i32_2 = arith.constant 0 : i32
    return %c0_i32, %c0_i32_0, %c0_i32_1 : i32, i32, i32
  }
  func.func @transform_7(%arg0: i32) -> (i32, i32) {
    %c0_i32 = arith.constant 0 : i32
    %c0_i32_0 = arith.constant 0 : i32
    return %arg0, %c0_i32 : i32, i32
  }
}

</mosaic_0001>

<bundles_post_ra>
// kernel: tpu_custom_call.1
= control target key start
LH: loop header
LB: loop body
LE: loop exit
PB: predicated region body
PF: predicated region fallthrough
CT: control target
= control target key end

     0   :  { %s7106_s24 = smov 0   ;;  %s7108_s25 = smov 0   ;;  %s8836_s0 = inlined_call_operand.vmem [shape: f32[1000,8], index: 0, kind: input, shape index: {}]   ;;  %s8837_s1 = inlined_call_operand.vmem [shape: f32[2,32,8], index: 1, kind: input, shape index: {}]   ;;  %s8838_s2 = inlined_call_operand.vmem [shape: f32[2,32,1], index: 2, kind: input, shape index: {}]   ;;  %s8839_s3 = inlined_call_operand.vmem [shape: f32[2,1,32,32], index: 3, kind: input, shape index: {}]   ;;  %s8840_s4 = inlined_call_operand.vmem [shape: f32[2,1,32,1], index: 4, kind: input, shape index: {}]   ;;  %s8841_s5 = inlined_call_operand.vmem [shape: f32[2,32,8], index: 5, kind: input, shape index: {}]   ;;  %s8842_s6 = inlined_call_operand.vmem [shape: f32[2,1,8], index: 6, kind: input, shape index: {}]   ;;  %s8843_s7 = inlined_call_operand.vmem [shape: f32[1000,8], index: 7, kind: output, shape index: {}]  }
   0x1   :  { %s7110_s26 = smov 0  }
   0x2 LB: > { %s7119_s27 = sadd.s32 4294967295, %s7030_s26   ;;  %s7121_s28 = sadd.s32 1, %s7030_s26   ;;  %s7030_s26 = sphi %s7110_s26, %s8942_s26   ;;  %s7026_s25 = sphi %s7108_s25, %s8941_s25   ;;  %s7022_s24 = sphi %s7106_s24, %s8940_s24  }
   0x3   : > { %s173_s29 = ssub.s32 %s7030_s26, %s7121_s28  ;;  %s176_s30 = sadd.s32 1, %s7026_s25 }
   0x4   : > { %p174_p0 = scmp.eq.s32.totalorder %s173_s29, 0  ;;  %p186_p1 = scmp.ne.s32.totalorder %s7026_s25, %s7022_s24 }
   0x5   : > { %p187_p2 = scmp.eq.s32.totalorder %s7119_s27, 1  ;;  %p5009_p3 = scmp.ge.s32.totalorder %s7030_s26, 1 }
   0x6   : > { %s7129_s8 = scalar_select %p174_p0, %s7026_s25, %s176_s30  }
   0x7   : > { %p7131_p4 = por %p187_p2, %p186_p1  ;;  %p246_p5 = scmp.lt.s32.totalorder %s7030_s26, 3 }
   0x9   : > { %p247_p6 = pnand %p5009_p3, %p246_p5 }
   0xb   : > { %250 = sbr.rel (%p247_p6) target bundleno = 2134 (0x856), region = 48 }
  0x10   : > { %s7136_s10 = sshll.u32 %s7119_s27, 6  ;;  %vm398_vm0 = vcmask 64512   ;;  %v7141_v0 = vld [vmem:[%s8837_s1] sm:$0xff]  ;;  %v375_v1 = vld [vmem:[%s8838_s2 + $0x8] sm:$0xff]  ;;  %v377_v2 = vld [vmem:[%s8838_s2 + $0x18] sm:$0xff]  ;;  %v7064_v3 = vmov 0  }
  0x11   : > { %p286_p7 = scmp.lt.s32.totalorder %s7136_s10, 124  ;;  %5569 = vmatprep.mubr.msk.f32.mxu0 %vm398_vm0, %v7141_v0  ;;  %5609 = vmatprep.mubr.msk.f32.mxu1 %vm398_vm0, %v7141_v0  ;;  %v374_v4 = vld [vmem:[%s8838_s2] sm:$0xff]  ;;  %v376_v5 = vld [vmem:[%s8838_s2 + $0x10] sm:$0xff]  ;;  %v882_v7 = vld [vmem:[%s8840_s4 + $0x8] sm:$0xff]  ;;  %vm905_vm1 = vcmask 261120   ;;  %s278_s11 = sand.u32 1, %s7022_s24  }
  0x12   : > { %6140 = vset.pattern.permute.xlu1 %v7064_v3  ;;  %6139 = vset.pattern.permute.xlu0 %v7064_v3  ;;  %v881_v6 = vld [vmem:[%s8840_s4] sm:$0xff]  ;;  %v883_v18 = vld [vmem:[%s8840_s4 + $0x10] sm:$0xff]  ;;  %v884_v19 = vld [vmem:[%s8840_s4 + $0x18] sm:$0xff]  ;;  %s5010_s12 = sshll.u32 %s278_s11, 9  ;;  %s4546_s15 = ssub.s32 (%p7131_p4), 125, %s7136_s10 }
  0x13   : > { %s287_s17 = scalar_select %p286_p7, %s7136_s10, 124  ;;  %385 = vperm.xlu1 %6140, %v375_v1   ;;  %395 = vperm.xlu0 %6139, %v377_v2  }
  0x14   : > { %s8316_s24 = scalar_lea.vmem [#allocation2], %s5010_s12   ;;  %s5534_s16 = sshll.u32 (%p7131_p4), %s7119_s27, 9 }
  0x15   : > { %s5012_s22 = sshll.u32 %s287_s17, 3  ;;  %p4547_p8 = scmp.lt.s32.totalorder (%p7131_p4), %s4546_s15, 64 }
  0x16   : > { %s7164_s29 = scalar_lea.vmem %s8836_s0, %s5012_s22  ;;  %s8637_s19 = scalar_lea.vmem (%p7131_p4), %s8843_s7, %s5534_s16  }
  0x17   : > { %v331_v8 = vld [vmem:[%s7164_s29 + $0xf8] sm:$0xff]  ;;  %380 = vperm.xlu1 %6140, %v374_v4   ;;  %390 = vperm.xlu0 %6139, %v376_v5   ;;  %v330_v12 = vld [vmem:[%s7164_s29 + $0xf0] sm:$0xff]  ;;  %v329_v16 = vld [vmem:[%s7164_s29 + $0xe8] sm:$0xff] }
  0x18   : > { %v363_v9 = vld [vmem:[%s7164_s29 + $0x1f8] sm:$0xff]  ;;  %5537 = vmatprep.subr.msk.mxu0 %vm398_vm0, %v331_v8  ;;  %v362_v13 = vld [vmem:[%s7164_s29 + $0x1f0] sm:$0xff]  ;;  %v361_v17 = vld [vmem:[%s7164_s29 + $0x1e8] sm:$0xff] }
  0x19   : > { %v315_v10 = vld [vmem:[%s7164_s29 + $0x78] sm:$0xff]  ;;  %5577 = vmatprep.subr.msk.mxu1 %vm398_vm0, %v363_v9  ;;  %v314_v14 = vld [vmem:[%s7164_s29 + $0x70] sm:$0xff]  ;;  %v313_v20 = vld [vmem:[%s7164_s29 + $0x68] sm:$0xff] }
  0x1a   : > { %v347_v11 = vld [vmem:[%s7164_s29 + $0x178] sm:$0xff]  ;;  %5538 = vmatpush3.xpose.msk.msra.mxu0 %vm398_vm0, %v315_v10  ;;  %v346_v15 = vld [vmem:[%s7164_s29 + $0x170] sm:$0xff]  ;;  %v345_v21 = vld [vmem:[%s7164_s29 + $0x168] sm:$0xff] }
  0x1b   : > { %5578 = vmatpush3.xpose.msk.msra.mxu1 %vm398_vm0, %v347_v11  ;;  %5539 = vmatprep.subr.msk.mxu0 %vm398_vm0, %v330_v12  ;;  %v328_v22 = vld [vmem:[%s7164_s29 + $0xe0] sm:$0xff]  ;;  %v327_v26 = vld [vmem:[%s7164_s29 + $0xd8] sm:$0xff]  ;;  %v326_v30 = vld [vmem:[%s7164_s29 + $0xd0] sm:$0xff] }
  0x1c   : > { %5579 = vmatprep.subr.msk.mxu1 %vm398_vm0, %v362_v13  ;;  %887 = vperm.xlu0 %6139, %v881_v6   ;;  %v360_v23 = vld [vmem:[%s7164_s29 + $0x1e0] sm:$0xff]  ;;  %v359_v27 = vld [vmem:[%s7164_s29 + $0x1d8] sm:$0xff]  ;;  %v358_v31 = vld [vmem:[%s7164_s29 + $0x1d0] sm:$0xff]  ;;  %v8844_v13 = vmov 0.0  }
  0x1d   : > { %892 = vperm.xlu1 %6140, %v882_v7   ;;  %v312_v24 = vld [vmem:[%s7164_s29 + $0x60] sm:$0xff]  ;;  %v311_v28 = vld [vmem:[%s7164_s29 + $0x58] sm:$0xff]  ;;  %v310_v32 = vld [vmem:[%s7164_s29 + $0x50] sm:$0xff] }
  0x1e   : > { %5540 = vmatpush3.xpose.msk.msra.mxu0 %vm398_vm0, %v314_v14  ;;  %v344_v25 = vld [vmem:[%s7164_s29 + $0x160] sm:$0xff]  ;;  %v343_v29 = vld [vmem:[%s7164_s29 + $0x158] sm:$0xff]  ;;  %v342_v33 = vld [vmem:[%s7164_s29 + $0x150] sm:$0xff] }
  0x1f   : > { %5580 = vmatpush3.xpose.msk.msra.mxu1 %vm398_vm0, %v346_v15  ;;  %5541 = vmatprep.subr.msk.mxu0 %vm398_vm0, %v329_v16  ;;  %v325_v34 = vld [vmem:[%s7164_s29 + $0xc8] sm:$0xff]  ;;  %v324_v38 = vld [vmem:[%s7164_s29 + $0xc0] sm:$0xff]  ;;  %v323_v42 = vld [vmem:[%s7164_s29 + $0xb8] sm:$0xff] }
  0x20   : > { %5581 = vmatprep.subr.msk.mxu1 %vm398_vm0, %v361_v17  ;;  %897 = vperm.xlu0 %6139, %v883_v18   ;;  %v357_v35 = vld [vmem:[%s7164_s29 + $0x1c8] sm:$0xff]  ;;  %v356_v39 = vld [vmem:[%s7164_s29 + $0x1c0] sm:$0xff]  ;;  %v355_v43 = vld [vmem:[%s7164_s29 + $0x1b8] sm:$0xff] }
  0x21   : > { %902 = vperm.xlu1 %6140, %v884_v19   ;;  %v309_v36 = vld [vmem:[%s7164_s29 + $0x48] sm:$0xff]  ;;  %v308_v40 = vld [vmem:[%s7164_s29 + $0x40] sm:$0xff]  ;;  %v307_v44 = vld [vmem:[%s7164_s29 + $0x38] sm:$0xff] }
  0x22   : > { %5542 = vmatpush3.xpose.msk.msra.mxu0 %vm398_vm0, %v313_v20  ;;  %v341_v37 = vld [vmem:[%s7164_s29 + $0x148] sm:$0xff]  ;;  %v340_v41 = vld [vmem:[%s7164_s29 + $0x140] sm:$0xff]  ;;  %v339_v45 = vld [vmem:[%s7164_s29 + $0x138] sm:$0xff] }
  0x23   : > { %5582 = vmatpush3.xpose.msk.msra.mxu1 %vm398_vm0, %v345_v21  ;;  %5543 = vmatprep.subr.msk.mxu0 %vm398_vm0, %v328_v22  ;;  %v322_v46 = vld [vmem:[%s7164_s29 + $0xb0] sm:$0xff]  ;;  %v321_v50 = vld [vmem:[%s7164_s29 + $0xa8] sm:$0xff]  ;;  %v320_v54 = vld [vmem:[%s7164_s29 + $0xa0] sm:$0xff] }
  0x24   : > { %5583 = vmatprep.subr.msk.mxu1 %vm398_vm0, %v360_v23  ;;  %v354_v47 = vld [vmem:[%s7164_s29 + $0x1b0] sm:$0xff]  ;;  %v353_v51 = vld [vmem:[%s7164_s29 + $0x1a8] sm:$0xff]  ;;  %v352_v55 = vld [vmem:[%s7164_s29 + $0x1a0] sm:$0xff] }
  0x25   : > { %v306_v48 = vld [vmem:[%s7164_s29 + $0x30] sm:$0xff]  ;;  %v305_v52 = vld [vmem:[%s7164_s29 + $0x28] sm:$0xff]  ;;  %v304_v56 = vld [vmem:[%s7164_s29 + $0x20] sm:$0xff] }
  0x26   : > { %5544 = vmatpush3.xpose.msk.msra.mxu0 %vm398_vm0, %v312_v24  ;;  %v338_v49 = vld [vmem:[%s7164_s29 + $0x130] sm:$0xff]  ;;  %v337_v53 = vld [vmem:[%s7164_s29 + $0x128] sm:$0xff]  ;;  %v336_v57 = vld [vmem:[%s7164_s29 + $0x120] sm:$0xff] }
  0x27   : > { %5584 = vmatpush3.xpose.msk.msra.mxu1 %vm398_vm0, %v344_v25  ;;  %5545 = vmatprep.subr.msk.mxu0 %vm398_vm0, %v327_v26  ;;  %v319_v58 = vld [vmem:[%s7164_s29 + $0x98] sm:$0xff]  ;;  %v318_v62 = vld [vmem:[%s7164_s29 + $0x90] sm:$0xff]  ;;  %v317_v3 = vld [vmem:[%s7164_s29 + $0x88] sm:$0xff] }
  0x28   : > { %5585 = vmatprep.subr.msk.mxu1 %vm398_vm0, %v359_v27  ;;  %v351_v59 = vld [vmem:[%s7164_s29 + $0x198] sm:$0xff]  ;;  %v350_v63 = vld [vmem:[%s7164_s29 + $0x190] sm:$0xff]  ;;  %v349_v4 = vld [vmem:[%s7164_s29 + $0x188] sm:$0xff] }
  0x29   : > { %v303_v60 = vld [vmem:[%s7164_s29 + $0x18] sm:$0xff]  ;;  %v302_v1 = vld [vmem:[%s7164_s29 + $0x10] sm:$0xff]  ;;  %v301_v5 = vld [vmem:[%s7164_s29 + $0x8] sm:$0xff] }
  0x2a   : > { %5546 = vmatpush3.xpose.msk.msra.mxu0 %vm398_vm0, %v311_v28  ;;  %v335_v61 = vld [vmem:[%s7164_s29 + $0x118] sm:$0xff]  ;;  %v334_v2 = vld [vmem:[%s7164_s29 + $0x110] sm:$0xff]  ;;  %v333_v6 = vld [vmem:[%s7164_s29 + $0x108] sm:$0xff] }
  0x2b   : > { %5586 = vmatpush3.xpose.msk.msra.mxu1 %vm398_vm0, %v343_v29  ;;  %5547 = vmatprep.subr.msk.mxu0 %vm398_vm0, %v326_v30  ;;  %v316_v7 = vld [vmem:[%s7164_s29 + $0x80] sm:$0xff]  ;;  %v371_v11 = vld [vmem:[%s8837_s1 + $0x8] sm:$0xff]  ;;  %v372_v12 = vld [vmem:[%s8837_s1 + $0x10] sm:$0xff] }
  0x2c   : > { %5587 = vmatprep.subr.msk.mxu1 %vm398_vm0, %v358_v31  ;;  %v348_v8 = vld [vmem:[%s7164_s29 + $0x180] sm:$0xff] }
  0x2d   : > { %v300_v9 = vld [vmem:[%s7164_s29] sm:$0xff] }
  0x2e   : > { %5548 = vmatpush3.xpose.msk.msra.mxu0 %vm398_vm0, %v310_v32  ;;  %v332_v10 = vld [vmem:[%s7164_s29 + $0x100] sm:$0xff] }
  0x2f   : > { %5588 = vmatpush3.xpose.msk.msra.mxu1 %vm398_vm0, %v342_v33  ;;  %5549 = vmatprep.subr.msk.mxu0 %vm398_vm0, %v325_v34 }
  0x30   : > { %5589 = vmatprep.subr.msk.mxu1 %vm398_vm0, %v357_v35 }
  0x32   : > { %5550 = vmatpush3.xpose.msk.msra.mxu0 %vm398_vm0, %v309_v36 }
  0x33   : > { %5590 = vmatpush3.xpose.msk.msra.mxu1 %vm398_vm0, %v341_v37  ;;  %5551 = vmatprep.subr.msk.mxu0 %vm398_vm0, %v324_v38 }
  0x34   : > { %5591 = vmatprep.subr.msk.mxu1 %vm398_vm0, %v356_v39 }
  0x36   : > { %5552 = vmatpush3.xpose.msk.msra.mxu0 %vm398_vm0, %v308_v40 }
  0x37   : > { %5592 = vmatpush3.xpose.msk.msra.mxu1 %vm398_vm0, %v340_v41  ;;  %5553 = vmatprep.subr.msk.mxu0 %vm398_vm0, %v323_v42 }
  0x38   : > { %5593 = vmatprep.subr.msk.mxu1 %vm398_vm0, %v355_v43 }
  0x3a   : > { %5554 = vmatpush3.xpose.msk.msra.mxu0 %vm398_vm0, %v307_v44 }
  0x3b   : > { %5594 = vmatpush3.xpose.msk.msra.mxu1 %vm398_vm0, %v339_v45  ;;  %5555 = vmatprep.subr.msk.mxu0 %vm398_vm0, %v322_v46 }
  0x3c   : > { %5595 = vmatprep.subr.msk.mxu1 %vm398_vm0, %v354_v47 }
  0x3e   : > { %5556 = vmatpush3.xpose.msk.msra.mxu0 %vm398_vm0, %v306_v48 }
  0x3f   : > { %5596 = vmatpush3.xpose.msk.msra.mxu1 %vm398_vm0, %v338_v49  ;;  %5557 = vmatprep.subr.msk.mxu0 %vm398_vm0, %v321_v50 }
  0x40   : > { %5597 = vmatprep.subr.msk.mxu1 %vm398_vm0, %v353_v51 }
  0x42   : > { %5558 = vmatpush3.xpose.msk.msra.mxu0 %vm398_vm0, %v305_v52 }
  0x43   : > { %5598 = vmatpush3.xpose.msk.msra.mxu1 %vm398_vm0, %v337_v53  ;;  %5559 = vmatprep.subr.msk.mxu0 %vm398_vm0, %v320_v54 }
  0x44   : > { %5599 = vmatprep.subr.msk.mxu1 %vm398_vm0, %v352_v55 }
  0x46   : > { %5560 = vmatpush3.xpose.msk.msra.mxu0 %vm398_vm0, %v304_v56 }
  0x47   : > { %5600 = vmatpush3.xpose.msk.msra.mxu1 %vm398_vm0, %v336_v57  ;;  %5561 = vmatprep.subr.msk.mxu0 %vm398_vm0, %v319_v58 }
  0x48   : > { %5601 = vmatprep.subr.msk.mxu1 %vm398_vm0, %v351_v59 }
  0x4a   : > { %5562 = vmatpush3.xpose.msk.msra.mxu0 %vm398_vm0, %v303_v60 }
  0x4b   : > { %5602 = vmatpush3.xpose.msk.msra.mxu1 %vm398_vm0, %v335_v61  ;;  %5563 = vmatprep.subr.msk.mxu0 %vm398_vm0, %v318_v62 }
  0x4c   : > { %5603 = vmatprep.subr.msk.mxu1 %vm398_vm0, %v350_v63 }
  0x4e   : > { %5564 = vmatpush3.xpose.msk.msra.mxu0 %vm398_vm0, %v302_v1 }
  0x4f   : > { %5604 = vmatpush3.xpose.msk.msra.mxu1 %vm398_vm0, %v334_v2  ;;  %5565 = vmatprep.subr.msk.mxu0 %vm398_vm0, %v317_v3 }
  0x50   : > { %5605 = vmatprep.subr.msk.mxu1 %vm398_vm0, %v349_v4 }
  0x52   : > { %5566 = vmatpush3.xpose.msk.msra.mxu0 %vm398_vm0, %v301_v5 }
  0x53   : > { %5606 = vmatpush3.xpose.msk.msra.mxu1 %vm398_vm0, %v333_v6  ;;  %5567 = vmatprep.subr.msk.mxu0 %vm398_vm0, %v316_v7 }
  0x54   : > { %5607 = vmatprep.subr.msk.mxu1 %vm398_vm0, %v348_v8 }
  0x56   : > { %5568 = vmatpush3.xpose.msk.msra.mxu0 %vm398_vm0, %v300_v9 }
  0x57   : > { %5608 = vmatpush3.xpose.msk.msra.mxu1 %vm398_vm0, %v332_v10 }
  0x59   : > { %5570 = vmatmul.mubr.msk.f32.vlgmr.msra.gmra.mxu0 %vm398_vm0, %v7141_v0 }
  0x5a   : > { %5610 = vmatmul.mubr.msk.f32.vlgmr.msra.gmra.mxu1 %vm398_vm0, %v7141_v0  ;;  %5571 = vmatprep.mubr.msk.f32.mxu0 %vm398_vm0, %v371_v11  ;;  %v373_v0 = vld [vmem:[%s8837_s1 + $0x18] sm:$0xff] }
  0x5b   : > { %5611 = vmatprep.mubr.msk.f32.mxu1 %vm398_vm0, %v371_v11 }
  0x5d   : > { %5572 = vmatmul.mubr.msk.f32.gmra.mxu0 %vm398_vm0, %v371_v11 }
  0x5e   : > { %5612 = vmatmul.mubr.msk.f32.gmra.mxu1 %vm398_vm0, %v371_v11  ;;  %5573 = vmatprep.mubr.msk.f32.mxu0 %vm398_vm0, %v372_v12 }
  0x5f   : > { %5613 = vmatprep.mubr.msk.f32.mxu1 %vm398_vm0, %v372_v12 }
  0x61   : > { %5574 = vmatmul.mubr.msk.f32.gmra.mxu0 %vm398_vm0, %v372_v12 }
  0x62   : > { %5614 = vmatmul.mubr.msk.f32.gmra.mxu1 %vm398_vm0, %v372_v12  ;;  %5575 = vmatprep.mubr.msk.f32.mxu0 %vm398_vm0, %v373_v0 }
  0x63   : > { %5615 = vmatprep.mubr.msk.f32.mxu1 %vm398_vm0, %v373_v0 }
  0x65   : > { %5576 = vmatmul.mubr.msk.f32.gmra.mxu0 %vm398_vm0, %v373_v0 }
  0x66   : > { %5616 = vmatmul.mubr.msk.f32.gmra.mxu1 %vm398_vm0, %v373_v0  ;;  %982 = vmatprep.mubr.f32.mxu0 %v8844_v13 }
  0x67   : > { %1071 = vmatprep.mubr.f32.mxu1 %v8844_v13 }
  0x8e   : > { %v386_v14 = vpop.permute.xlu1 %385  ;;  %v396_v18 = vpop.permute.xlu0 %395 }
  0x92   : > { %v381_v15 = vpop.permute.xlu1 %380  ;;  %v391_v30 = vpop.permute.xlu0 %390 }
 0x119   : > { %v669_v16 = vpop.f32.mrf.mxu0 }
 0x11a   : > { %v758_v17 = vpop.f32.mrf.mxu1  ;;  %v670_v19 = vadd.f32 %v669_v16, %v381_v15 }
 0x11b   : > { %v671_v20 = vpop.f32.mrf.mxu0  ;;  %v759_v52 = vadd.f32 %v758_v17, %v381_v15 }
 0x11c   : > { %v760_v21 = vpop.f32.mrf.mxu1  ;;  %v672_v22 = vadd.f32 %v671_v20, %v381_v15  ;;  %v5086_v23 = vmul.f32 -1.442695, %v670_v19 }
 0x11d   : > { %v675_v24 = vpop.f32.mrf.mxu0  ;;  %v761_v53 = vadd.f32 %v760_v21, %v381_v15  ;;  %v5088_v2 = vmul.f32 -1.442695, %v759_v52  ;;  %v878_v52 = vld [vmem:[%s8839_s3 + $0x8] sm:$0xff] }
 0x11e   : > { %v764_v25 = vpop.f32.mrf.mxu1  ;;  %v5087_v26 = vmul.f32 -1.442695, %v672_v22  ;;  %v676_v27 = vadd.f32 %v675_v24, %v386_v14  ;;  %6141 = vpow2.f32 %v5086_v23 }
 0x11f   : > { %v677_v28 = vpop.f32.mrf.mxu0  ;;  %v765_v45 = vadd.f32 %v764_v25, %v386_v14  ;;  %v5089_v1 = vmul.f32 -1.442695, %v761_v53  ;;  %v879_v53 = vld [vmem:[%s8839_s3 + $0x10] sm:$0xff] }
 0x120   : > { %v766_v29 = vpop.f32.mrf.mxu1  ;;  %v5090_v31 = vmul.f32 -1.442695, %v676_v27  ;;  %v678_v32 = vadd.f32 %v677_v28, %v386_v14  ;;  %6143 = vpow2.f32 %v5087_v26 }
 0x121   : > { %v767_v33 = vadd.f32 %v766_v29, %v386_v14  ;;  %v681_v34 = vpop.f32.mrf.mxu0  ;;  %v5092_v61 = vmul.f32 -1.442695, %v765_v45 }
 0x122   : > { %v770_v35 = vpop.f32.mrf.mxu1  ;;  %v5091_v36 = vmul.f32 -1.442695, %v678_v32  ;;  %v682_v38 = vadd.f32 %v681_v34, %v391_v30  ;;  %6145 = vpow2.f32 %v5090_v31 }
 0x123   : > { %v5093_v37 = vmul.f32 -1.442695, %v767_v33  ;;  %v771_v39 = vadd.f32 %v770_v35, %v391_v30  ;;  %v683_v40 = vpop.f32.mrf.mxu0 }
 0x124   : > { %v772_v41 = vpop.f32.mrf.mxu1  ;;  %6147 = vpow2.f32 %v5091_v36  ;;  %v5094_v42 = vmul.f32 -1.442695, %v682_v38  ;;  %v684_v43 = vadd.f32 %v683_v40, %v391_v30 }
 0x125   : > { %v773_v44 = vadd.f32 %v772_v41, %v391_v30  ;;  %6149 = vpow2.f32 %v5093_v37  ;;  %v5096_v46 = vmul.f32 -1.442695, %v771_v39  ;;  %v687_v47 = vpop.f32.mrf.mxu0 }
 0x126   : > { %v776_v48 = vpop.f32.mrf.mxu1  ;;  %6151 = vpow2.f32 %v5094_v42  ;;  %v5095_v49 = vmul.f32 -1.442695, %v684_v43  ;;  %v688_v51 = vadd.f32 %v687_v47, %v396_v18 }
 0x127   : > { %v5097_v50 = vmul.f32 -1.442695, %v773_v44  ;;  %6153 = vpow2.f32 %v5096_v46  ;;  %v777_v54 = vadd.f32 %v776_v48, %v396_v18  ;;  %v689_v55 = vpop.f32.mrf.mxu0 }
 0x128   : > { %v778_v56 = vpop.f32.mrf.mxu1  ;;  %6155 = vpow2.f32 %v5095_v49  ;;  %v5098_v57 = vmul.f32 -1.442695, %v688_v51  ;;  %v690_v58 = vadd.f32 %v689_v55, %v396_v18  ;;  %v877_v49 = vld [vmem:[%s8839_s3] sm:$0xff]  ;;  %v7359_v55 = vpop.permute.xlu0 %887 }
 0x129   : > { %v779_v59 = vadd.f32 %v778_v56, %v396_v18  ;;  %6157 = vpow2.f32 %v5097_v50  ;;  %v5100_v60 = vmul.f32 -1.442695, %v777_v54  ;;  %v880_v54 = vld [vmem:[%s8839_s3 + $0x18] sm:$0xff] }
 0x12a   : > { %6159 = vpow2.f32 %v5098_v57  ;;  %v5099_v62 = vmul.f32 -1.442695, %v690_v58 }
 0x12b   : > { %v5101_v63 = vmul.f32 -1.442695, %v779_v59  ;;  %6161 = vpow2.f32 %v5100_v60  ;;  %v6142_v3 = vpop.eup %6141 }
 0x12c   : > { %6163 = vpow2.f32 %v5099_v62  ;;  %v829_v7 = vadd.f32 1.0, %v6142_v3 }
 0x12d   : > { %6165 = vpow2.f32 %v5101_v63  ;;  %v6144_v4 = vpop.eup %6143 }
 0x12e   : > { %6167 = vpow2.f32 %v5092_v61  ;;  %v830_v9 = vadd.f32 1.0, %v6144_v4  ;;  %v7363_v61 = vpop.permute.xlu1 %892 }
 0x12f   : > { %6169 = vpow2.f32 %v5089_v1  ;;  %v6146_v5 = vpop.eup %6145 }
 0x130   : > { %6171 = vpow2.f32 %v5088_v2  ;;  %v833_v11 = vadd.f32 1.0, %v6146_v5  ;;  %v7367_v5 = vpop.permute.xlu0 %897 }
 0x131   : > { %v6148_v6 = vpop.eup %6147  ;;  %6173 = vrcp.f32 %v829_v7 }
 0x132   : > { %v6150_v8 = vpop.eup %6149  ;;  %v834_v0 = vadd.f32 1.0, %v6148_v6  ;;  %6175 = vrcp.f32 %v830_v9 }
 0x133   : > { %v6152_v10 = vpop.eup %6151  ;;  %6177 = vrcp.f32 %v833_v11  ;;  %v836_v31 = vadd.f32 1.0, %v6150_v8 }
 0x134   : > { %v6154_v12 = vpop.eup %6153  ;;  %v837_v15 = vadd.f32 1.0, %v6152_v10  ;;  %6179 = vrcp.f32 %v834_v0 }
 0x135   : > { %v6156_v14 = vpop.eup %6155  ;;  %v839_v29 = vadd.f32 1.0, %v6154_v12  ;;  %v7371_v12 = vpop.permute.xlu1 %902 }
 0x136   : > { %v6158_v16 = vpop.eup %6157  ;;  %v838_v17 = vadd.f32 1.0, %v6156_v14  ;;  %6181 = vrcp.f32 %v837_v15 }
 0x137   : > { %v6160_v18 = vpop.eup %6159  ;;  %v840_v26 = vadd.f32 1.0, %v6158_v16 }
 0x138   : > { %v6162_v19 = vpop.eup %6161  ;;  %v841_v20 = vadd.f32 1.0, %v6160_v18  ;;  %6183 = vrcp.f32 %v838_v17 }
 0x139   : > { %v6164_v21 = vpop.eup %6163  ;;  %v843_v23 = vadd.f32 1.0, %v6162_v19 }
 0x13a   : > { %v6166_v22 = vpop.eup %6165  ;;  %v842_v24 = vadd.f32 1.0, %v6164_v21  ;;  %6185 = vrcp.f32 %v841_v20 }
 0x13b   : > { %v6168_v25 = vpop.eup %6167  ;;  %v844_v27 = vadd.f32 1.0, %v6166_v22 }
 0x13c   : > { %v6170_v28 = vpop.eup %6169  ;;  %6187 = vrcp.f32 %v842_v24  ;;  %v835_v32 = vadd.f32 1.0, %v6168_v25 }
 0x13d   : > { %v6172_v30 = vpop.eup %6171  ;;  %6189 = vrcp.f32 %v844_v27  ;;  %v832_v33 = vadd.f32 1.0, %v6170_v28 }
 0x13e   : > { %6191 = vrcp.f32 %v843_v23  ;;  %v831_v34 = vadd.f32 1.0, %v6172_v30  ;;  %v6174_v35 = vpop.eup %6173 }
 0x13f   : > { %6193 = vrcp.f32 %v840_v26  ;;  %v6176_v36 = vpop.eup %6175 }
 0x140   : > { %6195 = vrcp.f32 %v839_v29  ;;  %v6178_v37 = vpop.eup %6177 }
 0x141   : > { %6197 = vrcp.f32 %v836_v31  ;;  %v6180_v38 = vpop.eup %6179 }
 0x142   : > { %6199 = vrcp.f32 %v835_v32 }
 0x143   : > { %6201 = vrcp.f32 %v832_v33  ;;  %v6182_v39 = vpop.eup %6181 }
 0x144   : > { %6203 = vrcp.f32 %v831_v34 }
 0x145   : > { %v6184_v40 = vpop.eup %6183 }
 0x147   : > { %v6186_v41 = vpop.eup %6185 }
 0x149   : > { %v6188_v42 = vpop.eup %6187 }
 0x14a   : > { %v6190_v43 = vpop.eup %6189  ;;  %942 = vmatprep.subr.mxu0 %v6188_v42 }
 0x14b   : > { %v6192_v44 = vpop.eup %6191  ;;  %1031 = vmatprep.subr.mxu1 %v6190_v43  ;;  %943 = vmatpush1.msra.mxu0 %v6186_v41  ;;  %v1321_v43 = vld [vmem:[%s8841_s5 + $0x8] sm:$0xff] }
 0x14c   : > { %v6194_v45 = vpop.eup %6193  ;;  %1032 = vmatpush1.msra.mxu1 %v6192_v44  ;;  %944 = vmatprep.subr.mxu0 %v6184_v40  ;;  %v1322_v40 = vld [vmem:[%s8841_s5 + $0x10] sm:$0xff] }
 0x14d   : > { %v6196_v46 = vpop.eup %6195  ;;  %1033 = vmatprep.subr.mxu1 %v6194_v45  ;;  %945 = vmatpush1.msra.mxu0 %v6182_v39  ;;  %v1320_v45 = vld [vmem:[%s8841_s5] sm:$0xff] }
 0x14e   : > { %v6198_v47 = vpop.eup %6197  ;;  %1034 = vmatpush1.msra.mxu1 %v6196_v46  ;;  %946 = vmatprep.subr.mxu0 %v6180_v38  ;;  %v1323_v38 = vld [vmem:[%s8841_s5 + $0x18] sm:$0xff] }
 0x14f   : > { %v6200_v48 = vpop.eup %6199  ;;  %1035 = vmatprep.subr.mxu1 %v6198_v47  ;;  %947 = vmatpush1.msra.mxu0 %v6178_v37 }
 0x150   : > { %v6202_v50 = vpop.eup %6201  ;;  %1036 = vmatpush1.msra.mxu1 %v6200_v48  ;;  %948 = vmatprep.subr.mxu0 %v6176_v36 }
 0x151   : > { %v6204_v51 = vpop.eup %6203  ;;  %1037 = vmatprep.subr.mxu1 %v6202_v50  ;;  %949 = vmatpush1.msra.mxu0 %v6174_v35 }
 0x152   : > { %1038 = vmatpush1.msra.mxu1 %v6204_v51  ;;  %5102 = vmatmul.mubr.msk.f32.vlgmr.msra.gmra.mxu0 %vm905_vm1, %v877_v49 }
 0x153   : > { %5106 = vmatmul.mubr.msk.f32.vlgmr.msra.gmra.mxu1 %vm905_vm1, %v877_v49  ;;  %988 = vmatprep.mubr.f32.mxu0 %v8844_v13 }
 0x154   : > { %1077 = vmatprep.mubr.f32.mxu1 %v8844_v13  ;;  %5833 = vmatprep.subr.mxu0 %v1323_v38 }
 0x155   : > { %6041 = vmatprep.subr.mxu1 %v1323_v38  ;;  %5834 = vmatpush3.msra.mxu0 %v1323_v38 }
 0x156   : > { %5103 = vmatmul.mubr.msk.f32.gmra.mxu0 %vm905_vm1, %v878_v52  ;;  %5835 = vmatprep.subr.mxu0 %v1322_v40 }
 0x157   : > { %5107 = vmatmul.mubr.msk.f32.gmra.mxu1 %vm905_vm1, %v878_v52  ;;  %994 = vmatprep.mubr.f32.mxu0 %v8844_v13 }
 0x158   : > { %1083 = vmatprep.mubr.f32.mxu1 %v8844_v13  ;;  %6045 = vmatpush3.msra.mxu1 %v1323_v38 }
 0x159   : > { %5836 = vmatpush3.msra.mxu0 %v1322_v40  ;;  %6042 = vmatprep.subr.mxu1 %v1322_v40 }
 0x15a   : > { %5104 = vmatmul.mubr.msk.f32.gmra.mxu0 %vm905_vm1, %v879_v53  ;;  %5837 = vmatprep.subr.mxu0 %v1321_v43 }
 0x15b   : > { %5108 = vmatmul.mubr.msk.f32.gmra.mxu1 %vm905_vm1, %v879_v53  ;;  %1000 = vmatprep.mubr.f32.mxu0 %v8844_v13 }
 0x15c   : > { %1089 = vmatprep.mubr.f32.mxu1 %v8844_v13  ;;  %5838 = vmatpush3.msra.mxu0 %v1321_v43 }
 0x15d   : > { %5839 = vmatprep.subr.mxu0 %v1320_v45  ;;  %6046 = vmatpush3.msra.mxu1 %v1322_v40 }
 0x15e   : > { %5105 = vmatmul.mubr.msk.f32.gmra.mxu0 %vm905_vm1, %v880_v54  ;;  %6043 = vmatprep.subr.mxu1 %v1321_v43 }
 0x15f   : > { %5109 = vmatmul.mubr.msk.f32.gmra.mxu1 %vm905_vm1, %v880_v54  ;;  %5840 = vmatpush3.msra.mxu0 %v1320_v45 }
 0x160   : > { %6047 = vmatpush3.msra.mxu1 %v1321_v43 }
 0x161   : > { %6044 = vmatprep.subr.mxu1 %v1320_v45 }
 0x162   : > { %6048 = vmatpush3.msra.mxu1 %v1320_v45 }
 0x212   : > { %v984_v56 = vpop.f32.mrf.mxu0 }
 0x213   : > { %v985_v57 = vadd.f32 %v984_v56, %v7359_v55  ;;  %v1073_v37 = vpop.f32.mrf.mxu1 }
 0x214   : > { %v986_v58 = vpop.f32.mrf.mxu0  ;;  %v1074_v56 = vadd.f32 %v1073_v37, %v7359_v55 }
 0x215   : > { %v5110_v59 = vmul.f32 -1.442695, %v985_v57  ;;  %v987_v60 = vadd.f32 %v986_v58, %v7359_v55  ;;  %v1075_v42 = vpop.f32.mrf.mxu1 }
 0x216   : > { %v990_v62 = vpop.f32.mrf.mxu0  ;;  %v1076_v53 = vadd.f32 %v1075_v42, %v7359_v55 }
 0x217   : > { %6205 = vpow2.f32 %v5110_v59  ;;  %v5111_v63 = vmul.f32 -1.442695, %v987_v60  ;;  %v991_v1 = vadd.f32 %v990_v62, %v7363_v61  ;;  %v1079_v47 = vpop.f32.mrf.mxu1  ;;  %v5112_v60 = vmul.f32 -1.442695, %v1074_v56  ;;  %v5358_v56 = vld [vmem:[%s8840_s4 + $0x38] sm:$0xff] }
 0x218   : > { %v992_v2 = vpop.f32.mrf.mxu0  ;;  %v5113_v57 = vmul.f32 -1.442695, %v1076_v53  ;;  %v1080_v62 = vadd.f32 %v1079_v47, %v7363_v61 }
 0x219   : > { %6207 = vpow2.f32 %v5111_v63  ;;  %v5114_v3 = vmul.f32 -1.442695, %v991_v1  ;;  %v993_v4 = vadd.f32 %v992_v2, %v7363_v61  ;;  %v1081_v50 = vpop.f32.mrf.mxu1 }
 0x21a   : > { %v996_v6 = vpop.f32.mrf.mxu0  ;;  %v1082_v58 = vadd.f32 %v1081_v50, %v7363_v61 }
 0x21b   : > { %6209 = vpow2.f32 %v5114_v3  ;;  %v5115_v7 = vmul.f32 -1.442695, %v993_v4  ;;  %v997_v8 = vadd.f32 %v996_v6, %v7367_v5  ;;  %v1085_v52 = vpop.f32.mrf.mxu1  ;;  %v5116_v3 = vmul.f32 -1.442695, %v1080_v62 }
 0x21c   : > { %v998_v9 = vpop.f32.mrf.mxu0  ;;  %v5117_v63 = vmul.f32 -1.442695, %v1082_v58  ;;  %v1086_v4 = vadd.f32 %v1085_v52, %v7367_v5  ;;  %v5356_v52 = vld [vmem:[%s8840_s4 + $0x28] sm:$0xff] }
 0x21d   : > { %6211 = vpow2.f32 %v5115_v7  ;;  %v5118_v10 = vmul.f32 -1.442695, %v997_v8  ;;  %v999_v11 = vadd.f32 %v998_v9, %v7367_v5  ;;  %v1087_v54 = vpop.f32.mrf.mxu1 }
 0x21e   : > { %v1002_v0 = vpop.f32.mrf.mxu0  ;;  %v1088_v1 = vadd.f32 %v1087_v54, %v7367_v5  ;;  %v5120_v7 = vmul.f32 -1.442695, %v1086_v4  ;;  %v5357_v4 = vld [vmem:[%s8840_s4 + $0x30] sm:$0xff] }
 0x21f   : > { %6213 = vpow2.f32 %v5118_v10  ;;  %v5119_v14 = vmul.f32 -1.442695, %v999_v11  ;;  %v1003_v15 = vadd.f32 %v1002_v0, %v7371_v12  ;;  %v1091_v59 = vpop.f32.mrf.mxu1 }
 0x220   : > { %v1004_v16 = vpop.f32.mrf.mxu0  ;;  %v5121_v6 = vmul.f32 -1.442695, %v1088_v1  ;;  %v1092_v8 = vadd.f32 %v1091_v59, %v7371_v12  ;;  %v5355_v1 = vld [vmem:[%s8840_s4 + $0x20] sm:$0xff] }
 0x221   : > { %6215 = vpow2.f32 %v5119_v14  ;;  %v5122_v17 = vmul.f32 -1.442695, %v1003_v15  ;;  %v1005_v18 = vadd.f32 %v1004_v16, %v7371_v12  ;;  %v1093_v2 = vpop.f32.mrf.mxu1 }
 0x222   : > { %v1094_v55 = vadd.f32 %v1093_v2, %v7371_v12  ;;  %v5124_v61 = vmul.f32 -1.442695, %v1092_v8 }
 0x223   : > { %6217 = vpow2.f32 %v5122_v17  ;;  %v5123_v19 = vmul.f32 -1.442695, %v1005_v18 }
 0x224   : > { %v6206_v20 = vpop.eup %6205  ;;  %v5125_v9 = vmul.f32 -1.442695, %v1094_v55 }
 0x225   : > { %v1144_v21 = vadd.f32 1.0, %v6206_v20  ;;  %6219 = vpow2.f32 %v5123_v19 }
 0x226   : > { %v6208_v22 = vpop.eup %6207 }
 0x227   : > { %6221 = vrcp.f32 %v1144_v21  ;;  %v1145_v23 = vadd.f32 1.0, %v6208_v22 }
 0x228   : > { %v6210_v24 = vpop.eup %6209 }
 0x229   : > { %6223 = vrcp.f32 %v1145_v23  ;;  %v1148_v25 = vadd.f32 1.0, %v6210_v24 }
 0x22a   : > { %v6212_v26 = vpop.eup %6211 }
 0x22b   : > { %6225 = vrcp.f32 %v1148_v25  ;;  %v1149_v27 = vadd.f32 1.0, %v6212_v26 }
 0x22c   : > { %v6214_v28 = vpop.eup %6213 }
 0x22d   : > { %6227 = vrcp.f32 %v1149_v27  ;;  %v1152_v29 = vadd.f32 1.0, %v6214_v28 }
 0x22e   : > { %v6216_v30 = vpop.eup %6215 }
 0x22f   : > { %6229 = vrcp.f32 %v1152_v29  ;;  %v1153_v31 = vadd.f32 1.0, %v6216_v30 }
 0x230   : > { %v6218_v32 = vpop.eup %6217 }
 0x231   : > { %6231 = vrcp.f32 %v1153_v31  ;;  %v1156_v33 = vadd.f32 1.0, %v6218_v32 }
 0x232   : > { %v6220_v34 = vpop.eup %6219 }
 0x233   : > { %6233 = vrcp.f32 %v1156_v33  ;;  %v1157_v35 = vadd.f32 1.0, %v6220_v34 }
 0x234   : > { %v6222_v36 = vpop.eup %6221 }
 0x235   : > { %6235 = vrcp.f32 %v1157_v35  ;;  %1192 = vxpose.xlu1.b32.start [1/4] (short) %v6222_v36, 128 }
 0x236   : > { %v6224_v39 = vpop.eup %6223  ;;  %6237 = vpow2.f32 %v5113_v57  ;;  %v5262_v57 = vld [vmem:[%s8838_s2 + $0x38] sm:$0xff] }
 0x237   : > { %1224 = vxpose.xlu0.b32.start [1/4] (short) %v6224_v39, 128  ;;  %6239 = vpow2.f32 %v5112_v60  ;;  %v5260_v60 = vld [vmem:[%s8838_s2 + $0x28] sm:$0xff] }
 0x238   : > { %v6226_v41 = vpop.eup %6225  ;;  %6241 = vpow2.f32 %v5117_v63 }
 0x239   : > { %1193 = vxpose.xlu1.b32.cont [2/4] (short) %v6226_v41, 128  ;;  %6243 = vpow2.f32 %v5116_v3 }
 0x23a   : > { %v6228_v44 = vpop.eup %6227  ;;  %6245 = vpow2.f32 %v5121_v6 }
 0x23b   : > { %1225 = vxpose.xlu0.b32.cont [2/4] (short) %v6228_v44, 128  ;;  %6247 = vpow2.f32 %v5120_v7 }
 0x23c   : > { %v6230_v46 = vpop.eup %6229  ;;  %6249 = vpow2.f32 %v5125_v9 }
 0x23d   : > { %1194 = vxpose.xlu1.b32.cont [3/4] (short) %v6230_v46, 128  ;;  %6251 = vpow2.f32 %v5124_v61  ;;  %v5261_v46 = vld [vmem:[%s8838_s2 + $0x30] sm:$0xff] }
 0x23e   : > { %v6232_v48 = vpop.eup %6231 }
 0x23f   : > { %1226 = vxpose.xlu0.b32.cont [3/4] (short) %v6232_v48, 128 }
 0x240   : > { %v6234_v49 = vpop.eup %6233 }
 0x241   : > { %1195 = vxpose.xlu1.b32.end [4/4] (short) %v6234_v49, 128  ;;  %v5259_v49 = vld [vmem:[%s8838_s2 + $0x20] sm:$0xff] }
 0x242   : > { %v6236_v51 = vpop.eup %6235 }
 0x243   : > { %1227 = vxpose.xlu0.b32.end [4/4] (short) %v6236_v51, 128  ;;  %v6238_v10 = vpop.eup %6237 }
 0x244   : > { %v6240_v11 = vpop.eup %6239  ;;  %v1147_v0 = vadd.f32 1.0, %v6238_v10 }
 0x245   : > { %v6242_v14 = vpop.eup %6241  ;;  %v1146_v15 = vadd.f32 1.0, %v6240_v11 }
 0x246   : > { %v6244_v5 = vpop.eup %6243  ;;  %6253 = vrcp.f32 %v1147_v0  ;;  %v1151_v16 = vadd.f32 1.0, %v6242_v14 }
 0x247   : > { %v6246_v17 = vpop.eup %6245  ;;  %6255 = vrcp.f32 %v1146_v15  ;;  %v1150_v18 = vadd.f32 1.0, %v6244_v5 }
 0x248   : > { %v6248_v19 = vpop.eup %6247  ;;  %6257 = vrcp.f32 %v1151_v16  ;;  %v1155_v12 = vadd.f32 1.0, %v6246_v17 }
 0x249   : > { %v6250_v20 = vpop.eup %6249  ;;  %6259 = vrcp.f32 %v1150_v18  ;;  %v1154_v21 = vadd.f32 1.0, %v6248_v19 }
 0x24a   : > { %v6252_v22 = vpop.eup %6251  ;;  %6261 = vrcp.f32 %v1155_v12  ;;  %v1159_v23 = vadd.f32 1.0, %v6250_v20 }
 0x24b   : > { %6263 = vrcp.f32 %v1154_v21  ;;  %v1158_v24 = vadd.f32 1.0, %v6252_v22 }
 0x24c   : > { %6265 = vrcp.f32 %v1159_v23 }
 0x24d   : > { %6267 = vrcp.f32 %v1158_v24 }
 0x253   : > { %v6254_v25 = vpop.eup %6253 }
 0x254   : > { %v6256_v26 = vpop.eup %6255 }
 0x255   : > { %v6258_v27 = vpop.eup %6257 }
 0x256   : > { %v6260_v28 = vpop.eup %6259 }
 0x257   : > { %v6262_v29 = vpop.eup %6261 }
 0x258   : > { %v6264_v30 = vpop.eup %6263 }
 0x259   : > { %v6266_v31 = vpop.eup %6265 }
 0x25a   : > { %v6268_v32 = vpop.eup %6267 }
 0x272   : > { %1288 = vxpose.xlu1.b32.start [1/4] (short) %v6254_v25, 128 }
 0x274   : > { %1256 = vxpose.xlu0.b32.start [1/4] (short) %v6256_v26, 128 }
 0x276   : > { %1289 = vxpose.xlu1.b32.cont [2/4] (short) %v6258_v27, 128 }
 0x278   : > { %1257 = vxpose.xlu0.b32.cont [2/4] (short) %v6260_v28, 128 }
 0x27a   : > { %1290 = vxpose.xlu1.b32.cont [3/4] (short) %v6262_v29, 128 }
 0x27c   : > { %1258 = vxpose.xlu0.b32.cont [3/4] (short) %v6264_v30, 128 }
 0x27e   : > { %1291 = vxpose.xlu1.b32.end [4/4] (short) %v6266_v31, 128 }
 0x280   : > { %1259 = vxpose.xlu0.b32.end [4/4] (short) %v6268_v32, 128 }
 0x2b1   : > { %v1208_v33 = vpop.trf.xlu1 }
 0x2b2   : > { %5841 = vmatprep.mubr.msk.f32.mxu0 %vm905_vm1, %v1208_v33 }
 0x2b3   : > { %v7396_v34 = vpop.trf.xlu0 }
 0x2b5   : > { %v1209_v35 = vpop.trf.xlu1 }
 0x2b6   : > { %5842 = vmatmul.mubr.msk.f32.vlgmr.msra.gmra.mxu0 %vm905_vm1, %v1209_v35 }
 0x2b7   : > { %v7399_v36 = vpop.trf.xlu0 }
 0x2b9   : > { %v1210_v37 = vpop.trf.xlu1 }
 0x2ba   : > { %5844 = vmatprep.mubr.msk.f32.mxu0 %vm905_vm1, %v1210_v37 }
 0x2bb   : > { %v7402_v38 = vpop.trf.xlu0 }
 0x2bd   : > { %v1211_v39 = vpop.trf.xlu1 }
 0x2be   : > { %5845 = vmatmul.mubr.msk.f32.gmra.mxu0 %vm905_vm1, %v1211_v39 }
 0x2bf   : > { %v7405_v40 = vpop.trf.xlu0 }
 0x2c1   : > { %v1212_v41 = vpop.trf.xlu1 }
 0x2c2   : > { %5847 = vmatprep.mubr.msk.f32.mxu0 %vm905_vm1, %v1212_v41 }
 0x2c3   : > { %v1244_v42 = vpop.trf.xlu0 }
 0x2c4   : > { %5871 = vmatprep.mubr.msk.f32.mxu1 %vm905_vm1, %v1244_v42 }
 0x2c5   : > { %v1213_v43 = vpop.trf.xlu1 }
 0x2c6   : > { %5848 = vmatmul.mubr.msk.f32.gmra.mxu0 %vm905_vm1, %v1213_v43 }
 0x2c7   : > { %v1245_v44 = vpop.trf.xlu0 }
 0x2c8   : > { %5872 = vmatmul.mubr.msk.f32.vlgmr.msra.gmra.mxu1 %vm905_vm1, %v1245_v44 }
 0x2c9   : > { %v1214_v45 = vpop.trf.xlu1 }
 0x2ca   : > { %5850 = vmatprep.mubr.msk.f32.mxu0 %vm905_vm1, %v1214_v45 }
 0x2cb   : > { %v1246_v47 = vpop.trf.xlu0 }
 0x2cc   : > { %5874 = vmatprep.mubr.msk.f32.mxu1 %vm905_vm1, %v1246_v47  ;;  %2442 = vperm.xlu1 %6140, %v5261_v46  }
 0x2cd   : > { %v1215_v48 = vpop.trf.xlu1 }
 0x2ce   : > { %5851 = vmatmul.mubr.msk.f32.gmra.mxu0 %vm905_vm1, %v1215_v48 }
 0x2cf   : > { %v1247_v50 = vpop.trf.xlu0 }
 0x2d0   : > { %5875 = vmatmul.mubr.msk.f32.gmra.mxu1 %vm905_vm1, %v1247_v50  ;;  %2432 = vperm.xlu1 %6140, %v5259_v49  }
 0x2d1   : > { %v1216_v51 = vpop.trf.xlu1 }
 0x2d2   : > { %5853 = vmatprep.mubr.msk.f32.mxu0 %vm905_vm1, %v1216_v51 }
 0x2d3   : > { %v1248_v53 = vpop.trf.xlu0 }
 0x2d4   : > { %5877 = vmatprep.mubr.msk.f32.mxu1 %vm905_vm1, %v1248_v53  ;;  %2945 = vperm.xlu1 %6140, %v5356_v52  }
 0x2d5   : > { %v1217_v54 = vpop.trf.xlu1 }
 0x2d6   : > { %5854 = vmatmul.mubr.msk.f32.gmra.mxu0 %vm905_vm1, %v1217_v54 }
 0x2d7   : > { %v1249_v58 = vpop.trf.xlu0 }
 0x2d8   : > { %5878 = vmatmul.mubr.msk.f32.gmra.mxu1 %vm905_vm1, %v1249_v58  ;;  %2955 = vperm.xlu1 %6140, %v5358_v56   ;;  %v7519_v56 = vld [vmem:[%s8837_s1 + $0x20] sm:$0xff] }
 0x2d9   : > { %2447 = vperm.xlu0 %6139, %v5262_v57   ;;  %v1218_v59 = vpop.trf.xlu1 }
 0x2da   : > { %5856 = vmatprep.mubr.msk.f32.mxu0 %vm905_vm1, %v1218_v59 }
 0x2db   : > { %v1250_v62 = vpop.trf.xlu0 }
 0x2dc   : > { %5880 = vmatprep.mubr.msk.f32.mxu1 %vm905_vm1, %v1250_v62 }
 0x2dd   : > { %2437 = vperm.xlu0 %6139, %v5260_v60   ;;  %v1219_v63 = vpop.trf.xlu1 }
 0x2de   : > { %5857 = vmatmul.mubr.msk.f32.gmra.mxu0 %vm905_vm1, %v1219_v63 }
 0x2df   : > { %v1251_v2 = vpop.trf.xlu0 }
 0x2e0   : > { %5881 = vmatmul.mubr.msk.f32.gmra.mxu1 %vm905_vm1, %v1251_v2 }
 0x2e1   : > { %2940 = vperm.xlu0 %6139, %v5355_v1   ;;  %v1220_v3 = vpop.trf.xlu1 }
 0x2e2   : > { %5859 = vmatprep.mubr.msk.f32.mxu0 %vm905_vm1, %v1220_v3  ;;  %v7528_v3 = vld [vmem:[%s8842_s6] ss:$0 sm:$0xff] }
 0x2e3   : > { %v1252_v6 = vpop.trf.xlu0 }
 0x2e4   : > { %5883 = vmatprep.mubr.msk.f32.mxu1 %vm905_vm1, %v1252_v6 }
 0x2e5   : > { %2950 = vperm.xlu0 %6139, %v5357_v4   ;;  %v1221_v55 = vpop.trf.xlu1 }
 0x2e6   : > { %5860 = vmatmul.mubr.msk.f32.gmra.mxu0 %vm905_vm1, %v1221_v55 }
 0x2e7   : > { %v1253_v7 = vpop.trf.xlu0 }
 0x2e8   : > { %5884 = vmatmul.mubr.msk.f32.gmra.mxu1 %vm905_vm1, %v1253_v7 }
 0x2e9   : > { %v1222_v8 = vpop.trf.xlu1 }
 0x2ea   : > { %5862 = vmatprep.mubr.msk.f32.mxu0 %vm905_vm1, %v1222_v8 }
 0x2eb   : > { %v1254_v9 = vpop.trf.xlu0 }
 0x2ec   : > { %5886 = vmatprep.mubr.msk.f32.mxu1 %vm905_vm1, %v1254_v9 }
 0x2ed   : > { %v1223_v61 = vpop.trf.xlu1 }
 0x2ee   : > { %5863 = vmatmul.mubr.msk.f32.gmra.mxu0 %vm905_vm1, %v1223_v61 }
 0x2ef   : > { %v1255_v10 = vpop.trf.xlu0  ;;  %5865 = vmatprep.mubr.msk.f32.mxu0 %vm905_vm1, %v7396_v34 }
 0x2f0   : > { %5887 = vmatmul.mubr.msk.f32.gmra.mxu1 %vm905_vm1, %v1255_v10 }
 0x2f1   : > { %v1304_v0 = vpop.trf.xlu1 }
 0x2f2   : > { %5866 = vmatmul.mubr.msk.f32.gmra.mxu0 %vm905_vm1, %v7399_v36 }
 0x2f3   : > { %v1272_v11 = vpop.trf.xlu0  ;;  %5868 = vmatprep.mubr.msk.f32.mxu0 %vm905_vm1, %v7402_v38 }
 0x2f4   : > { %5889 = vmatprep.mubr.msk.f32.mxu1 %vm905_vm1, %v1272_v11 }
 0x2f5   : > { %v1305_v5 = vpop.trf.xlu1 }
 0x2f6   : > { %5869 = vmatmul.mubr.msk.f32.gmra.mxu0 %vm905_vm1, %v7405_v40 }
 0x2f7   : > { %v1273_v14 = vpop.trf.xlu0  ;;  %3034 = vmatprep.mubr.f32.mxu0 %v8844_v13 }
 0x2f8   : > { %5890 = vmatmul.mubr.msk.f32.gmra.mxu1 %vm905_vm1, %v1273_v14 }
 0x2f9   : > { %v1306_v17 = vpop.trf.xlu1 }
 0x2fb   : > { %v1274_v15 = vpop.trf.xlu0 }
 0x2fc   : > { %5892 = vmatprep.mubr.msk.f32.mxu1 %vm905_vm1, %v1274_v15 }
 0x2fd   : > { %v1307_v12 = vpop.trf.xlu1 }
 0x2ff   : > { %v1275_v16 = vpop.trf.xlu0 }
 0x300   : > { %5893 = vmatmul.mubr.msk.f32.gmra.mxu1 %vm905_vm1, %v1275_v16 }
 0x301   : > { %v1308_v21 = vpop.trf.xlu1 }
 0x303   : > { %v1276_v18 = vpop.trf.xlu0 }
 0x304   : > { %5895 = vmatprep.mubr.msk.f32.mxu1 %vm905_vm1, %v1276_v18 }
 0x305   : > { %v1309_v24 = vpop.trf.xlu1 }
 0x307   : > { %v1277_v19 = vpop.trf.xlu0 }
 0x308   : > { %5896 = vmatmul.mubr.msk.f32.gmra.mxu1 %vm905_vm1, %v1277_v19 }
 0x309   : > { %v1310_v26 = vpop.trf.xlu1 }
 0x30b   : > { %v1278_v20 = vpop.trf.xlu0 }
 0x30c   : > { %5898 = vmatprep.mubr.msk.f32.mxu1 %vm905_vm1, %v1278_v20 }
 0x30d   : > { %v1311_v29 = vpop.trf.xlu1 }
 0x30f   : > { %v1279_v22 = vpop.trf.xlu0 }
 0x310   : > { %5899 = vmatmul.mubr.msk.f32.gmra.mxu1 %vm905_vm1, %v1279_v22 }
 0x311   : > { %v1312_v31 = vpop.trf.xlu1 }
 0x313   : > { %v1280_v23 = vpop.trf.xlu0 }
 0x314   : > { %5901 = vmatprep.mubr.msk.f32.mxu1 %vm905_vm1, %v1280_v23 }
 0x315   : > { %v1313_v34 = vpop.trf.xlu1 }
 0x317   : > { %v1281_v25 = vpop.trf.xlu0 }
 0x318   : > { %5902 = vmatmul.mubr.msk.f32.gmra.mxu1 %vm905_vm1, %v1281_v25 }
 0x319   : > { %v1314_v36 = vpop.trf.xlu1 }
 0x31b   : > { %v1282_v27 = vpop.trf.xlu0 }
 0x31c   : > { %5904 = vmatprep.mubr.msk.f32.mxu1 %vm905_vm1, %v1282_v27 }
 0x31d   : > { %v1315_v37 = vpop.trf.xlu1 }
 0x31f   : > { %v1283_v28 = vpop.trf.xlu0 }
 0x320   : > { %5905 = vmatmul.mubr.msk.f32.gmra.mxu1 %vm905_vm1, %v1283_v28 }
 0x321   : > { %v1316_v38 = vpop.trf.xlu1 }
 0x323   : > { %v1284_v30 = vpop.trf.xlu0 }
 0x324   : > { %5907 = vmatprep.mubr.msk.f32.mxu1 %vm905_vm1, %v1284_v30 }
 0x325   : > { %v1317_v39 = vpop.trf.xlu1 }
 0x327   : > { %v1285_v32 = vpop.trf.xlu0 }
 0x328   : > { %5908 = vmatmul.mubr.msk.f32.gmra.mxu1 %vm905_vm1, %v1285_v32 }
 0x329   : > { %v1318_v40 = vpop.trf.xlu1 }
 0x32b   : > { %v1286_v33 = vpop.trf.xlu0 }
 0x32c   : > { %5910 = vmatprep.mubr.msk.f32.mxu1 %vm905_vm1, %v1286_v33 }
 0x32d   : > { %v1319_v41 = vpop.trf.xlu1 }
 0x32f   : > { %v1287_v35 = vpop.trf.xlu0 }
 0x330   : > { %5911 = vmatmul.mubr.msk.f32.gmra.mxu1 %vm905_vm1, %v1287_v35 }
 0x331   : > { %5913 = vmatprep.mubr.msk.f32.mxu1 %vm905_vm1, %v1304_v0 }
 0x334   : > { %5914 = vmatmul.mubr.msk.f32.gmra.mxu1 %vm905_vm1, %v1305_v5 }
 0x335   : > { %5916 = vmatprep.mubr.msk.f32.mxu1 %vm905_vm1, %v1306_v17 }
 0x338   : > { %5917 = vmatmul.mubr.msk.f32.gmra.mxu1 %vm905_vm1, %v1307_v12 }
 0x339   : > { %5919 = vmatprep.mubr.msk.f32.mxu1 %vm905_vm1, %v1308_v21 }
 0x33c   : > { %5920 = vmatmul.mubr.msk.f32.gmra.mxu1 %vm905_vm1, %v1309_v24 }
 0x33d   : > { %5922 = vmatprep.mubr.msk.f32.mxu1 %vm905_vm1, %v1310_v26 }
 0x340   : > { %5923 = vmatmul.mubr.msk.f32.gmra.mxu1 %vm905_vm1, %v1311_v29 }
 0x341   : > { %5925 = vmatprep.mubr.msk.f32.mxu1 %vm905_vm1, %v1312_v31 }
 0x344   : > { %5926 = vmatmul.mubr.msk.f32.gmra.mxu1 %vm905_vm1, %v1313_v34 }
 0x345   : > { %5928 = vmatprep.mubr.msk.f32.mxu1 %vm905_vm1, %v1314_v36 }
 0x348   : > { %5929 = vmatmul.mubr.msk.f32.gmra.mxu1 %vm905_vm1, %v1315_v37 }
 0x349   : > { %5931 = vmatprep.mubr.msk.f32.mxu1 %vm905_vm1, %v1316_v38 }
 0x34c   : > { %5932 = vmatmul.mubr.msk.f32.gmra.mxu1 %vm905_vm1, %v1317_v39 }
 0x34d   : > { %5934 = vmatprep.mubr.msk.f32.mxu1 %vm905_vm1, %v1318_v40 }
 0x350   : > { %5935 = vmatmul.mubr.msk.f32.gmra.mxu1 %vm905_vm1, %v1319_v41 }
 0x351   : > { %5717 = vmatprep.mubr.msk.f32.mxu1 %vm398_vm0, %v7519_v56 }
 0x376   : > { %v7496_v42 = vpop.f32.mrf.mxu0 }
 0x378   : > { %v7498_v43 = vpop.f32.mrf.mxu0 }
 0x37e   : > { %v7500_v44 = vpop.f32.mrf.mxu0 }
 0x380   : > { %v7502_v45 = vpop.f32.mrf.mxu0 }
 0x386   : > { %v5849_v46 = vpop.f32.mrf.mxu0 }
 0x387   : > { %v1615_v26 = vadd.f32 %v5849_v46, %v7528_v3 }
 0x388   : > { %v7504_v47 = vpop.f32.mrf.mxu0  ;;  %v7508_v49 = vpop.f32.mrf.mxu1 }
 0x389   : > { %v5196_v33 = vmul.f32 -1.442695, %v1615_v26 }
 0x38a   : > { %v7512_v51 = vpop.f32.mrf.mxu1 }
 0x38e   : > { %v7506_v48 = vpop.f32.mrf.mxu0 }
 0x390   : > { %v7510_v50 = vpop.f32.mrf.mxu0  ;;  %v5876_v53 = vpop.f32.mrf.mxu1 }
 0x391   : > { %v1705_v28 = vadd.f32 %v5876_v53, %v7528_v3 }
 0x392   : > { %v7521_v57 = vpop.f32.mrf.mxu1 }
 0x393   : > { %v5214_v35 = vmul.f32 -1.442695, %v1705_v28 }
 0x396   : > { %v5855_v52 = vpop.f32.mrf.mxu0 }
 0x397   : > { %v1635_v36 = vadd.f32 %v5855_v52, %v7528_v3 }
 0x398   : > { %v7514_v54 = vpop.f32.mrf.mxu0  ;;  %v5879_v58 = vpop.f32.mrf.mxu1 }
 0x399   : > { %v1715_v31 = vadd.f32 %v5879_v58, %v7528_v3  ;;  %v5200_v53 = vmul.f32 -1.442695, %v1635_v36  ;;  %v1610_v36 = vadd.f32 %v7528_v3, %v7504_v47 }
 0x39a   : > { %v1709_v60 = vpop.f32.mrf.mxu1 }
 0x39b   : > { %v5216_v38 = vmul.f32 -1.442695, %v1715_v31  ;;  %v1710_v41 = vadd.f32 %v7528_v3, %v1709_v60  ;;  %v364_v60 = vlaneseq }
 0x39d   : > { %v5215_v52 = vmul.f32 -1.442695, %v1710_v41 }
 0x39e   : > { %v5858_v59 = vpop.f32.mrf.mxu0 }
 0x39f   : > { %v1645_v24 = vadd.f32 %v5858_v59, %v7528_v3 }
 0x3a0   : > { %v1639_v62 = vpop.f32.mrf.mxu0  ;;  %v5882_v63 = vpop.f32.mrf.mxu1 }
 0x3a1   : > { %v1725_v22 = vadd.f32 %v5882_v63, %v7528_v3  ;;  %v5202_v32 = vmul.f32 -1.442695, %v1645_v24  ;;  %v1640_v34 = vadd.f32 %v7528_v3, %v1639_v62 }
 0x3a2   : > { %v1719_v2 = vpop.f32.mrf.mxu1 }
 0x3a3   : > { %v5218_v29 = vmul.f32 -1.442695, %v1725_v22  ;;  %v1720_v30 = vadd.f32 %v7528_v3, %v1719_v2  ;;  %v5201_v39 = vmul.f32 -1.442695, %v1640_v34 }
 0x3a5   : > { %v5217_v37 = vmul.f32 -1.442695, %v1720_v30 }
 0x3a6   : > { %v5861_v1 = vpop.f32.mrf.mxu0 }
 0x3a7   : > { %v1655_v55 = vadd.f32 %v5861_v1, %v7528_v3  ;;  %v1630_v1 = vadd.f32 %v7528_v3, %v7514_v54  ;;  %v1700_v54 = vadd.f32 %v7528_v3, %v7521_v57 }
 0x3a8   : > { %v5885_v4 = vpop.f32.mrf.mxu1  ;;  %v1649_v6 = vpop.f32.mrf.mxu0 }
 0x3a9   : > { %v1735_v7 = vadd.f32 %v5885_v4, %v7528_v3  ;;  %v5204_v61 = vmul.f32 -1.442695, %v1655_v55  ;;  %v1650_v17 = vadd.f32 %v7528_v3, %v1649_v6 }
 0x3aa   : > { %v1729_v8 = vpop.f32.mrf.mxu1 }
 0x3ab   : > { %v5220_v14 = vmul.f32 -1.442695, %v1735_v7  ;;  %v1730_v15 = vadd.f32 %v7528_v3, %v1729_v8  ;;  %6269 = vpow2.f32 %v5204_v61  ;;  %v5203_v25 = vmul.f32 -1.442695, %v1650_v17 }
 0x3ac   : > { %v1625_v61 = vadd.f32 %v7506_v48, %v7528_v3  ;;  %v1695_v48 = vadd.f32 %v7508_v49, %v7528_v3  ;;  %v1690_v49 = vadd.f32 %v7528_v3, %v7512_v51 }
 0x3ad   : > { %v5219_v23 = vmul.f32 -1.442695, %v1730_v15 }
 0x3ae   : > { %v5864_v9 = vpop.f32.mrf.mxu0  ;;  %v5211_v51 = vmul.f32 -1.442695, %v1690_v49  ;;  %v6912_v49 = vld [vmem:[%s7164_s29 + $0xf0] sm:$0xff] }
 0x3af   : > { %v1665_v10 = vadd.f32 %v5864_v9, %v7528_v3 }
 0x3b0   : > { %v1659_v11 = vpop.f32.mrf.mxu0  ;;  %v5888_v0 = vpop.f32.mrf.mxu1 }
 0x3b1   : > { %v5206_v5 = vmul.f32 -1.442695, %v1665_v10  ;;  %v1660_v16 = vadd.f32 %v7528_v3, %v1659_v11  ;;  %v1745_v18 = vadd.f32 %v5888_v0, %v7528_v3  ;;  %v5199_v11 = vmul.f32 -1.442695, %v1630_v1 }
 0x3b2   : > { %v1739_v19 = vpop.f32.mrf.mxu1  ;;  %v7555_v17 = vpop.f32.mrf.mxu0 }
 0x3b3   : > { %v5205_v12 = vmul.f32 -1.442695, %v1660_v16  ;;  %6271 = vpow2.f32 %v5206_v5  ;;  %v5222_v20 = vmul.f32 -1.442695, %v1745_v18  ;;  %v1740_v21 = vadd.f32 %v7528_v3, %v1739_v19 }
 0x3b4   : > { %6273 = vpow2.f32 %v5220_v14  ;;  %v365_v5 = vand.u32 127, %v364_v60 }
 0x3b5   : > { %6275 = vpow2.f32 %v5205_v12  ;;  %v5221_v27 = vmul.f32 -1.442695, %v1740_v21  ;;  %v5198_v12 = vmul.f32 -1.442695, %v1625_v61  ;;  %v1620_v21 = vadd.f32 %v7528_v3, %v7510_v50 }
 0x3b6   : > { %6277 = vpow2.f32 %v5222_v20  ;;  %v5213_v20 = vmul.f32 -1.442695, %v1700_v54  ;;  %vm366_vm2 = vcmp.lt.s32.totalorder %v365_v5, 4 }
 0x3b7   : > { %6279 = vpow2.f32 %v5219_v23  ;;  %v5197_v30 = vmul.f32 -1.442695, %v1620_v21 }
 0x3b8   : > { %6281 = vpow2.f32 %v5203_v25  ;;  %v6270_v40 = vpop.eup %6269  ;;  %v7549_v8 = vpop.f32.mrf.mxu1 }
 0x3b9   : > { %6283 = vpow2.f32 %v5221_v27  ;;  %v2113_v7 = vadd.f32 1.0, %v6270_v40  ;;  %v7571_v27 = vpop.f32.mrf.mxu0 }
 0x3ba   : > { %6285 = vpow2.f32 %v5218_v29  ;;  %v7557_v18 = vpop.f32.mrf.mxu1  ;;  %v5212_v29 = vmul.f32 -1.442695, %v1695_v48  ;;  %v1600_v48 = vadd.f32 %v7528_v3, %v7502_v45  ;;  %v1595_v45 = vadd.f32 %v7496_v42, %v7528_v3 }
 0x3bb   : > { %6287 = vpow2.f32 %v5202_v32 }
 0x3bc   : > { %6289 = vpow2.f32 %v5196_v33  ;;  %v7576_v33 = vsel %vm366_vm2, 1.0, %v8844_v13 }
 0x3bd   : > { %6291 = vpow2.f32 %v5214_v35 }
 0x3be   : > { %6293 = vpow2.f32 %v5217_v37  ;;  %v5870_v37 = vpop.f32.mrf.mxu0 }
 0x3bf   : > { %6295 = vpow2.f32 %v5216_v38  ;;  %v1685_v47 = vadd.f32 %v5870_v37, %v7528_v3 }
 0x3c0   : > { %v6272_v46 = vpop.eup %6271  ;;  %6297 = vpow2.f32 %v5201_v39  ;;  %v7565_v22 = vpop.f32.mrf.mxu1 }
 0x3c1   : > { %v6274_v58 = vpop.eup %6273  ;;  %v2115_v59 = vadd.f32 1.0, %v6272_v46  ;;  %v1679_v1 = vpop.f32.mrf.mxu0 }
 0x3c2   : > { %v6276_v62 = vpop.eup %6275  ;;  %v2129_v4 = vadd.f32 1.0, %v6274_v58  ;;  %v7573_v31 = vpop.f32.mrf.mxu1 }
 0x3c3   : > { %v6278_v63 = vpop.eup %6277  ;;  %6299 = vrcp.f32 %v2115_v59  ;;  %v2114_v2 = vadd.f32 1.0, %v6276_v62 }
 0x3c4   : > { %6301 = vpow2.f32 %v5200_v53  ;;  %v2131_v6 = vadd.f32 1.0, %v6278_v63  ;;  %v6280_v55 = vpop.eup %6279  ;;  %v1605_v53 = vadd.f32 %v7500_v44, %v7528_v3 }
 0x3c5   : > { %6303 = vrcp.f32 %v2114_v2  ;;  %v6282_v9 = vpop.eup %6281  ;;  %v2128_v0 = vadd.f32 1.0, %v6280_v55 }
 0x3c6   : > { %6305 = vrcp.f32 %v2131_v6  ;;  %v6284_v10 = vpop.eup %6283  ;;  %v2112_v16 = vadd.f32 1.0, %v6282_v9 }
 0x3c7   : > { %6307 = vpow2.f32 %v5215_v52  ;;  %v2130_v14 = vadd.f32 1.0, %v6284_v10  ;;  %v6286_v15 = vpop.eup %6285  ;;  %v5195_v52 = vmul.f32 -1.442695, %v1610_v36  ;;  %v5194_v10 = vmul.f32 -1.442695, %v1605_v53 }
 0x3c8   : > { %6309 = vrcp.f32 %v2129_v4  ;;  %v6288_v19 = vpop.eup %6287  ;;  %v2127_v24 = vadd.f32 1.0, %v6286_v15  ;;  %v7580_v38 = vpop.f32.mrf.mxu1  ;;  %v6909_v4 = vld [vmem:[%s7164_s29 + $0x78] sm:$0xff]  ;;  %v1680_v15 = vadd.f32 %v7528_v3, %v1679_v1  ;;  %v5193_v36 = vmul.f32 -1.442695, %v1600_v48 }
 0x3c9   : > { %6311 = vrcp.f32 %v2113_v7  ;;  %v7561_v57 = vpop.eup %6289  ;;  %v2111_v26 = vadd.f32 1.0, %v6288_v19  ;;  %v6910_v7 = vld [vmem:[%s7164_s29 + $0xf8] sm:$0xff] }
 0x3ca   : > { %6313 = vrcp.f32 %v2130_v14  ;;  %v7567_v23 = vpop.eup %6291  ;;  %v7587_v2 = vpop.f32.mrf.mxu1  ;;  %v5210_v14 = vmul.f32 -1.442695, %v1685_v47 }
 0x3cb   : > { %6315 = vpow2.f32 %v5199_v11  ;;  %v6294_v25 = vpop.eup %6293 }
 0x3cc   : > { %6317 = vrcp.f32 %v2128_v0  ;;  %v6296_v28 = vpop.eup %6295  ;;  %v2126_v34 = vadd.f32 1.0, %v6294_v25  ;;  %v2123_v25 = vadd.f32 1.0, %v7567_v23  ;;  %v6913_v23 = vld [vmem:[%s7164_s29 + $0xe8] sm:$0xff] }
 0x3cd   : > { %6319 = vrcp.f32 %v2112_v16  ;;  %v6298_v50 = vpop.eup %6297  ;;  %v2125_v41 = vadd.f32 1.0, %v6296_v28 }
 0x3ce   : > { %6321 = vpow2.f32 %v5198_v12  ;;  %v2110_v58 = vadd.f32 1.0, %v6298_v50  ;;  %v6911_v12 = vld [vmem:[%s7164_s29 + $0x70] sm:$0xff]  ;;  %v1675_v50 = vadd.f32 %v7555_v17, %v7528_v3  ;;  %v6914_v17 = vld [vmem:[%s7164_s29 + $0x68] sm:$0xff] }
 0x3cf   : > { %6323 = vpow2.f32 %v5213_v20 }
 0x3d0   : > { %v6300_v32 = vpop.eup %6299  ;;  %6325 = vrcp.f32 %v2127_v24  ;;  %v7596_v11 = vpop.f32.mrf.mxu1 }
 0x3d1   : > { %v6302_v35 = vpop.eup %6301  ;;  %6327 = vrcp.f32 %v2111_v26  ;;  %v2307_v39 = vmul.f32 %v6300_v32, %v7576_v33 }
 0x3d2   : > { %v6304_v40 = vpop.eup %6303  ;;  %6329 = vpow2.f32 %v5212_v29  ;;  %v2109_v60 = vadd.f32 1.0, %v6302_v35 }
 0x3d3   : > { %v6306_v46 = vpop.eup %6305  ;;  %6331 = vpow2.f32 %v5197_v30  ;;  %v7590_v6 = vadd.f32 %v6909_v4, %v2307_v39  ;;  %v2306_v44 = vmul.f32 %v6304_v40, %v7576_v33  ;;  %v7619_v30 = vpop.f32.mrf.mxu1 }
 0x3d4   : > { %v6308_v59 = vpop.eup %6307  ;;  %6333 = vrcp.f32 %v2126_v34  ;;  %v2323_v62 = vmul.f32 %v6306_v46, %v7576_v33  ;;  %v5209_v34 = vmul.f32 -1.442695, %v1680_v15 }
 0x3d5   : > { %v6310_v63 = vpop.eup %6309  ;;  %6335 = vpow2.f32 %v5211_v51  ;;  %v2124_v54 = vadd.f32 1.0, %v6308_v59  ;;  %v7608_v20 = vadd.f32 %v6911_v12, %v2306_v44  ;;  %v5208_v59 = vmul.f32 -1.442695, %v1675_v50 }
 0x3d6   : > { %v6312_v55 = vpop.eup %6311  ;;  %6337 = vrcp.f32 %v2125_v41  ;;  %v7594_v9 = vadd.f32 %v6910_v7, %v2323_v62  ;;  %v2321_v16 = vmul.f32 %v6310_v63, %v7576_v33  ;;  %v1670_v62 = vadd.f32 %v7528_v3, %v7571_v27  ;;  %v6915_v63 = vld [vmem:[%s7164_s29 + $0xe0] sm:$0xff] }
 0x3d7   : > { %v6314_v61 = vpop.eup %6313  ;;  %6339 = vrcp.f32 %v2110_v58  ;;  %v2305_v21 = vmul.f32 %v6312_v55, %v7576_v33  ;;  %v5192_v44 = vmul.f32 -1.442695, %v1595_v45 }
 0x3d8   : > { %8876 = vst [vmem:[#allocation3_spill] sm:$0xff] %v7594_v9  ;;  %v6316_v0 = vpop.eup %6315  ;;  %5685 = vmatprep.subr.msk.mxu1 %vm398_vm0, %v7594_v9  ;;  %v2322_v5 = vmul.f32 %v6314_v61, %v7576_v33  ;;  %6341 = vpow2.f32 %v5195_v52  ;;  %v7624_v35 = vadd.f32 %v6913_v23, %v2321_v16  ;;  %v7627_v37 = vpop.f32.mrf.mxu1  ;;  %v5207_v16 = vmul.f32 -1.442695, %v1670_v62 }
 0x3d9   : > { %v6318_v19 = vpop.eup %6317  ;;  %5686 = vmatpush3.xpose.msk.msra.mxu1 %vm398_vm0, %v7590_v6  ;;  %6343 = vrcp.f32 %v2109_v60  ;;  %v2108_v29 = vadd.f32 1.0, %v6316_v0  ;;  %v7632_v39 = vadd.f32 %v6914_v17, %v2305_v21  ;;  %v6916_v60 = vld [vmem:[%s7164_s29 + $0x60] sm:$0xff] }
 0x3da   : > { %v6320_v24 = vpop.eup %6319  ;;  %v7613_v26 = vadd.f32 %v6912_v49, %v2322_v5  ;;  %6345 = vrcp.f32 %v2124_v54  ;;  %8878 = vst [vmem:[#allocation5_spill] sm:$0xff] %v7624_v35  ;;  %v2320_v51 = vmul.f32 %v6318_v19, %v7576_v33  ;;  %v7643_v55 = vpop.f32.mrf.mxu1  ;;  %v6917_v19 = vld [vmem:[%s7164_s29 + $0xd8] sm:$0xff] }
 0x3db   : > { %v6322_v28 = vpop.eup %6321  ;;  %6347 = vpow2.f32 %v5210_v14  ;;  %v2304_v40 = vmul.f32 %v6320_v24, %v7576_v33 }
 0x3dc   : > { %8877 = vst [vmem:[#allocation4_spill] sm:$0xff] %v7613_v26  ;;  %v6324_v32 = vpop.eup %6323  ;;  %5687 = vmatprep.subr.msk.mxu1 %vm398_vm0, %v7613_v26  ;;  %6349 = vpow2.f32 %v5194_v10  ;;  %v2107_v46 = vadd.f32 1.0, %v6322_v28  ;;  %v7640_v52 = vadd.f32 %v6915_v63, %v2320_v51  ;;  %v1590_v10 = vadd.f32 %v7528_v3, %v7498_v43  ;;  %v6918_v43 = vld [vmem:[%s7164_s29 + $0x58] sm:$0xff] }
 0x3dd   : > { %v6326_v42 = vpop.eup %6325  ;;  %5688 = vmatpush3.xpose.msk.msra.mxu1 %vm398_vm0, %v7608_v20  ;;  %6351 = vrcp.f32 %v2123_v25  ;;  %v2122_v58 = vadd.f32 1.0, %v6324_v32  ;;  %v7648_v7 = vadd.f32 %v6916_v60, %v2304_v40  ;;  %v2105_v28 = vadd.f32 1.0, %v7561_v57 }
 0x3de   : > { %v6328_v41 = vpop.eup %6327  ;;  %5689 = vmatprep.subr.msk.mxu1 %vm398_vm0, %v7624_v35  ;;  %6353 = vrcp.f32 %v2108_v29  ;;  %8879 = vst [vmem:[#allocation6_spill] sm:$0xff] %v7640_v52  ;;  %v2319_v1 = vmul.f32 %v6326_v42, %v7576_v33  ;;  %v5191_v25 = vmul.f32 -1.442695, %v1590_v10  ;;  %v6922_v10 = vld [vmem:[%s7164_s29 + $0x48] sm:$0xff] }
 0x3df   : > { %v6330_v53 = vpop.eup %6329  ;;  %6355 = vpow2.f32 %v5209_v34  ;;  %v2303_v27 = vmul.f32 %v6328_v41, %v7576_v33  ;;  %v6919_v34 = vld [vmem:[%s7164_s29 + $0xd0] sm:$0xff] }
 0x3e0   : > { %v6332_v47 = vpop.eup %6331  ;;  %6357 = vpow2.f32 %v5193_v36  ;;  %v2121_v54 = vadd.f32 1.0, %v6330_v53  ;;  %v7655_v15 = vpop.f32.mrf.mxu1  ;;  %v7658_v48 = vadd.f32 %v6917_v19, %v2319_v1  ;;  %v6920_v41 = vld [vmem:[%s7164_s29 + $0x50] sm:$0xff] }
 0x3e1   : > { %v6334_v4 = vpop.eup %6333  ;;  %5690 = vmatpush3.xpose.msk.msra.mxu1 %vm398_vm0, %v7632_v39  ;;  %6359 = vrcp.f32 %v2107_v46  ;;  %v2106_v14 = vadd.f32 1.0, %v6332_v47  ;;  %v7664_v21 = vadd.f32 %v6918_v43, %v2303_v27  ;;  %v6921_v47 = vld [vmem:[%s7164_s29 + $0xc8] sm:$0xff] }
 0x3e2   : > { %v6336_v61 = vpop.eup %6335  ;;  %5691 = vmatprep.subr.msk.mxu1 %vm398_vm0, %v7640_v52  ;;  %6361 = vrcp.f32 %v2122_v58  ;;  %8880 = vst [vmem:[#allocation7_spill] sm:$0xff] %v7658_v48  ;;  %v2318_v12 = vmul.f32 %v6334_v4, %v7576_v33  ;;  %v7669_v45 = vpop.f32.mrf.mxu1 }
 0x3e3   : > { %v6338_v0 = vpop.eup %6337  ;;  %6363 = vpow2.f32 %v5208_v59  ;;  %v2120_v32 = vadd.f32 1.0, %v6336_v61 }
 0x3e4   : > { %v6340_v5 = vpop.eup %6339  ;;  %6365 = vpow2.f32 %v5192_v44  ;;  %v7673_v23 = vadd.f32 %v6919_v34, %v2318_v12  ;;  %v2317_v51 = vmul.f32 %v6338_v0, %v7576_v33 }
 0x3e5   : > { %5692 = vmatpush3.xpose.msk.msra.mxu1 %vm398_vm0, %v7648_v7  ;;  %v6342_v24 = vpop.eup %6341  ;;  %6367 = vrcp.f32 %v2121_v54  ;;  %v2302_v29 = vmul.f32 %v6340_v5, %v7576_v33 }
 0x3e6   : > { %5693 = vmatprep.subr.msk.mxu1 %vm398_vm0, %v7658_v48  ;;  %v6344_v49 = vpop.eup %6343  ;;  %6369 = vrcp.f32 %v2106_v14  ;;  %8881 = vst [vmem:[#allocation8_spill] sm:$0xff] %v7673_v23  ;;  %v2104_v40 = vadd.f32 1.0, %v6342_v24  ;;  %v7687_v62 = vadd.f32 %v6921_v47, %v2317_v51 }
 0x3e7   : > { %v6346_v50 = vpop.eup %6345  ;;  %6371 = vpow2.f32 %v5207_v16  ;;  %v7683_v46 = vadd.f32 %v6920_v41, %v2302_v29  ;;  %v2301_v53 = vmul.f32 %v6344_v49, %v7576_v33  ;;  %v6923_v16 = vld [vmem:[%s7164_s29 + $0xc0] sm:$0xff] }
 0x3e8   : > { %v6348_v42 = vpop.eup %6347  ;;  %v7676_v36 = vpop.f32.mrf.mxu1  ;;  %6373 = vpow2.f32 %v5191_v25  ;;  %8882 = vst [vmem:[#allocation9_spill] sm:$0xff] %v7687_v62  ;;  %v2316_v63 = vmul.f32 %v6346_v50, %v7576_v33  ;;  %v6924_v50 = vld [vmem:[%s7164_s29 + $0x40] sm:$0xff] }
 0x3e9   : > { %5694 = vmatpush3.xpose.msk.msra.mxu1 %vm398_vm0, %v7664_v21  ;;  %v6350_v57 = vpop.eup %6349  ;;  %6375 = vrcp.f32 %v2105_v28  ;;  %v2119_v59 = vadd.f32 1.0, %v6348_v42  ;;  %v7699_v54 = vadd.f32 %v6922_v10, %v2301_v53  ;;  %v6927_v10 = vld [vmem:[%s7164_s29 + $0xb0] sm:$0xff] }
 0x3ea   : > { %5695 = vmatprep.subr.msk.mxu1 %vm398_vm0, %v7673_v23  ;;  %v6352_v17 = vpop.eup %6351  ;;  %6377 = vrcp.f32 %v2120_v32  ;;  %v7690_v4 = vpop.f32.mrf.mxu1  ;;  %v2103_v27 = vadd.f32 1.0, %v6350_v57  ;;  %v7703_v19 = vadd.f32 %v6923_v16, %v2316_v63  ;;  %v6925_v57 = vld [vmem:[%s7164_s29 + $0xb8] sm:$0xff] }
 0x3eb   : > { %v6354_v58 = vpop.eup %6353  ;;  %6379 = vrcp.f32 %v2104_v40  ;;  %v2315_v12 = vmul.f32 %v6352_v17, %v7576_v33  ;;  %v6926_v63 = vld [vmem:[%s7164_s29 + $0x38] sm:$0xff] }
 0x3ec   : > { %v6356_v1 = vpop.eup %6355  ;;  %v2300_v0 = vmul.f32 %v6354_v58, %v7576_v33  ;;  %6381 = vrcp.f32 %v2119_v59  ;;  %8883 = vst [vmem:[#allocation10_spill] sm:$0xff] %v7703_v19 }
 0x3ed   : > { %5696 = vmatpush3.xpose.msk.msra.mxu1 %vm398_vm0, %v7683_v46  ;;  %v6358_v44 = vpop.eup %6357  ;;  %v2118_v5 = vadd.f32 1.0, %v6356_v1  ;;  %6383 = vrcp.f32 %v2103_v27  ;;  %v7719_v17 = vadd.f32 %v6925_v57, %v2315_v12 }
 0x3ee   : > { %5697 = vmatprep.subr.msk.mxu1 %vm398_vm0, %v7687_v62  ;;  %v6360_v60 = vpop.eup %6359  ;;  %v2102_v28 = vadd.f32 1.0, %v6358_v44  ;;  %v7715_v32 = vadd.f32 %v6924_v50, %v2300_v0 }
 0x3ef   : > { %v6362_v14 = vpop.eup %6361  ;;  %v2299_v34 = vmul.f32 %v6360_v60, %v7576_v33  ;;  %6385 = vrcp.f32 %v2118_v5  ;;  %8884 = vst [vmem:[#allocation11_spill] sm:$0xff] %v7719_v17 }
 0x3f0   : > { %v7696_v61 = vpop.f32.mrf.mxu1  ;;  %v6364_v43 = vpop.eup %6363  ;;  %v2314_v40 = vmul.f32 %v6362_v14, %v7576_v33  ;;  %6387 = vrcp.f32 %v2102_v28 }
 0x3f1   : > { %5698 = vmatpush3.xpose.msk.msra.mxu1 %vm398_vm0, %v7699_v54  ;;  %v6366_v25 = vpop.eup %6365  ;;  %v2117_v42 = vadd.f32 1.0, %v6364_v43  ;;  %v7731_v1 = vadd.f32 %v6926_v63, %v2299_v34  ;;  %v6929_v34 = vld [vmem:[%s7164_s29 + $0xa8] sm:$0xff]  ;;  %v1825_v13 = vadd.f32 %v7696_v61, %v7528_v3  ;;  %v6935_v61 = vld [vmem:[%s7164_s29 + $0x90] sm:$0xff] }
 0x3f2   : > { %v7708_v24 = vpop.f32.mrf.mxu1  ;;  %5699 = vmatprep.subr.msk.mxu1 %vm398_vm0, %v7703_v19  ;;  %v6368_v49 = vpop.eup %6367  ;;  %v2101_v59 = vadd.f32 1.0, %v6366_v25  ;;  %v7735_v0 = vadd.f32 %v6927_v10, %v2314_v40  ;;  %v6928_v25 = vld [vmem:[%s7164_s29 + $0x30] sm:$0xff]  ;;  %v6937_v19 = vld [vmem:[%s7164_s29 + $0x88] sm:$0xff] }
 0x3f3   : > { %v6370_v51 = vpop.eup %6369  ;;  %6389 = vrcp.f32 %v2117_v42  ;;  %v2313_v14 = vmul.f32 %v6368_v49, %v7576_v33  ;;  %v5238_v23 = vmul.f32 -1.442695, %v1825_v13 }
 0x3f4   : > { %v7712_v29 = vpop.f32.mrf.mxu1  ;;  %v6372_v41 = vpop.eup %6371  ;;  %v2298_v44 = vmul.f32 %v6370_v51, %v7576_v33  ;;  %8885 = vst [vmem:[#allocation12_spill] sm:$0xff] %v7735_v0  ;;  %6391 = vrcp.f32 %v2101_v59 }
 0x3f5   : > { %5700 = vmatpush3.xpose.msk.msra.mxu1 %vm398_vm0, %v7715_v32  ;;  %v6374_v58 = vpop.eup %6373  ;;  %v2116_v27 = vadd.f32 1.0, %v6372_v41  ;;  %v7751_v51 = vadd.f32 %v6929_v34, %v2313_v14 }
 0x3f6   : > { %v7724_v53 = vpop.f32.mrf.mxu1  ;;  %5701 = vmatprep.subr.msk.mxu1 %vm398_vm0, %v7719_v17  ;;  %v6376_v60 = vpop.eup %6375  ;;  %v2100_v12 = vadd.f32 1.0, %v6374_v58  ;;  %v7747_v28 = vadd.f32 %v6928_v25, %v2298_v44  ;;  %v6930_v58 = vld [vmem:[%s7164_s29 + $0x28] sm:$0xff]  ;;  %v6932_v25 = vld [vmem:[%s7164_s29 + $0x20] sm:$0xff] }
 0x3f7   : > { %v6378_v5 = vpop.eup %6377  ;;  %v2297_v50 = vmul.f32 %v6376_v60, %v7576_v33  ;;  %6393 = vrcp.f32 %v2116_v27  ;;  %v6931_v60 = vld [vmem:[%s7164_s29 + $0xa0] sm:$0xff] }
 0x3f8   : > { %v7728_v47 = vpop.f32.mrf.mxu1  ;;  %v6380_v49 = vpop.eup %6379  ;;  %v2312_v42 = vmul.f32 %v6378_v5, %v7576_v33  ;;  %6395 = vrcp.f32 %v2100_v12 }
 0x3f9   : > { %5702 = vmatpush3.xpose.msk.msra.mxu1 %vm398_vm0, %v7731_v1  ;;  %v6382_v57 = vpop.eup %6381  ;;  %v7763_v59 = vadd.f32 %v6930_v58, %v2297_v50  ;;  %v2296_v63 = vmul.f32 %v6380_v49, %v7576_v33  ;;  %6397 = vpow2.f32 %v5238_v23 }
 0x3fa   : > { %v7740_v16 = vpop.f32.mrf.mxu1  ;;  %5703 = vmatprep.subr.msk.mxu1 %vm398_vm0, %v7735_v0  ;;  %v6384_v44 = vpop.eup %6383  ;;  %v7767_v27 = vadd.f32 %v6931_v60, %v2312_v42  ;;  %v2311_v10 = vmul.f32 %v6382_v57, %v7576_v33  ;;  %v6933_v42 = vld [vmem:[%s7164_s29 + $0x98] sm:$0xff] }
 0x3fb   : > { %v7779_v50 = vadd.f32 %v6932_v25, %v2296_v63  ;;  %v2295_v49 = vmul.f32 %v6384_v44, %v7576_v33  ;;  %v1820_v63 = vadd.f32 %v7528_v3, %v7708_v24 }
 0x3fc   : > { %v7744_v43 = vpop.f32.mrf.mxu1  ;;  %v6386_v14 = vpop.eup %6385  ;;  %v7783_v57 = vadd.f32 %v6933_v42, %v2311_v10  ;;  %v6934_v10 = vld [vmem:[%s7164_s29 + $0x18] sm:$0xff] }
 0x3fd   : > { %5704 = vmatpush3.xpose.msk.msra.mxu1 %vm398_vm0, %v7747_v28  ;;  %v6388_v34 = vpop.eup %6387  ;;  %v2310_v58 = vmul.f32 %v6386_v14, %v7576_v33  ;;  %v7797_v25 = vadd.f32 %v6934_v10, %v2295_v49  ;;  %v5237_v48 = vmul.f32 -1.442695, %v1820_v63  ;;  %v6936_v10 = vld [vmem:[%s7164_s29 + $0x10] sm:$0xff] }
 0x3fe   : > { %v7756_v40 = vpop.f32.mrf.mxu1  ;;  %5705 = vmatprep.subr.msk.mxu1 %vm398_vm0, %v7751_v51  ;;  %v2294_v14 = vmul.f32 %v6388_v34, %v7576_v33 }
 0x3ff   : > { %v7801_v9 = vadd.f32 %v6935_v61, %v2310_v58  ;;  %6399 = vpow2.f32 %v5237_v48  ;;  %v1810_v48 = vadd.f32 %v7528_v3, %v7690_v4  ;;  %v1805_v4 = vadd.f32 %v7655_v15, %v7528_v3 }
 0x400   : > { %v7760_v41 = vpop.f32.mrf.mxu1  ;;  %v6390_v60 = vpop.eup %6389  ;;  %v7809_v34 = vadd.f32 %v6936_v10, %v2294_v14  ;;  %v1800_v15 = vadd.f32 %v7528_v3, %v7669_v45 }
 0x401   : > { %5706 = vmatpush3.xpose.msk.msra.mxu1 %vm398_vm0, %v7763_v59  ;;  %v6392_v42 = vpop.eup %6391  ;;  %v2309_v52 = vmul.f32 %v6390_v60, %v7576_v33  ;;  %v1815_v60 = vadd.f32 %v7676_v36, %v7528_v3 }
 0x402   : > { %v7772_v5 = vpop.f32.mrf.mxu1  ;;  %5707 = vmatprep.subr.msk.mxu1 %vm398_vm0, %v7767_v27  ;;  %v2293_v58 = vmul.f32 %v6392_v42, %v7576_v33 }
 0x403   : > { %v7816_v62 = vadd.f32 %v6937_v19, %v2309_v52  ;;  %v6939_v19 = vld [vmem:[%s7164_s29 + $0x80] sm:$0xff] }
 0x404   : > { %v7776_v12 = vpop.f32.mrf.mxu1  ;;  %v6394_v35 = vpop.eup %6393 }
 0x405   : > { %5708 = vmatpush3.xpose.msk.msra.mxu1 %vm398_vm0, %v7779_v50  ;;  %v6396_v61 = vpop.eup %6395  ;;  %v2308_v63 = vmul.f32 %v6394_v35, %v7576_v33  ;;  %v5236_v35 = vmul.f32 -1.442695, %v1815_v60 }
 0x406   : > { %v7790_v26 = vpop.f32.mrf.mxu1  ;;  %5709 = vmatprep.subr.msk.mxu1 %vm398_vm0, %v7783_v57  ;;  %v2292_v52 = vmul.f32 %v6396_v61, %v7576_v33 }
 0x407   : > { %v7830_v17 = vadd.f32 %v6939_v19, %v2308_v63  ;;  %v5235_v19 = vmul.f32 -1.442695, %v1810_v48  ;;  %v7864_v48 = vld [vmem:[%s8837_s1 + $0x30] sm:$0xff] }
 0x408   : > { %v5930_v44 = vpop.f32.mrf.mxu1 }
 0x409   : > { %5710 = vmatpush3.xpose.msk.msra.mxu1 %vm398_vm0, %v7797_v25  ;;  %v1885_v61 = vadd.f32 %v5930_v44, %v7528_v3  ;;  %v7852_v44 = vld [vmem:[%s8837_s1 + $0x28] sm:$0xff] }
 0x40a   : > { %v1879_v24 = vpop.f32.mrf.mxu1  ;;  %5711 = vmatprep.subr.msk.mxu1 %vm398_vm0, %v7801_v9 }
 0x40c   : > { %v5933_v49 = vpop.f32.mrf.mxu1 }
 0x40d   : > { %v1895_v13 = vadd.f32 %v5933_v49, %v7528_v3  ;;  %5712 = vmatpush3.xpose.msk.msra.mxu1 %vm398_vm0, %v7809_v34  ;;  %v6938_v49 = vld [vmem:[%s7164_s29 + $0x8] sm:$0xff] }
 0x40e   : > { %v1889_v14 = vpop.f32.mrf.mxu1  ;;  %5713 = vmatprep.subr.msk.mxu1 %vm398_vm0, %v7816_v62  ;;  %v7825_v0 = vadd.f32 %v6938_v49, %v2293_v58 }
 0x40f   : > { %v5252_v42 = vmul.f32 -1.442695, %v1895_v13  ;;  %v1890_v36 = vadd.f32 %v7528_v3, %v1889_v14 }
 0x410   : > { %v5936_v10 = vpop.f32.mrf.mxu1 }
 0x411   : > { %v1905_v23 = vadd.f32 %v5936_v10, %v7528_v3  ;;  %5714 = vmatpush3.xpose.msk.msra.mxu1 %vm398_vm0, %v7825_v0  ;;  %6401 = vpow2.f32 %v5252_v42  ;;  %v5251_v60 = vmul.f32 -1.442695, %v1890_v36  ;;  %v6940_v10 = vld [vmem:[%s7164_s29] sm:$0xff]  ;;  %v5250_v42 = vmul.f32 -1.442695, %v1885_v61 }
 0x412   : > { %v1899_v13 = vpop.f32.mrf.mxu1  ;;  %5715 = vmatprep.subr.msk.mxu1 %vm398_vm0, %v7830_v17  ;;  %v7841_v63 = vadd.f32 %v6940_v10, %v2292_v52  ;;  %6403 = vpow2.f32 %v5236_v35  ;;  %v1880_v36 = vadd.f32 %v7528_v3, %v1879_v24  ;;  %v5234_v52 = vmul.f32 -1.442695, %v1805_v4 }
 0x413   : > { %v5254_v14 = vmul.f32 -1.442695, %v1905_v23  ;;  %v1900_v58 = vadd.f32 %v7528_v3, %v1899_v13  ;;  %v1795_v23 = vadd.f32 %v7627_v37, %v7528_v3  ;;  %v6398_v37 = vpop.eup %6397  ;;  %v1875_v13 = vadd.f32 %v7776_v12, %v7528_v3  ;;  %v7877_v12 = vld [vmem:[%s8837_s1 + $0x38] sm:$0xff] }
 0x414   : > { %v6400_v24 = vpop.eup %6399  ;;  %v5249_v45 = vmul.f32 -1.442695, %v1880_v36  ;;  %v2147_v61 = vadd.f32 1.0, %v6398_v37  ;;  %v1785_v37 = vadd.f32 %v7596_v11, %v7528_v3 }
 0x415   : > { %v5253_v49 = vmul.f32 -1.442695, %v1900_v58  ;;  %6405 = vpow2.f32 %v5254_v14  ;;  %5716 = vmatpush3.xpose.msk.msra.mxu1 %vm398_vm0, %v7841_v63  ;;  %v5232_v35 = vmul.f32 -1.442695, %v1795_v23  ;;  %v5233_v14 = vmul.f32 -1.442695, %v1800_v15 }
 0x416   : > { %v1870_v58 = vadd.f32 %v7528_v3, %v7790_v26  ;;  %v5248_v10 = vmul.f32 -1.442695, %v1875_v13  ;;  %v1790_v26 = vadd.f32 %v7528_v3, %v7643_v55 }
 0x417   : > { %6407 = vpow2.f32 %v5253_v49 }
 0x418   : > { %6409 = vpow2.f32 %v5251_v60  ;;  %5718 = vmatmul.mubr.msk.f32.vlgmr.msra.gmra.mxu1 %vm398_vm0, %v7519_v56  ;;  %v2146_v60 = vadd.f32 1.0, %v6400_v24  ;;  %v5247_v4 = vmul.f32 -1.442695, %v1870_v58 }
 0x419   : > { %6411 = vpow2.f32 %v5235_v19  ;;  %5719 = vmatprep.mubr.msk.f32.mxu1 %vm398_vm0, %v7852_v44 }
 0x41a   : > { %6413 = vpow2.f32 %v5250_v42  ;;  %v1865_v42 = vadd.f32 %v7760_v41, %v7528_v3 }
 0x41b   : > { %6415 = vpow2.f32 %v5234_v52 }
 0x41c   : > { %5720 = vmatmul.mubr.msk.f32.gmra.mxu1 %vm398_vm0, %v7852_v44  ;;  %6417 = vpow2.f32 %v5232_v35  ;;  %v5231_v35 = vmul.f32 -1.442695, %v1790_v26 }
 0x41d   : > { %5721 = vmatprep.mubr.msk.f32.mxu1 %vm398_vm0, %v7864_v48  ;;  %6419 = vpow2.f32 %v5249_v45  ;;  %v5246_v45 = vmul.f32 -1.442695, %v1865_v42 }
 0x41e   : > { %v6402_v49 = vpop.eup %6401  ;;  %6421 = vpow2.f32 %v5233_v14  ;;  %v1860_v14 = vadd.f32 %v7528_v3, %v7772_v5 }
 0x41f   : > { %v6404_v19 = vpop.eup %6403  ;;  %6423 = vrcp.f32 %v2147_v61  ;;  %v2161_v15 = vadd.f32 1.0, %v6402_v49  ;;  %v5230_v61 = vmul.f32 -1.442695, %v1785_v37 }
 0x420   : > { %5722 = vmatmul.mubr.msk.f32.gmra.mxu1 %vm398_vm0, %v7864_v48  ;;  %6425 = vrcp.f32 %v2146_v60  ;;  %v2145_v13 = vadd.f32 1.0, %v6404_v19  ;;  %v1780_v60 = vadd.f32 %v7528_v3, %v7619_v30  ;;  %v5245_v26 = vmul.f32 -1.442695, %v1860_v14 }
 0x421   : > { %5723 = vmatprep.mubr.msk.f32.mxu1 %vm398_vm0, %v7877_v12  ;;  %6427 = vpow2.f32 %v5248_v10 }
 0x422   : > { %v6406_v23 = vpop.eup %6405  ;;  %6429 = vpow2.f32 %v5247_v4  ;;  %v5229_v42 = vmul.f32 -1.442695, %v1780_v60 }
 0x423   : > { %v2163_v52 = vadd.f32 1.0, %v6406_v23  ;;  %v1775_v23 = vadd.f32 %v7580_v38, %v7528_v3 }
 0x424   : > { %v6408_v36 = vpop.eup %6407  ;;  %5724 = vmatmul.mubr.msk.f32.gmra.mxu1 %vm398_vm0, %v7877_v12 }
 0x425   : > { %v6410_v55 = vpop.eup %6409  ;;  %v2162_v24 = vadd.f32 1.0, %v6408_v36  ;;  %6431 = vrcp.f32 %v2163_v52  ;;  %5757 = vmatprep.mubr.msk.f32.mxu1 %vm398_vm0, %v7519_v56  ;;  %v1855_v56 = vadd.f32 %v7744_v43, %v7528_v3 }
 0x426   : > { %v6412_v41 = vpop.eup %6411  ;;  %v2160_v58 = vadd.f32 1.0, %v6410_v55  ;;  %v1850_v55 = vadd.f32 %v7528_v3, %v7756_v40 }
 0x427   : > { %6433 = vrcp.f32 %v2162_v24  ;;  %v6414_v11 = vpop.eup %6413  ;;  %v2144_v10 = vadd.f32 1.0, %v6412_v41  ;;  %v5244_v52 = vmul.f32 -1.442695, %v1855_v56  ;;  %v5228_v24 = vmul.f32 -1.442695, %v1775_v23  ;;  %v6941_v23 = vld [vmem:[%s7164_s29 + $0x1f8] sm:$0xff] }
 0x428   : > { %6435 = vrcp.f32 %v2161_v15  ;;  %v6416_v49 = vpop.eup %6415  ;;  %v2159_v19 = vadd.f32 1.0, %v6414_v11 }
 0x429   : > { %6437 = vpow2.f32 %v5231_v35  ;;  %v6418_v4 = vpop.eup %6417  ;;  %v2143_v30 = vadd.f32 1.0, %v6416_v49 }
 0x42a   : > { %6439 = vrcp.f32 %v2145_v13  ;;  %v6420_v5 = vpop.eup %6419  ;;  %v1770_v13 = vadd.f32 %v7528_v3, %v7587_v2 }
 0x42b   : > { %6441 = vpow2.f32 %v5246_v45  ;;  %v6422_v36 = vpop.eup %6421  ;;  %v2158_v37 = vadd.f32 1.0, %v6420_v5  ;;  %v1845_v45 = vadd.f32 %v7728_v47, %v7528_v3  ;;  %v2141_v47 = vadd.f32 1.0, %v6418_v4 }
 0x42c   : > { %6443 = vrcp.f32 %v2160_v58  ;;  %v6424_v15 = vpop.eup %6423  ;;  %v2142_v41 = vadd.f32 1.0, %v6422_v36  ;;  %v5243_v58 = vmul.f32 -1.442695, %v1850_v55  ;;  %v5227_v49 = vmul.f32 -1.442695, %v1770_v13  ;;  %v6942_v36 = vld [vmem:[%s7164_s29 + $0x178] sm:$0xff] }
 0x42d   : > { %6445 = vpow2.f32 %v5230_v61  ;;  %v6426_v43 = vpop.eup %6425  ;;  %v2339_v40 = vmul.f32 %v6424_v15, %v7576_v33  ;;  %v1765_v61 = vadd.f32 %v7565_v22, %v7528_v3  ;;  %v1840_v5 = vadd.f32 %v7528_v3, %v7740_v16  ;;  %v6943_v15 = vld [vmem:[%s7164_s29 + $0x1f0] sm:$0xff] }
 0x42e   : > { %6447 = vrcp.f32 %v2144_v10  ;;  %v6428_v35 = vpop.eup %6427  ;;  %v2338_v4 = vmul.f32 %v6426_v43, %v7576_v33 }
 0x42f   : > { %6449 = vpow2.f32 %v5245_v26  ;;  %v6430_v38 = vpop.eup %6429  ;;  %v2157_v60 = vadd.f32 1.0, %v6428_v35  ;;  %v5226_v35 = vmul.f32 -1.442695, %v1765_v61 }
 0x430   : > { %6451 = vrcp.f32 %v2159_v19  ;;  %v5242_v19 = vmul.f32 -1.442695, %v1845_v45 }
 0x431   : > { %6453 = vpow2.f32 %v5229_v42 }
 0x432   : > { %6455 = vrcp.f32 %v2143_v30  ;;  %v6432_v14 = vpop.eup %6431  ;;  %v7918_v30 = vadd.f32 %v6942_v36, %v2339_v40 }
 0x433   : > { %6457 = vpow2.f32 %v5244_v52  ;;  %v2355_v2 = vmul.f32 %v6432_v14, %v7576_v33  ;;  %v5241_v14 = vmul.f32 -1.442695, %v1840_v5 }
 0x434   : > { %v6434_v11 = vpop.eup %6433  ;;  %6459 = vrcp.f32 %v2158_v37  ;;  %8887 = vst [vmem:[#allocation14_spill] sm:$0xff] %v7918_v30  ;;  %v2156_v37 = vadd.f32 1.0, %v6430_v38 }
 0x435   : > { %v6436_v10 = vpop.eup %6435  ;;  %6461 = vpow2.f32 %v5228_v24  ;;  %v2354_v56 = vmul.f32 %v6434_v11, %v7576_v33  ;;  %v7915_v22 = vadd.f32 %v6941_v23, %v2355_v2  ;;  %v6944_v24 = vld [vmem:[%s8842_s6] ss:$0 sm:$0xff] }
 0x436   : > { %v6438_v26 = vpop.eup %6437  ;;  %6463 = vrcp.f32 %v2142_v41  ;;  %v2353_v3 = vmul.f32 %v6436_v10, %v7576_v33  ;;  %v1760_v13 = vadd.f32 %v6944_v24, %v7573_v31  ;;  %v1835_v41 = vadd.f32 %v6944_v24, %v7712_v29 }
 0x437   : > { %8886 = vst [vmem:[#allocation13_spill] sm:$0xff] %v7915_v22  ;;  %v6440_v42 = vpop.eup %6439  ;;  %6465 = vpow2.f32 %v5243_v58  ;;  %v7921_v52 = vadd.f32 %v6943_v15, %v2354_v56  ;;  %5725 = vmatprep.subr.msk.mxu1 %vm398_vm0, %v7915_v22  ;;  %v2140_v38 = vadd.f32 1.0, %v6438_v26  ;;  %v6945_v58 = vld [vmem:[%s7164_s29 + $0x170] sm:$0xff]  ;;  %v1830_v23 = vadd.f32 %v6944_v24, %v7724_v53 }
 0x438   : > { %v6442_v55 = vpop.eup %6441  ;;  %6467 = vrcp.f32 %v2157_v60  ;;  %5726 = vmatpush3.xpose.msk.msra.mxu1 %vm398_vm0, %v7918_v30  ;;  %v7937_v40 = vadd.f32 %v6945_v58, %v2338_v4  ;;  %v2337_v31 = vmul.f32 %v6440_v42, %v7576_v33  ;;  %v6946_v60 = vld [vmem:[%s7164_s29 + $0x1e8] sm:$0xff] }
 0x439   : > { %8888 = vst [vmem:[#allocation15_spill] sm:$0xff] %v7921_v52  ;;  %v6444_v16 = vpop.eup %6443  ;;  %6469 = vpow2.f32 %v5227_v49  ;;  %5727 = vmatprep.subr.msk.mxu1 %vm398_vm0, %v7921_v52  ;;  %v2155_v61 = vadd.f32 1.0, %v6442_v55  ;;  %v7941_v2 = vadd.f32 %v6946_v60, %v2353_v3  ;;  %v1755_v49 = vadd.f32 %v6944_v24, %v7549_v8  ;;  %v6947_v42 = vld [vmem:[%s7164_s29 + $0x168] sm:$0xff]  ;;  %v6948_v55 = vld [vmem:[%s7164_s29 + $0x1e0] sm:$0xff] }
 0x43a   : > { %v6446_v43 = vpop.eup %6445  ;;  %6471 = vrcp.f32 %v2141_v47  ;;  %8889 = vst [vmem:[#allocation16_spill] sm:$0xff] %v7937_v40  ;;  %v2352_v29 = vmul.f32 %v6444_v16, %v7576_v33  ;;  %v5225_v47 = vmul.f32 -1.442695, %v1760_v13  ;;  %v7951_v36 = vadd.f32 %v6947_v42, %v2337_v31  ;;  %v6952_v42 = vld [vmem:[%s7164_s29 + $0x1d0] sm:$0xff]  ;;  %v6970_v52 = vld [vmem:[%s7164_s29 + $0x188] sm:$0xff] }
 0x43b   : > { %v6448_v45 = vpop.eup %6447  ;;  %6473 = vpow2.f32 %v5242_v19  ;;  %8890 = vst [vmem:[#allocation17_spill] sm:$0xff] %v7941_v2  ;;  %v2139_v26 = vadd.f32 1.0, %v6446_v43  ;;  %v5240_v19 = vmul.f32 -1.442695, %v1835_v41  ;;  %v1750_v13 = vadd.f32 %v6944_v24, %v7557_v18 }
 0x43c   : > { %v6450_v11 = vpop.eup %6449  ;;  %6475 = vrcp.f32 %v2156_v37  ;;  %5728 = vmatpush3.xpose.msk.msra.mxu1 %vm398_vm0, %v7937_v40  ;;  %v2336_v8 = vmul.f32 %v6448_v45, %v7576_v33  ;;  %v7955_v37 = vadd.f32 %v6948_v55, %v2352_v29  ;;  %v5239_v41 = vmul.f32 -1.442695, %v1830_v23  ;;  %v6949_v45 = vld [vmem:[%s7164_s29 + $0x160] sm:$0xff] }
 0x43d   : > { %v6452_v10 = vpop.eup %6451  ;;  %6477 = vpow2.f32 %v5226_v35  ;;  %5729 = vmatprep.subr.msk.mxu1 %vm398_vm0, %v7941_v2  ;;  %v2154_v4 = vadd.f32 1.0, %v6450_v11  ;;  %v5224_v35 = vmul.f32 -1.442695, %v1755_v49 }
 0x43e   : > { %v6454_v56 = vpop.eup %6453  ;;  %6479 = vrcp.f32 %v2140_v38  ;;  %8891 = vst [vmem:[#allocation18_spill] sm:$0xff] %v7955_v37  ;;  %v2351_v3 = vmul.f32 %v6452_v10, %v7576_v33  ;;  %v5223_v10 = vmul.f32 -1.442695, %v1750_v13 }
 0x43f   : > { %v6456_v5 = vpop.eup %6455  ;;  %6481 = vpow2.f32 %v5241_v14  ;;  %v2138_v43 = vadd.f32 1.0, %v6454_v56  ;;  %v7964_v14 = vadd.f32 %v6949_v45, %v2336_v8  ;;  %v6951_v56 = vld [vmem:[%s7164_s29 + $0x158] sm:$0xff] }
 0x440   : > { %v6458_v15 = vpop.eup %6457  ;;  %6483 = vrcp.f32 %v2155_v61  ;;  %5730 = vmatpush3.xpose.msk.msra.mxu1 %vm398_vm0, %v7951_v36  ;;  %v2335_v58 = vmul.f32 %v6456_v5, %v7576_v33  ;;  %v6950_v61 = vld [vmem:[%s7164_s29 + $0x1d8] sm:$0xff] }
 0x441   : > { %v6460_v16 = vpop.eup %6459  ;;  %6485 = vpow2.f32 %v5225_v47  ;;  %5731 = vmatprep.subr.msk.mxu1 %vm398_vm0, %v7955_v37  ;;  %8892 = vst [vmem:[#allocation19_spill] sm:$0xff] %v7964_v14  ;;  %v2153_v11 = vadd.f32 1.0, %v6458_v15  ;;  %v7968_v60 = vadd.f32 %v6950_v61, %v2351_v3 }
 0x442   : > { %v6462_v53 = vpop.eup %6461  ;;  %6487 = vrcp.f32 %v2139_v26  ;;  %v2350_v18 = vmul.f32 %v6460_v16, %v7576_v33  ;;  %v7976_v26 = vadd.f32 %v6951_v56, %v2335_v58  ;;  %v6956_v56 = vld [vmem:[%s7164_s29 + $0x1c0] sm:$0xff] }
 0x443   : > { %v6464_v38 = vpop.eup %6463  ;;  %6489 = vpow2.f32 %v5240_v19  ;;  %8893 = vst [vmem:[#allocation20_spill] sm:$0xff] %v7968_v60  ;;  %v2137_v47 = vadd.f32 1.0, %v6462_v53 }
 0x444   : > { %v6466_v31 = vpop.eup %6465  ;;  %6491 = vrcp.f32 %v2154_v4  ;;  %5732 = vmatpush3.xpose.msk.msra.mxu1 %vm398_vm0, %v7964_v14  ;;  %v2334_v19 = vmul.f32 %v6464_v38, %v7576_v33  ;;  %v7980_v8 = vadd.f32 %v6952_v42, %v2350_v18 }
 0x445   : > { %v6468_v24 = vpop.eup %6467  ;;  %6493 = vpow2.f32 %v5224_v35  ;;  %5733 = vmatprep.subr.msk.mxu1 %vm398_vm0, %v7968_v60  ;;  %v2152_v23 = vadd.f32 1.0, %v6466_v31  ;;  %v6953_v35 = vld [vmem:[%s7164_s29 + $0x150] sm:$0xff] }
 0x446   : > { %v6470_v29 = vpop.eup %6469  ;;  %6495 = vrcp.f32 %v2138_v43  ;;  %8894 = vst [vmem:[#allocation21_spill] sm:$0xff] %v7980_v8  ;;  %v2349_v15 = vmul.f32 %v6468_v24, %v7576_v33  ;;  %v7988_v53 = vadd.f32 %v6953_v35, %v2334_v19  ;;  %v6955_v24 = vld [vmem:[%s7164_s29 + $0x148] sm:$0xff] }
 0x447   : > { %v6472_v49 = vpop.eup %6471  ;;  %6497 = vpow2.f32 %v5239_v41  ;;  %v2136_v16 = vadd.f32 1.0, %v6470_v29  ;;  %v6954_v41 = vld [vmem:[%s7164_s29 + $0x1c8] sm:$0xff] }
 0x448   : > { %v6474_v5 = vpop.eup %6473  ;;  %6499 = vrcp.f32 %v2153_v11  ;;  %5734 = vmatpush3.xpose.msk.msra.mxu1 %vm398_vm0, %v7976_v26  ;;  %v2333_v13 = vmul.f32 %v6472_v49, %v7576_v33  ;;  %v7992_v45 = vadd.f32 %v6954_v41, %v2349_v15 }
 0x449   : > { %v6476_v4 = vpop.eup %6475  ;;  %6501 = vpow2.f32 %v5223_v10  ;;  %5735 = vmatprep.subr.msk.mxu1 %vm398_vm0, %v7980_v8  ;;  %v2151_v38 = vadd.f32 1.0, %v6474_v5 }
 0x44a   : > { %v6478_v55 = vpop.eup %6477  ;;  %6503 = vrcp.f32 %v2137_v47  ;;  %8895 = vst [vmem:[#allocation22_spill] sm:$0xff] %v7992_v45  ;;  %v2348_v58 = vmul.f32 %v6476_v4, %v7576_v33  ;;  %v8000_v29 = vadd.f32 %v6955_v24, %v2333_v13 }
 0x44b   : > { %v6480_v3 = vpop.eup %6479  ;;  %6505 = vrcp.f32 %v2152_v23  ;;  %v2135_v18 = vadd.f32 1.0, %v6478_v55  ;;  %v6957_v55 = vld [vmem:[%s7164_s29 + $0x140] sm:$0xff] }
 0x44c   : > { %v6482_v43 = vpop.eup %6481  ;;  %5736 = vmatpush3.xpose.msk.msra.mxu1 %vm398_vm0, %v7988_v53  ;;  %6507 = vrcp.f32 %v2136_v16  ;;  %v2332_v10 = vmul.f32 %v6480_v3, %v7576_v33  ;;  %v8004_v19 = vadd.f32 %v6956_v56, %v2348_v58 }
 0x44d   : > { %v6484_v31 = vpop.eup %6483  ;;  %5737 = vmatprep.subr.msk.mxu1 %vm398_vm0, %v7992_v45  ;;  %6509 = vrcp.f32 %v2151_v38  ;;  %v2150_v47 = vadd.f32 1.0, %v6482_v43  ;;  %v6958_v43 = vld [vmem:[%s7164_s29 + $0x1b8] sm:$0xff] }
 0x44e   : > { %v6486_v11 = vpop.eup %6485  ;;  %8896 = vst [vmem:[#allocation23_spill] sm:$0xff] %v8004_v19  ;;  %v2347_v5 = vmul.f32 %v6484_v31, %v7576_v33  ;;  %6511 = vrcp.f32 %v2135_v18  ;;  %v8012_v3 = vadd.f32 %v6957_v55, %v2332_v10 }
 0x44f   : > { %v6488_v61 = vpop.eup %6487  ;;  %v2134_v4 = vadd.f32 1.0, %v6486_v11  ;;  %6513 = vrcp.f32 %v2150_v47  ;;  %v6960_v47 = vld [vmem:[%s7164_s29 + $0x1b0] sm:$0xff] }
 0x450   : > { %v6490_v49 = vpop.eup %6489  ;;  %5738 = vmatpush3.xpose.msk.msra.mxu1 %vm398_vm0, %v8000_v29  ;;  %v2331_v16 = vmul.f32 %v6488_v61, %v7576_v33  ;;  %v8016_v38 = vadd.f32 %v6958_v43, %v2347_v5  ;;  %v6959_v61 = vld [vmem:[%s7164_s29 + $0x138] sm:$0xff] }
 0x451   : > { %v6492_v23 = vpop.eup %6491  ;;  %5739 = vmatprep.subr.msk.mxu1 %vm398_vm0, %v8004_v19  ;;  %v2149_v13 = vadd.f32 1.0, %v6490_v49  ;;  %6515 = vrcp.f32 %v2134_v4 }
 0x452   : > { %v6494_v42 = vpop.eup %6493  ;;  %8897 = vst [vmem:[#allocation24_spill] sm:$0xff] %v8016_v38  ;;  %v2346_v41 = vmul.f32 %v6492_v23, %v7576_v33  ;;  %v8024_v18 = vadd.f32 %v6959_v61, %v2331_v16 }
 0x453   : > { %v6496_v15 = vpop.eup %6495  ;;  %v2133_v11 = vadd.f32 1.0, %v6494_v42  ;;  %6517 = vrcp.f32 %v2149_v13 }
 0x454   : > { %v6498_v35 = vpop.eup %6497  ;;  %5740 = vmatpush3.xpose.msk.msra.mxu1 %vm398_vm0, %v8012_v3  ;;  %v2330_v24 = vmul.f32 %v6496_v15, %v7576_v33  ;;  %v8028_v56 = vadd.f32 %v6960_v47, %v2346_v41  ;;  %v6961_v15 = vld [vmem:[%s7164_s29 + $0x130] sm:$0xff] }
 0x455   : > { %v6500_v58 = vpop.eup %6499  ;;  %5741 = vmatprep.subr.msk.mxu1 %vm398_vm0, %v8016_v38  ;;  %v2148_v49 = vadd.f32 1.0, %v6498_v35  ;;  %6519 = vrcp.f32 %v2133_v11  ;;  %v6962_v35 = vld [vmem:[%s7164_s29 + $0x1a8] sm:$0xff] }
 0x456   : > { %v6502_v31 = vpop.eup %6501  ;;  %8898 = vst [vmem:[#allocation25_spill] sm:$0xff] %v8028_v56  ;;  %v2345_v5 = vmul.f32 %v6500_v58, %v7576_v33  ;;  %v8036_v4 = vadd.f32 %v6961_v15, %v2330_v24  ;;  %v6963_v58 = vld [vmem:[%s7164_s29 + $0x128] sm:$0xff]  ;;  %v6964_v24 = vld [vmem:[%s7164_s29 + $0x1a0] sm:$0xff] }
 0x457   : > { %v6504_v10 = vpop.eup %6503  ;;  %v2132_v42 = vadd.f32 1.0, %v6502_v31  ;;  %6521 = vrcp.f32 %v2148_v49 }
 0x458   : > { %v6506_v23 = vpop.eup %6505  ;;  %5742 = vmatpush3.xpose.msk.msra.mxu1 %vm398_vm0, %v8024_v18  ;;  %v2329_v55 = vmul.f32 %v6504_v10, %v7576_v33  ;;  %v8040_v13 = vadd.f32 %v6962_v35, %v2345_v5  ;;  %v6965_v5 = vld [vmem:[%s7164_s29 + $0x120] sm:$0xff] }
 0x459   : > { %5743 = vmatprep.subr.msk.mxu1 %vm398_vm0, %v8028_v56  ;;  %v6508_v16 = vpop.eup %6507  ;;  %v2344_v43 = vmul.f32 %v6506_v23, %v7576_v33  ;;  %6523 = vrcp.f32 %v2132_v42 }
 0x45a   : > { %8899 = vst [vmem:[#allocation26_spill] sm:$0xff] %v8040_v13  ;;  %v6510_v41 = vpop.eup %6509  ;;  %v8048_v31 = vadd.f32 %v6963_v58, %v2329_v55  ;;  %v2328_v11 = vmul.f32 %v6508_v16, %v7576_v33  ;;  %v6966_v55 = vld [vmem:[%s7164_s29 + $0x198] sm:$0xff] }
 0x45b   : > { %v6512_v61 = vpop.eup %6511  ;;  %v8052_v10 = vadd.f32 %v6964_v24, %v2344_v43  ;;  %v2343_v49 = vmul.f32 %v6510_v41, %v7576_v33  ;;  %v6967_v41 = vld [vmem:[%s7164_s29 + $0x118] sm:$0xff]  ;;  %v6968_v24 = vld [vmem:[%s7164_s29 + $0x190] sm:$0xff] }
 0x45c   : > { %5744 = vmatpush3.xpose.msk.msra.mxu1 %vm398_vm0, %v8036_v4  ;;  %v6514_v47 = vpop.eup %6513  ;;  %v8060_v23 = vadd.f32 %v6965_v5, %v2328_v11  ;;  %v2327_v42 = vmul.f32 %v6512_v61, %v7576_v33 }
 0x45d   : > { %5745 = vmatprep.subr.msk.mxu1 %vm398_vm0, %v8040_v13  ;;  %8900 = vst [vmem:[#allocation27_spill] sm:$0xff] %v8052_v10  ;;  %v8064_v16 = vadd.f32 %v6966_v55, %v2343_v49  ;;  %v2342_v35 = vmul.f32 %v6514_v47, %v7576_v33  ;;  %v6969_v55 = vld [vmem:[%s7164_s29 + $0x110] sm:$0xff] }
 0x45e   : > { %v6516_v15 = vpop.eup %6515  ;;  %v8072_v58 = vadd.f32 %v6967_v41, %v2327_v42 }
 0x45f   : > { %8901 = vst [vmem:[#allocation28_spill] sm:$0xff] %v8064_v16  ;;  %v2326_v11 = vmul.f32 %v6516_v15, %v7576_v33  ;;  %v8076_v49 = vadd.f32 %v6968_v24, %v2342_v35  ;;  %v6971_v24 = vld [vmem:[%s7164_s29 + $0x108] sm:$0xff] }
 0x460   : > { %5746 = vmatpush3.xpose.msk.msra.mxu1 %vm398_vm0, %v8048_v31  ;;  %v6518_v43 = vpop.eup %6517 }
 0x461   : > { %5747 = vmatprep.subr.msk.mxu1 %vm398_vm0, %v8052_v10  ;;  %8902 = vst [vmem:[#allocation29_spill] sm:$0xff] %v8076_v49  ;;  %v2341_v47 = vmul.f32 %v6518_v43, %v7576_v33  ;;  %v8084_v42 = vadd.f32 %v6969_v55, %v2326_v11  ;;  %v6972_v55 = vld [vmem:[%s7164_s29 + $0x180] sm:$0xff] }
 0x462   : > { %v6520_v61 = vpop.eup %6519 }
 0x463   : > { %v2325_v15 = vmul.f32 %v6520_v61, %v7576_v33  ;;  %v8088_v35 = vadd.f32 %v6970_v52, %v2341_v47  ;;  %v6973_v52 = vld [vmem:[%s7164_s29 + $0x100] sm:$0xff] }
 0x464   : > { %5748 = vmatpush3.xpose.msk.msra.mxu1 %vm398_vm0, %v8060_v23  ;;  %v6522_v5 = vpop.eup %6521  ;;  %v6974_v47 = vld [vmem:[%s8837_s1 + $0x20] sm:$0xff] }
 0x465   : > { %5749 = vmatprep.subr.msk.mxu1 %vm398_vm0, %v8064_v16  ;;  %8903 = vst [vmem:[#allocation30_spill] sm:$0xff] %v8088_v35  ;;  %v2340_v43 = vmul.f32 %v6522_v5, %v7576_v33  ;;  %v8096_v22 = vadd.f32 %v6971_v24, %v2325_v15  ;;  %v8905_v5 = vmov 0.0   ;;  %v8128_v15 = vpop.permute.xlu0 %2447 }
 0x466   : > { %v6524_v41 = vpop.eup %6523 }
 0x467   : > { %v2324_v11 = vmul.f32 %v6524_v41, %v7576_v33  ;;  %v8100_v37 = vadd.f32 %v6972_v55, %v2340_v43 }
 0x468   : > { %5750 = vmatpush3.xpose.msk.msra.mxu1 %vm398_vm0, %v8072_v58 }
 0x469   : > { %5751 = vmatprep.subr.msk.mxu1 %vm398_vm0, %v8076_v49  ;;  %8904 = vst [vmem:[#allocation31_spill] sm:$0xff] %v8100_v37  ;;  %v8107_v61 = vadd.f32 %v6973_v52, %v2324_v11  ;;  %v8132_v11 = vpop.permute.xlu0 %2437 }
 0x46c   : > { %5752 = vmatpush3.xpose.msk.msra.mxu1 %vm398_vm0, %v8084_v42 }
 0x46d   : > { %5753 = vmatprep.subr.msk.mxu1 %vm398_vm0, %v8088_v35 }
 0x470   : > { %5754 = vmatpush3.xpose.msk.msra.mxu1 %vm398_vm0, %v8096_v22 }
 0x471   : > { %5755 = vmatprep.subr.msk.mxu1 %vm398_vm0, %v8100_v37 }
 0x474   : > { %5756 = vmatpush3.xpose.msk.msra.mxu1 %vm398_vm0, %v8107_v61 }
 0x477   : > { %5758 = vmatmul.mubr.msk.f32.vlgmr.msra.gmra.mxu1 %vm398_vm0, %v6974_v47 }
 0x478   : > { %5759 = vmatprep.mubr.msk.f32.mxu1 %vm398_vm0, %v7852_v44 }
 0x47b   : > { %5760 = vmatmul.mubr.msk.f32.gmra.mxu1 %vm398_vm0, %v7852_v44  ;;  %v8130_v44 = vpop.permute.xlu1 %2442 }
 0x47c   : > { %5761 = vmatprep.mubr.msk.f32.mxu1 %vm398_vm0, %v7864_v48 }
 0x47f   : > { %5762 = vmatmul.mubr.msk.f32.gmra.mxu1 %vm398_vm0, %v7864_v48  ;;  %v8137_v60 = vpop.permute.xlu1 %2432 }
 0x480   : > { %5763 = vmatprep.mubr.msk.f32.mxu1 %vm398_vm0, %v7877_v12 }
 0x483   : > { %5764 = vmatmul.mubr.msk.f32.gmra.mxu1 %vm398_vm0, %v7877_v12 }
 0x484   : > { %3123 = vmatprep.mubr.f32.mxu1 %v8905_v5 }
 0x4d8   : > { %v2720_v41 = vpop.f32.mrf.mxu1 }
 0x4d9   : > { %v2721_v13 = vadd.f32 %v2720_v41, %v8137_v60 }
 0x4da   : > { %v2722_v43 = vpop.f32.mrf.mxu1 }
 0x4db   : > { %v2723_v56 = vadd.f32 %v2722_v43, %v8137_v60 }
 0x4dc   : > { %v2726_v24 = vpop.f32.mrf.mxu1 }
 0x4dd   : > { %v2727_v19 = vadd.f32 %v2726_v24, %v8132_v11  ;;  %v5335_v24 = vmul.f32 -1.442695, %v2721_v13 }
 0x4de   : > { %v2728_v55 = vpop.f32.mrf.mxu1 }
 0x4df   : > { %v2729_v48 = vadd.f32 %v2728_v55, %v8132_v11  ;;  %v5339_v16 = vmul.f32 -1.442695, %v2727_v19 }
 0x4e0   : > { %v2732_v52 = vpop.f32.mrf.mxu1 }
 0x4e1   : > { %v2733_v47 = vadd.f32 %v2732_v52, %v8130_v44  ;;  %v5340_v8 = vmul.f32 -1.442695, %v2729_v48 }
 0x4e2   : > { %v2734_v2 = vpop.f32.mrf.mxu1 }
 0x4e3   : > { %v2735_v12 = vadd.f32 %v2734_v2, %v8130_v44  ;;  %v5343_v55 = vmul.f32 -1.442695, %v2733_v47  ;;  %6525 = vpow2.f32 %v5340_v8  ;;  %v5336_v2 = vmul.f32 -1.442695, %v2723_v56 }
 0x4e4   : > { %v2738_v45 = vpop.f32.mrf.mxu1 }
 0x4e5   : > { %v5344_v38 = vmul.f32 -1.442695, %v2735_v12  ;;  %v2739_v10 = vadd.f32 %v2738_v45, %v8128_v15 }
 0x4e6   : > { %v2740_v49 = vpop.f32.mrf.mxu1 }
 0x4e7   : > { %v5347_v52 = vmul.f32 -1.442695, %v2739_v10  ;;  %v2741_v48 = vadd.f32 %v2740_v49, %v8128_v15  ;;  %6527 = vpow2.f32 %v5344_v38 }
 0x4e9   : > { %6529 = vpow2.f32 %v5347_v52  ;;  %v5348_v37 = vmul.f32 -1.442695, %v2741_v48 }
 0x4ea   : > { %6531 = vpow2.f32 %v5343_v55 }
 0x4eb   : > { %6533 = vpow2.f32 %v5348_v37 }
 0x4ec   : > { %6535 = vpow2.f32 %v5339_v16 }
 0x4ed   : > { %6537 = vpow2.f32 %v5336_v2 }
 0x4ee   : > { %6539 = vpow2.f32 %v5335_v24 }
 0x4f0   : > { %v6526_v45 = vpop.eup %6525 }
 0x4f1   : > { %v2885_v52 = vadd.f32 1.0, %v6526_v45 }
 0x4f4   : > { %v6528_v43 = vpop.eup %6527 }
 0x4f5   : > { %v2889_v35 = vadd.f32 1.0, %v6528_v43 }
 0x4f6   : > { %v6530_v41 = vpop.eup %6529 }
 0x4f7   : > { %v6532_v47 = vpop.eup %6531  ;;  %v2892_v8 = vadd.f32 1.0, %v6530_v41 }
 0x4f8   : > { %v6534_v12 = vpop.eup %6533  ;;  %v2888_v38 = vadd.f32 1.0, %v6532_v47 }
 0x4f9   : > { %v6536_v10 = vpop.eup %6535  ;;  %v2893_v49 = vadd.f32 1.0, %v6534_v12  ;;  %v8155_v12 = vld [vmem:[%s8839_s3 + $0x28] sm:$0xff] }
 0x4fa   : > { %v6538_v19 = vpop.eup %6537  ;;  %v2884_v13 = vadd.f32 1.0, %v6536_v10  ;;  %v8171_v10 = vld [vmem:[%s8839_s3 + $0x38] sm:$0xff] }
 0x4fb   : > { %v6540_v56 = vpop.eup %6539  ;;  %6541 = vrcp.f32 %v2893_v49  ;;  %v2881_v37 = vadd.f32 1.0, %v6538_v19 }
 0x4fc   : > { %6543 = vrcp.f32 %v2892_v8  ;;  %v2880_v16 = vadd.f32 1.0, %v6540_v56  ;;  %v8163_v8 = vld [vmem:[%s8839_s3 + $0x30] sm:$0xff] }
 0x4fd   : > { %6545 = vrcp.f32 %v2889_v35  ;;  %v8147_v35 = vld [vmem:[%s8839_s3 + $0x20] sm:$0xff] }
 0x4fe   : > { %6547 = vrcp.f32 %v2888_v38 }
 0x4ff   : > { %6549 = vrcp.f32 %v2885_v52 }
 0x500   : > { %6551 = vrcp.f32 %v2884_v13 }
 0x501   : > { %6553 = vrcp.f32 %v2881_v37 }
 0x502   : > { %6555 = vrcp.f32 %v2880_v16 }
 0x508   : > { %v6542_v55 = vpop.eup %6541 }
 0x509   : > { %v6544_v48 = vpop.eup %6543  ;;  %2994 = vmatprep.subr.mxu0 %v6542_v55 }
 0x50a   : > { %v6546_v2 = vpop.eup %6545  ;;  %2995 = vmatpush1.msra.mxu0 %v6544_v48 }
 0x50b   : > { %v6548_v24 = vpop.eup %6547  ;;  %2996 = vmatprep.subr.mxu0 %v6546_v2 }
 0x50c   : > { %v6550_v43 = vpop.eup %6549  ;;  %2997 = vmatpush1.msra.mxu0 %v6548_v24 }
 0x50d   : > { %v6552_v45 = vpop.eup %6551  ;;  %2998 = vmatprep.subr.mxu0 %v6550_v43 }
 0x50e   : > { %v6554_v41 = vpop.eup %6553  ;;  %2999 = vmatpush1.msra.mxu0 %v6552_v45 }
 0x50f   : > { %v6556_v47 = vpop.eup %6555  ;;  %3000 = vmatprep.subr.mxu0 %v6554_v41 }
 0x510   : > { %3001 = vmatpush1.msra.mxu0 %v6556_v47 }
 0x511   : > { %5359 = vmatmul.mubr.msk.f32.vlgmr.msra.gmra.mxu0 %vm905_vm1, %v8147_v35 }
 0x512   : > { %3040 = vmatprep.mubr.f32.mxu0 %v8905_v5 }
 0x515   : > { %5360 = vmatmul.mubr.msk.f32.gmra.mxu0 %vm905_vm1, %v8155_v12 }
 0x516   : > { %3046 = vmatprep.mubr.f32.mxu0 %v8905_v5 }
 0x519   : > { %5361 = vmatmul.mubr.msk.f32.gmra.mxu0 %vm905_vm1, %v8163_v8 }
 0x51a   : > { %3052 = vmatprep.mubr.f32.mxu0 %v8905_v5 }
 0x51d   : > { %5362 = vmatmul.mubr.msk.f32.gmra.mxu0 %vm905_vm1, %v8171_v10 }
 0x537   : > { %v2809_v49 = vpop.f32.mrf.mxu1 }
 0x538   : > { %v2810_v47 = vadd.f32 %v2809_v49, %v8137_v60 }
 0x539   : > { %v2811_v19 = vpop.f32.mrf.mxu1 }
 0x53a   : > { %v2812_v43 = vadd.f32 %v2811_v19, %v8137_v60 }
 0x53b   : > { %v2815_v38 = vpop.f32.mrf.mxu1 }
 0x53c   : > { %v2816_v2 = vadd.f32 %v2815_v38, %v8132_v11 }
 0x53d   : > { %v2817_v56 = vpop.f32.mrf.mxu1 }
 0x53e   : > { %v2818_v52 = vadd.f32 %v2817_v56, %v8132_v11  ;;  %v5341_v14 = vmul.f32 -1.442695, %v2816_v2  ;;  %v5337_v11 = vmul.f32 -1.442695, %v2810_v47 }
 0x53f   : > { %v2821_v13 = vpop.f32.mrf.mxu1 }
 0x540   : > { %v2822_v37 = vadd.f32 %v2821_v13, %v8130_v44  ;;  %v5342_v55 = vmul.f32 -1.442695, %v2818_v52  ;;  %v5338_v52 = vmul.f32 -1.442695, %v2812_v43 }
 0x541   : > { %v2823_v16 = vpop.f32.mrf.mxu1 }
 0x542   : > { %v2824_v48 = vadd.f32 %v2823_v16, %v8130_v44  ;;  %v5345_v40 = vmul.f32 -1.442695, %v2822_v37  ;;  %6557 = vpow2.f32 %v5342_v55 }
 0x543   : > { %v2827_v24 = vpop.f32.mrf.mxu1 }
 0x544   : > { %v5346_v45 = vmul.f32 -1.442695, %v2824_v48  ;;  %v2828_v41 = vadd.f32 %v2827_v24, %v8128_v15 }
 0x545   : > { %v2829_v30 = vpop.f32.mrf.mxu1 }
 0x546   : > { %v5349_v56 = vmul.f32 -1.442695, %v2828_v41  ;;  %v2830_v13 = vadd.f32 %v2829_v30, %v8128_v15  ;;  %6559 = vpow2.f32 %v5346_v45 }
 0x548   : > { %6561 = vpow2.f32 %v5349_v56  ;;  %v5350_v44 = vmul.f32 -1.442695, %v2830_v13 }
 0x549   : > { %6563 = vpow2.f32 %v5345_v40 }
 0x54a   : > { %6565 = vpow2.f32 %v5350_v44 }
 0x54b   : > { %6567 = vpow2.f32 %v5341_v14 }
 0x54c   : > { %6569 = vpow2.f32 %v5338_v52 }
 0x54d   : > { %6571 = vpow2.f32 %v5337_v11 }
 0x54f   : > { %v6558_v19 = vpop.eup %6557 }
 0x550   : > { %v2887_v43 = vadd.f32 1.0, %v6558_v19 }
 0x553   : > { %v6560_v38 = vpop.eup %6559 }
 0x554   : > { %v2891_v48 = vadd.f32 1.0, %v6560_v38  ;;  %v8194_v38 = vpop.permute.xlu0 %2940 }
 0x555   : > { %v6562_v60 = vpop.eup %6561 }
 0x556   : > { %v6564_v49 = vpop.eup %6563  ;;  %v2894_v16 = vadd.f32 1.0, %v6562_v60 }
 0x557   : > { %v6566_v37 = vpop.eup %6565  ;;  %v2890_v2 = vadd.f32 1.0, %v6564_v49 }
 0x558   : > { %v6568_v55 = vpop.eup %6567  ;;  %v2895_v30 = vadd.f32 1.0, %v6566_v37 }
 0x559   : > { %v6570_v15 = vpop.eup %6569  ;;  %v2886_v45 = vadd.f32 1.0, %v6568_v55 }
 0x55a   : > { %v6572_v24 = vpop.eup %6571  ;;  %6573 = vrcp.f32 %v2895_v30  ;;  %v2883_v40 = vadd.f32 1.0, %v6570_v15  ;;  %v8202_v15 = vpop.permute.xlu0 %2950 }
 0x55b   : > { %6575 = vrcp.f32 %v2894_v16  ;;  %v2882_v14 = vadd.f32 1.0, %v6572_v24 }
 0x55c   : > { %6577 = vrcp.f32 %v2891_v48 }
 0x55d   : > { %6579 = vrcp.f32 %v2890_v2 }
 0x55e   : > { %6581 = vrcp.f32 %v2887_v43 }
 0x55f   : > { %6583 = vrcp.f32 %v2886_v45 }
 0x560   : > { %6585 = vrcp.f32 %v2883_v40 }
 0x561   : > { %6587 = vrcp.f32 %v2882_v14 }
 0x567   : > { %v6574_v41 = vpop.eup %6573 }
 0x568   : > { %v6576_v47 = vpop.eup %6575  ;;  %3083 = vmatprep.subr.mxu1 %v6574_v41 }
 0x569   : > { %v6578_v56 = vpop.eup %6577  ;;  %3084 = vmatpush1.msra.mxu1 %v6576_v47 }
 0x56a   : > { %v6580_v13 = vpop.eup %6579  ;;  %3085 = vmatprep.subr.mxu1 %v6578_v56 }
 0x56b   : > { %v6582_v52 = vpop.eup %6581  ;;  %3086 = vmatpush1.msra.mxu1 %v6580_v13 }
 0x56c   : > { %v6584_v44 = vpop.eup %6583  ;;  %3087 = vmatprep.subr.mxu1 %v6582_v52 }
 0x56d   : > { %v6586_v11 = vpop.eup %6585  ;;  %3088 = vmatpush1.msra.mxu1 %v6584_v44 }
 0x56e   : > { %v6588_v19 = vpop.eup %6587  ;;  %3089 = vmatprep.subr.mxu1 %v6586_v11 }
 0x56f   : > { %3090 = vmatpush1.msra.mxu1 %v6588_v19  ;;  %v5386_v19 = vld [vmem:[%s8841_s5 + $0x38] sm:$0xff] }
 0x570   : > { %5363 = vmatmul.mubr.msk.f32.vlgmr.msra.gmra.mxu1 %vm905_vm1, %v8147_v35  ;;  %5937 = vmatprep.subr.mxu0 %v5386_v19 }
 0x571   : > { %3129 = vmatprep.mubr.f32.mxu1 %v8905_v5  ;;  %5938 = vmatpush3.msra.mxu0 %v5386_v19 }
 0x574   : > { %5364 = vmatmul.mubr.msk.f32.gmra.mxu1 %vm905_vm1, %v8155_v12  ;;  %v8198_v12 = vpop.permute.xlu1 %2945 }
 0x575   : > { %3135 = vmatprep.mubr.f32.mxu1 %v8905_v5 }
 0x578   : > { %5365 = vmatmul.mubr.msk.f32.gmra.mxu1 %vm905_vm1, %v8163_v8  ;;  %v8206_v41 = vpop.permute.xlu1 %2955 }
 0x579   : > { %3141 = vmatprep.mubr.f32.mxu1 %v8905_v5 }
 0x57c   : > { %5366 = vmatmul.mubr.msk.f32.gmra.mxu1 %vm905_vm1, %v8171_v10 }
 0x5d1   : > { %v3036_v60 = vpop.f32.mrf.mxu0 }
 0x5d2   : > { %v3037_v35 = vadd.f32 %v3036_v60, %v8194_v38  ;;  %v5385_v60 = vld [vmem:[%s8841_s5 + $0x30] sm:$0xff] }
 0x5d3   : > { %v3038_v49 = vpop.f32.mrf.mxu0  ;;  %5939 = vmatprep.subr.mxu0 %v5385_v60 }
 0x5d4   : > { %v5367_v37 = vmul.f32 -1.442695, %v3037_v35  ;;  %v3039_v16 = vadd.f32 %v3038_v49, %v8194_v38  ;;  %5940 = vmatpush3.msra.mxu0 %v5385_v60 }
 0x5d5   : > { %v3042_v55 = vpop.f32.mrf.mxu0 }
 0x5d6   : > { %6589 = vpow2.f32 %v5367_v37  ;;  %v5368_v48 = vmul.f32 -1.442695, %v3039_v16  ;;  %v3043_v8 = vadd.f32 %v3042_v55, %v8198_v12 }
 0x5d7   : > { %v3044_v5 = vpop.f32.mrf.mxu0 }
 0x5d8   : > { %6591 = vpow2.f32 %v5368_v48  ;;  %v5371_v30 = vmul.f32 -1.442695, %v3043_v8  ;;  %v3045_v10 = vadd.f32 %v3044_v5, %v8198_v12 }
 0x5d9   : > { %v3048_v2 = vpop.f32.mrf.mxu0 }
 0x5da   : > { %6593 = vpow2.f32 %v5371_v30  ;;  %v5372_v24 = vmul.f32 -1.442695, %v3045_v10  ;;  %v3049_v43 = vadd.f32 %v3048_v2, %v8202_v15 }
 0x5db   : > { %v3050_v45 = vpop.f32.mrf.mxu0 }
 0x5dc   : > { %6595 = vpow2.f32 %v5372_v24  ;;  %v5375_v40 = vmul.f32 -1.442695, %v3049_v43  ;;  %v3051_v14 = vadd.f32 %v3050_v45, %v8202_v15 }
 0x5dd   : > { %v3054_v47 = vpop.f32.mrf.mxu0 }
 0x5de   : > { %6597 = vpow2.f32 %v5375_v40  ;;  %v5376_v56 = vmul.f32 -1.442695, %v3051_v14  ;;  %v3055_v13 = vadd.f32 %v3054_v47, %v8206_v41  ;;  %v5384_v14 = vld [vmem:[%s8841_s5 + $0x28] sm:$0xff]  ;;  %v5383_v47 = vld [vmem:[%s8841_s5 + $0x20] sm:$0xff] }
 0x5df   : > { %v3056_v52 = vpop.f32.mrf.mxu0  ;;  %5941 = vmatprep.subr.mxu0 %v5384_v14 }
 0x5e0   : > { %6599 = vpow2.f32 %v5376_v56  ;;  %v5379_v44 = vmul.f32 -1.442695, %v3055_v13  ;;  %v3057_v11 = vadd.f32 %v3056_v52, %v8206_v41  ;;  %5942 = vmatpush3.msra.mxu0 %v5384_v14 }
 0x5e1   : > { %5943 = vmatprep.subr.mxu0 %v5383_v47 }
 0x5e2   : > { %6601 = vpow2.f32 %v5379_v44  ;;  %v5380_v35 = vmul.f32 -1.442695, %v3057_v11  ;;  %5944 = vmatpush3.msra.mxu0 %v5383_v47 }
 0x5e3   : > { %v6590_v49 = vpop.eup %6589 }
 0x5e4   : > { %v3196_v37 = vadd.f32 1.0, %v6590_v49  ;;  %6603 = vpow2.f32 %v5380_v35 }
 0x5e5   : > { %v6592_v16 = vpop.eup %6591 }
 0x5e6   : > { %6605 = vrcp.f32 %v3196_v37  ;;  %v3197_v55 = vadd.f32 1.0, %v6592_v16 }
 0x5e7   : > { %v6594_v48 = vpop.eup %6593 }
 0x5e8   : > { %6607 = vrcp.f32 %v3197_v55  ;;  %v3200_v8 = vadd.f32 1.0, %v6594_v48 }
 0x5e9   : > { %v6596_v5 = vpop.eup %6595 }
 0x5ea   : > { %6609 = vrcp.f32 %v3200_v8  ;;  %v3201_v30 = vadd.f32 1.0, %v6596_v5 }
 0x5eb   : > { %v6598_v10 = vpop.eup %6597 }
 0x5ec   : > { %6611 = vrcp.f32 %v3201_v30  ;;  %v3204_v2 = vadd.f32 1.0, %v6598_v10 }
 0x5ed   : > { %v6600_v24 = vpop.eup %6599 }
 0x5ee   : > { %6613 = vrcp.f32 %v3204_v2  ;;  %v3205_v43 = vadd.f32 1.0, %v6600_v24 }
 0x5ef   : > { %v6602_v45 = vpop.eup %6601 }
 0x5f0   : > { %6615 = vrcp.f32 %v3205_v43  ;;  %v3208_v40 = vadd.f32 1.0, %v6602_v45 }
 0x5f1   : > { %v6604_v56 = vpop.eup %6603 }
 0x5f2   : > { %6617 = vrcp.f32 %v3208_v40  ;;  %v3209_v13 = vadd.f32 1.0, %v6604_v56 }
 0x5f3   : > { %v6606_v52 = vpop.eup %6605 }
 0x5f4   : > { %6619 = vrcp.f32 %v3209_v13  ;;  %3244 = vxpose.xlu0.b32.start [1/4] (short) %v6606_v52, 128 }
 0x5f5   : > { %v6608_v44 = vpop.eup %6607 }
 0x5f6   : > { %3276 = vxpose.xlu1.b32.start [1/4] (short) %v6608_v44, 128 }
 0x5f7   : > { %v6610_v11 = vpop.eup %6609 }
 0x5f8   : > { %3245 = vxpose.xlu0.b32.cont [2/4] (short) %v6610_v11, 128 }
 0x5f9   : > { %v6612_v19 = vpop.eup %6611 }
 0x5fa   : > { %3277 = vxpose.xlu1.b32.cont [2/4] (short) %v6612_v19, 128 }
 0x5fb   : > { %v6614_v60 = vpop.eup %6613 }
 0x5fc   : > { %3246 = vxpose.xlu0.b32.cont [3/4] (short) %v6614_v60, 128 }
 0x5fd   : > { %v6616_v35 = vpop.eup %6615 }
 0x5fe   : > { %3278 = vxpose.xlu1.b32.cont [3/4] (short) %v6616_v35, 128 }
 0x5ff   : > { %v6618_v49 = vpop.eup %6617 }
 0x600   : > { %3247 = vxpose.xlu0.b32.end [4/4] (short) %v6618_v49, 128 }
 0x601   : > { %v6620_v37 = vpop.eup %6619 }
 0x602   : > { %3279 = vxpose.xlu1.b32.end [4/4] (short) %v6620_v37, 128 }
 0x630   : > { %v3125_v16 = vpop.f32.mrf.mxu1 }
 0x631   : > { %v3126_v55 = vadd.f32 %v3125_v16, %v8194_v38 }
 0x632   : > { %v3127_v48 = vpop.f32.mrf.mxu1 }
 0x633   : > { %v5369_v8 = vmul.f32 -1.442695, %v3126_v55  ;;  %v3128_v5 = vadd.f32 %v3127_v48, %v8194_v38 }
 0x634   : > { %v3131_v30 = vpop.f32.mrf.mxu1 }
 0x635   : > { %6621 = vpow2.f32 %v5369_v8  ;;  %v5370_v10 = vmul.f32 -1.442695, %v3128_v5  ;;  %v3132_v2 = vadd.f32 %v3131_v30, %v8198_v12 }
 0x636   : > { %v3133_v24 = vpop.f32.mrf.mxu1 }
 0x637   : > { %6623 = vpow2.f32 %v5370_v10  ;;  %v5373_v43 = vmul.f32 -1.442695, %v3132_v2  ;;  %v3134_v45 = vadd.f32 %v3133_v24, %v8198_v12 }
 0x638   : > { %v3137_v40 = vpop.f32.mrf.mxu1 }
 0x639   : > { %6625 = vpow2.f32 %v5373_v43  ;;  %v5374_v14 = vmul.f32 -1.442695, %v3134_v45  ;;  %v3138_v47 = vadd.f32 %v3137_v40, %v8202_v15 }
 0x63a   : > { %v3139_v56 = vpop.f32.mrf.mxu1 }
 0x63b   : > { %6627 = vpow2.f32 %v5374_v14  ;;  %v5377_v13 = vmul.f32 -1.442695, %v3138_v47  ;;  %v3140_v38 = vadd.f32 %v3139_v56, %v8202_v15 }
 0x63c   : > { %v3143_v52 = vpop.f32.mrf.mxu1 }
 0x63d   : > { %6629 = vpow2.f32 %v5377_v13  ;;  %v5378_v44 = vmul.f32 -1.442695, %v3140_v38  ;;  %v3144_v11 = vadd.f32 %v3143_v52, %v8206_v41 }
 0x63e   : > { %v3145_v19 = vpop.f32.mrf.mxu1 }
 0x63f   : > { %6631 = vpow2.f32 %v5378_v44  ;;  %v5381_v60 = vmul.f32 -1.442695, %v3144_v11  ;;  %v3146_v12 = vadd.f32 %v3145_v19, %v8206_v41 }
 0x641   : > { %6633 = vpow2.f32 %v5381_v60  ;;  %v5382_v35 = vmul.f32 -1.442695, %v3146_v12 }
 0x642   : > { %v6622_v49 = vpop.eup %6621 }
 0x643   : > { %v3198_v37 = vadd.f32 1.0, %v6622_v49  ;;  %6635 = vpow2.f32 %v5382_v35 }
 0x644   : > { %v6624_v16 = vpop.eup %6623 }
 0x645   : > { %6637 = vrcp.f32 %v3198_v37  ;;  %v3199_v55 = vadd.f32 1.0, %v6624_v16 }
 0x646   : > { %v6626_v48 = vpop.eup %6625 }
 0x647   : > { %6639 = vrcp.f32 %v3199_v55  ;;  %v3202_v15 = vadd.f32 1.0, %v6626_v48 }
 0x648   : > { %v6628_v8 = vpop.eup %6627 }
 0x649   : > { %6641 = vrcp.f32 %v3202_v15  ;;  %v3203_v5 = vadd.f32 1.0, %v6628_v8 }
 0x64a   : > { %v6630_v30 = vpop.eup %6629 }
 0x64b   : > { %6643 = vrcp.f32 %v3203_v5  ;;  %v3206_v10 = vadd.f32 1.0, %v6630_v30 }
 0x64c   : > { %v6632_v2 = vpop.eup %6631 }
 0x64d   : > { %6645 = vrcp.f32 %v3206_v10  ;;  %v3207_v41 = vadd.f32 1.0, %v6632_v2 }
 0x64e   : > { %v6634_v24 = vpop.eup %6633 }
 0x64f   : > { %6647 = vrcp.f32 %v3207_v41  ;;  %v3210_v43 = vadd.f32 1.0, %v6634_v24 }
 0x650   : > { %v6636_v45 = vpop.eup %6635 }
 0x651   : > { %6649 = vrcp.f32 %v3210_v43  ;;  %v3211_v40 = vadd.f32 1.0, %v6636_v45 }
 0x652   : > { %v6638_v14 = vpop.eup %6637 }
 0x653   : > { %6651 = vrcp.f32 %v3211_v40  ;;  %3308 = vxpose.xlu0.b32.start [1/4] (short) %v6638_v14, 128 }
 0x654   : > { %v6640_v47 = vpop.eup %6639 }
 0x655   : > { %3340 = vxpose.xlu1.b32.start [1/4] (short) %v6640_v47, 128 }
 0x656   : > { %v6642_v56 = vpop.eup %6641 }
 0x657   : > { %3309 = vxpose.xlu0.b32.cont [2/4] (short) %v6642_v56, 128 }
 0x658   : > { %v6644_v13 = vpop.eup %6643 }
 0x659   : > { %3341 = vxpose.xlu1.b32.cont [2/4] (short) %v6644_v13, 128 }
 0x65a   : > { %v6646_v38 = vpop.eup %6645 }
 0x65b   : > { %3310 = vxpose.xlu0.b32.cont [3/4] (short) %v6646_v38, 128 }
 0x65c   : > { %v6648_v52 = vpop.eup %6647 }
 0x65d   : > { %3342 = vxpose.xlu1.b32.cont [3/4] (short) %v6648_v52, 128 }
 0x65e   : > { %v6650_v44 = vpop.eup %6649 }
 0x65f   : > { %3311 = vxpose.xlu0.b32.end [4/4] (short) %v6650_v44, 128 }
 0x660   : > { %v6652_v11 = vpop.eup %6651 }
 0x661   : > { %3343 = vxpose.xlu1.b32.end [4/4] (short) %v6652_v11, 128 }
 0x670   : > { %v3260_v19 = vpop.trf.xlu0 }
 0x671   : > { %5945 = vmatprep.mubr.msk.f32.mxu0 %vm905_vm1, %v3260_v19 }
 0x672   : > { %v3292_v60 = vpop.trf.xlu1 }
 0x674   : > { %v3261_v12 = vpop.trf.xlu0 }
 0x675   : > { %5946 = vmatmul.mubr.msk.f32.vlgmr.msra.gmra.mxu0 %vm905_vm1, %v3261_v12 }
 0x676   : > { %v3293_v35 = vpop.trf.xlu1 }
 0x678   : > { %v3262_v49 = vpop.trf.xlu0 }
 0x679   : > { %5948 = vmatprep.mubr.msk.f32.mxu0 %vm905_vm1, %v3262_v49 }
 0x67a   : > { %v3294_v16 = vpop.trf.xlu1 }
 0x67c   : > { %v3263_v37 = vpop.trf.xlu0 }
 0x67d   : > { %5949 = vmatmul.mubr.msk.f32.gmra.mxu0 %vm905_vm1, %v3263_v37 }
 0x67e   : > { %v3295_v48 = vpop.trf.xlu1 }
 0x680   : > { %v3264_v55 = vpop.trf.xlu0 }
 0x681   : > { %5951 = vmatprep.mubr.msk.f32.mxu0 %vm905_vm1, %v3264_v55 }
 0x682   : > { %v3296_v5 = vpop.trf.xlu1 }
 0x684   : > { %v3265_v15 = vpop.trf.xlu0 }
 0x685   : > { %5952 = vmatmul.mubr.msk.f32.gmra.mxu0 %vm905_vm1, %v3265_v15 }
 0x686   : > { %v3297_v10 = vpop.trf.xlu1 }
 0x688   : > { %v3266_v8 = vpop.trf.xlu0 }
 0x689   : > { %5954 = vmatprep.mubr.msk.f32.mxu0 %vm905_vm1, %v3266_v8 }
 0x68a   : > { %v3298_v24 = vpop.trf.xlu1 }
 0x68c   : > { %v3267_v30 = vpop.trf.xlu0 }
 0x68d   : > { %5955 = vmatmul.mubr.msk.f32.gmra.mxu0 %vm905_vm1, %v3267_v30 }
 0x68e   : > { %v3299_v45 = vpop.trf.xlu1 }
 0x690   : > { %v3268_v2 = vpop.trf.xlu0 }
 0x691   : > { %5957 = vmatprep.mubr.msk.f32.mxu0 %vm905_vm1, %v3268_v2 }
 0x692   : > { %v3300_v47 = vpop.trf.xlu1 }
 0x694   : > { %v3269_v41 = vpop.trf.xlu0 }
 0x695   : > { %5958 = vmatmul.mubr.msk.f32.gmra.mxu0 %vm905_vm1, %v3269_v41 }
 0x696   : > { %v3301_v13 = vpop.trf.xlu1 }
 0x698   : > { %v3270_v43 = vpop.trf.xlu0 }
 0x699   : > { %5960 = vmatprep.mubr.msk.f32.mxu0 %vm905_vm1, %v3270_v43 }
 0x69a   : > { %v3302_v44 = vpop.trf.xlu1 }
 0x69c   : > { %v3271_v40 = vpop.trf.xlu0 }
 0x69d   : > { %5961 = vmatmul.mubr.msk.f32.gmra.mxu0 %vm905_vm1, %v3271_v40 }
 0x69e   : > { %v3303_v11 = vpop.trf.xlu1 }
 0x6a0   : > { %v3272_v14 = vpop.trf.xlu0 }
 0x6a1   : > { %5963 = vmatprep.mubr.msk.f32.mxu0 %vm905_vm1, %v3272_v14 }
 0x6a2   : > { %v3304_v19 = vpop.trf.xlu1 }
 0x6a4   : > { %v3273_v56 = vpop.trf.xlu0 }
 0x6a5   : > { %5964 = vmatmul.mubr.msk.f32.gmra.mxu0 %vm905_vm1, %v3273_v56 }
 0x6a6   : > { %v3305_v12 = vpop.trf.xlu1 }
 0x6a8   : > { %v3274_v38 = vpop.trf.xlu0 }
 0x6a9   : > { %5966 = vmatprep.mubr.msk.f32.mxu0 %vm905_vm1, %v3274_v38 }
 0x6ac   : > { %v3275_v52 = vpop.trf.xlu0 }
 0x6ad   : > { %5967 = vmatmul.mubr.msk.f32.gmra.mxu0 %vm905_vm1, %v3275_v52 }
 0x6ae   : > { %5969 = vmatprep.mubr.msk.f32.mxu0 %vm905_vm1, %v3292_v60  ;;  %v3306_v60 = vpop.trf.xlu1 }
 0x6b1   : > { %5970 = vmatmul.mubr.msk.f32.gmra.mxu0 %vm905_vm1, %v3293_v35 }
 0x6b2   : > { %5972 = vmatprep.mubr.msk.f32.mxu0 %vm905_vm1, %v3294_v16  ;;  %v3307_v35 = vpop.trf.xlu1 }
 0x6b5   : > { %5973 = vmatmul.mubr.msk.f32.gmra.mxu0 %vm905_vm1, %v3295_v48 }
 0x6b6   : > { %5975 = vmatprep.mubr.msk.f32.mxu0 %vm905_vm1, %v3296_v5 }
 0x6b9   : > { %5976 = vmatmul.mubr.msk.f32.gmra.mxu0 %vm905_vm1, %v3297_v10 }
 0x6ba   : > { %5978 = vmatprep.mubr.msk.f32.mxu0 %vm905_vm1, %v3298_v24 }
 0x6bd   : > { %5979 = vmatmul.mubr.msk.f32.gmra.mxu0 %vm905_vm1, %v3299_v45 }
 0x6be   : > { %5981 = vmatprep.mubr.msk.f32.mxu0 %vm905_vm1, %v3300_v47 }
 0x6c1   : > { %5982 = vmatmul.mubr.msk.f32.gmra.mxu0 %vm905_vm1, %v3301_v13 }
 0x6c2   : > { %5984 = vmatprep.mubr.msk.f32.mxu0 %vm905_vm1, %v3302_v44 }
 0x6c5   : > { %5985 = vmatmul.mubr.msk.f32.gmra.mxu0 %vm905_vm1, %v3303_v11 }
 0x6c6   : > { %5987 = vmatprep.mubr.msk.f32.mxu0 %vm905_vm1, %v3304_v19 }
 0x6c9   : > { %5988 = vmatmul.mubr.msk.f32.gmra.mxu0 %vm905_vm1, %v3305_v12 }
 0x6ca   : > { %5990 = vmatprep.mubr.msk.f32.mxu0 %vm905_vm1, %v3306_v60 }
 0x6cd   : > { %5991 = vmatmul.mubr.msk.f32.gmra.mxu0 %vm905_vm1, %v3307_v35 }
 0x6cf   : > { %v3324_v49 = vpop.trf.xlu0 }
 0x6d0   : > { %5993 = vmatprep.mubr.msk.f32.mxu0 %vm905_vm1, %v3324_v49 }
 0x6d1   : > { %v3356_v37 = vpop.trf.xlu1 }
 0x6d3   : > { %v3325_v16 = vpop.trf.xlu0 }
 0x6d4   : > { %5994 = vmatmul.mubr.msk.f32.gmra.mxu0 %vm905_vm1, %v3325_v16 }
 0x6d5   : > { %v3357_v55 = vpop.trf.xlu1 }
 0x6d7   : > { %v3326_v48 = vpop.trf.xlu0 }
 0x6d8   : > { %5996 = vmatprep.mubr.msk.f32.mxu0 %vm905_vm1, %v3326_v48  ;;  %v8297_v48 = vld [vmem:[%s8842_s6 + $0x1] ss:$0 sm:$0xff] }
 0x6d9   : > { %v3358_v8 = vpop.trf.xlu1 }
 0x6db   : > { %v3327_v15 = vpop.trf.xlu0 }
 0x6dc   : > { %5997 = vmatmul.mubr.msk.f32.gmra.mxu0 %vm905_vm1, %v3327_v15 }
 0x6dd   : > { %v3359_v30 = vpop.trf.xlu1 }
 0x6df   : > { %v3328_v5 = vpop.trf.xlu0 }
 0x6e0   : > { %5999 = vmatprep.mubr.msk.f32.mxu0 %vm905_vm1, %v3328_v5 }
 0x6e1   : > { %v3360_v41 = vpop.trf.xlu1 }
 0x6e3   : > { %v3329_v10 = vpop.trf.xlu0 }
 0x6e4   : > { %6000 = vmatmul.mubr.msk.f32.gmra.mxu0 %vm905_vm1, %v3329_v10 }
 0x6e5   : > { %v3361_v43 = vpop.trf.xlu1 }
 0x6e7   : > { %v3330_v2 = vpop.trf.xlu0 }
 0x6e8   : > { %6002 = vmatprep.mubr.msk.f32.mxu0 %vm905_vm1, %v3330_v2 }
 0x6e9   : > { %v3362_v14 = vpop.trf.xlu1 }
 0x6eb   : > { %v3331_v24 = vpop.trf.xlu0 }
 0x6ec   : > { %6003 = vmatmul.mubr.msk.f32.gmra.mxu0 %vm905_vm1, %v3331_v24 }
 0x6ed   : > { %v3363_v56 = vpop.trf.xlu1 }
 0x6ef   : > { %v3332_v45 = vpop.trf.xlu0 }
 0x6f0   : > { %6005 = vmatprep.mubr.msk.f32.mxu0 %vm905_vm1, %v3332_v45 }
 0x6f1   : > { %v3364_v52 = vpop.trf.xlu1 }
 0x6f3   : > { %v3333_v40 = vpop.trf.xlu0 }
 0x6f4   : > { %6006 = vmatmul.mubr.msk.f32.gmra.mxu0 %vm905_vm1, %v3333_v40 }
 0x6f5   : > { %v3365_v11 = vpop.trf.xlu1 }
 0x6f7   : > { %v3334_v47 = vpop.trf.xlu0 }
 0x6f8   : > { %6008 = vmatprep.mubr.msk.f32.mxu0 %vm905_vm1, %v3334_v47 }
 0x6f9   : > { %v3366_v60 = vpop.trf.xlu1 }
 0x6fb   : > { %v3335_v13 = vpop.trf.xlu0 }
 0x6fc   : > { %6009 = vmatmul.mubr.msk.f32.gmra.mxu0 %vm905_vm1, %v3335_v13 }
 0x6fd   : > { %v3367_v35 = vpop.trf.xlu1 }
 0x6ff   : > { %v3336_v38 = vpop.trf.xlu0 }
 0x700   : > { %6011 = vmatprep.mubr.msk.f32.mxu0 %vm905_vm1, %v3336_v38 }
 0x701   : > { %v3368_v49 = vpop.trf.xlu1 }
 0x703   : > { %v3337_v44 = vpop.trf.xlu0 }
 0x704   : > { %6012 = vmatmul.mubr.msk.f32.gmra.mxu0 %vm905_vm1, %v3337_v44 }
 0x705   : > { %v3369_v16 = vpop.trf.xlu1 }
 0x707   : > { %v3338_v19 = vpop.trf.xlu0 }
 0x708   : > { %6014 = vmatprep.mubr.msk.f32.mxu0 %vm905_vm1, %v3338_v19 }
 0x70b   : > { %v3339_v12 = vpop.trf.xlu0 }
 0x70c   : > { %6015 = vmatmul.mubr.msk.f32.gmra.mxu0 %vm905_vm1, %v3339_v12 }
 0x70d   : > { %6017 = vmatprep.mubr.msk.f32.mxu0 %vm905_vm1, %v3356_v37  ;;  %v3370_v37 = vpop.trf.xlu1 }
 0x710   : > { %6018 = vmatmul.mubr.msk.f32.gmra.mxu0 %vm905_vm1, %v3357_v55 }
 0x711   : > { %6020 = vmatprep.mubr.msk.f32.mxu0 %vm905_vm1, %v3358_v8  ;;  %v3371_v55 = vpop.trf.xlu1 }
 0x714   : > { %6021 = vmatmul.mubr.msk.f32.gmra.mxu0 %vm905_vm1, %v3359_v30 }
 0x715   : > { %6023 = vmatprep.mubr.msk.f32.mxu0 %vm905_vm1, %v3360_v41 }
 0x718   : > { %6024 = vmatmul.mubr.msk.f32.gmra.mxu0 %vm905_vm1, %v3361_v43 }
 0x719   : > { %6026 = vmatprep.mubr.msk.f32.mxu0 %vm905_vm1, %v3362_v14 }
 0x71c   : > { %6027 = vmatmul.mubr.msk.f32.gmra.mxu0 %vm905_vm1, %v3363_v56 }
 0x71d   : > { %6029 = vmatprep.mubr.msk.f32.mxu0 %vm905_vm1, %v3364_v52 }
 0x720   : > { %6030 = vmatmul.mubr.msk.f32.gmra.mxu0 %vm905_vm1, %v3365_v11 }
 0x721   : > { %6032 = vmatprep.mubr.msk.f32.mxu0 %vm905_vm1, %v3366_v60 }
 0x724   : > { %6033 = vmatmul.mubr.msk.f32.gmra.mxu0 %vm905_vm1, %v3367_v35 }
 0x725   : > { %6035 = vmatprep.mubr.msk.f32.mxu0 %vm905_vm1, %v3368_v49 }
 0x728   : > { %6036 = vmatmul.mubr.msk.f32.gmra.mxu0 %vm905_vm1, %v3369_v16 }
 0x729   : > { %6038 = vmatprep.mubr.msk.f32.mxu0 %vm905_vm1, %v3370_v37 }
 0x72c   : > { %6039 = vmatmul.mubr.msk.f32.gmra.mxu0 %vm905_vm1, %v3371_v55 }
 0x735   : > { %v5947_v15 = vpop.f32.mrf.mxu0 }
 0x736   : > { %v3649_v8 = vadd.f32 %v5947_v15, %v8297_v48 }
 0x737   : > { %v3643_v5 = vpop.f32.mrf.mxu0 }
 0x738   : > { %v5454_v30 = vmul.f32 -1.442695, %v3649_v8  ;;  %v3644_v10 = vadd.f32 %v8297_v48, %v3643_v5 }
 0x73a   : > { %6653 = vpow2.f32 %v5454_v30  ;;  %v5453_v2 = vmul.f32 -1.442695, %v3644_v10 }
 0x73c   : > { %6655 = vpow2.f32 %v5453_v2  ;;  %v8309_v2 = vsub.f32 1.0, %v7576_v33 }
 0x73d   : > { %v5950_v41 = vpop.f32.mrf.mxu0 }
 0x73e   : > { %v3659_v24 = vadd.f32 %v5950_v41, %v8297_v48 }
 0x73f   : > { %v3653_v43 = vpop.f32.mrf.mxu0 }
 0x740   : > { %v5456_v45 = vmul.f32 -1.442695, %v3659_v24  ;;  %v3654_v40 = vadd.f32 %v8297_v48, %v3653_v43 }
 0x742   : > { %6657 = vpow2.f32 %v5456_v45  ;;  %v5455_v14 = vmul.f32 -1.442695, %v3654_v40 }
 0x744   : > { %6659 = vpow2.f32 %v5455_v14 }
 0x745   : > { %v5953_v47 = vpop.f32.mrf.mxu0 }
 0x746   : > { %v3669_v56 = vadd.f32 %v5953_v47, %v8297_v48 }
 0x747   : > { %v6654_v13 = vpop.eup %6653  ;;  %v3663_v38 = vpop.f32.mrf.mxu0 }
 0x748   : > { %v4155_v52 = vadd.f32 1.0, %v6654_v13  ;;  %v5458_v44 = vmul.f32 -1.442695, %v3669_v56  ;;  %v3664_v11 = vadd.f32 %v8297_v48, %v3663_v38 }
 0x749   : > { %v6656_v19 = vpop.eup %6655 }
 0x74a   : > { %6661 = vrcp.f32 %v4155_v52  ;;  %v4154_v12 = vadd.f32 1.0, %v6656_v19  ;;  %v5457_v60 = vmul.f32 -1.442695, %v3664_v11 }
 0x74b   : > { %6663 = vpow2.f32 %v5458_v44 }
 0x74c   : > { %6665 = vrcp.f32 %v4154_v12 }
 0x74d   : > { %6667 = vpow2.f32 %v5457_v60  ;;  %v5956_v35 = vpop.f32.mrf.mxu0 }
 0x74e   : > { %v3679_v49 = vadd.f32 %v5956_v35, %v8297_v48 }
 0x74f   : > { %v6658_v16 = vpop.eup %6657  ;;  %v3673_v37 = vpop.f32.mrf.mxu0 }
 0x750   : > { %v4157_v55 = vadd.f32 1.0, %v6658_v16  ;;  %v5460_v15 = vmul.f32 -1.442695, %v3679_v49  ;;  %v3674_v8 = vadd.f32 %v8297_v48, %v3673_v37 }
 0x751   : > { %v6660_v5 = vpop.eup %6659 }
 0x752   : > { %6669 = vrcp.f32 %v4157_v55  ;;  %v4156_v30 = vadd.f32 1.0, %v6660_v5  ;;  %v5459_v10 = vmul.f32 -1.442695, %v3674_v8 }
 0x753   : > { %6671 = vpow2.f32 %v5460_v15 }
 0x754   : > { %6673 = vrcp.f32 %v4156_v30 }
 0x755   : > { %6675 = vpow2.f32 %v5459_v10  ;;  %v5959_v41 = vpop.f32.mrf.mxu0 }
 0x756   : > { %v3689_v24 = vadd.f32 %v5959_v41, %v8297_v48 }
 0x757   : > { %v6662_v43 = vpop.eup %6661  ;;  %v3683_v45 = vpop.f32.mrf.mxu0 }
 0x758   : > { %v6664_v40 = vpop.eup %6663  ;;  %v4347_v14 = vmul.f32 %v6662_v43, %v8309_v2  ;;  %v5462_v47 = vmul.f32 -1.442695, %v3689_v24  ;;  %v3684_v56 = vadd.f32 %v8297_v48, %v3683_v45 }
 0x759   : > { %v6666_v13 = vpop.eup %6665  ;;  %v4159_v38 = vadd.f32 1.0, %v6664_v40 }
 0x75a   : > { %v6668_v52 = vpop.eup %6667  ;;  %v4411_v33 = vadd.f32 %v4347_v14, %v7825_v0  ;;  %v4346_v44 = vmul.f32 %v6666_v13, %v8309_v2  ;;  %6677 = vpow2.f32 %v5462_v47  ;;  %v5461_v11 = vmul.f32 -1.442695, %v3684_v56 }
 0x75b   : > { %6679 = vrcp.f32 %v4159_v38  ;;  %v4158_v19 = vadd.f32 1.0, %v6668_v52 }
 0x75c   : > { %4475 = vst.msk [vmem:[%s8316_s24 + $0x8] sm:$0xff] %vm398_vm0, %v4411_v33  ;;  %v4410_v12 = vadd.f32 %v4346_v44, %v7841_v63  ;;  %6681 = vpow2.f32 %v5461_v11 }
 0x75d   : > { %6683 = vrcp.f32 %v4158_v19  ;;  %v5962_v60 = vpop.f32.mrf.mxu0 }
 0x75e   : > { %4474 = vst.msk [vmem:[%s8316_s24] sm:$0xff] %vm398_vm0, %v4410_v12  ;;  %v3699_v0 = vadd.f32 %v5962_v60, %v8297_v48 }
 0x75f   : > { %v6670_v35 = vpop.eup %6669  ;;  %v3693_v49 = vpop.f32.mrf.mxu0 }
 0x760   : > { %v6672_v16 = vpop.eup %6671  ;;  %v4349_v37 = vmul.f32 %v6670_v35, %v8309_v2  ;;  %v5464_v55 = vmul.f32 -1.442695, %v3699_v0  ;;  %v3694_v15 = vadd.f32 %v8297_v48, %v3693_v49 }
 0x761   : > { %v6674_v8 = vpop.eup %6673  ;;  %v4161_v5 = vadd.f32 1.0, %v6672_v16 }
 0x762   : > { %v6676_v63 = vpop.eup %6675  ;;  %v4413_v30 = vadd.f32 %v4349_v37, %v7797_v25  ;;  %v4348_v10 = vmul.f32 %v6674_v8, %v8309_v2  ;;  %6685 = vpow2.f32 %v5464_v55  ;;  %v5463_v41 = vmul.f32 -1.442695, %v3694_v15 }
 0x763   : > { %6687 = vrcp.f32 %v4161_v5  ;;  %v4160_v24 = vadd.f32 1.0, %v6676_v63 }
 0x764   : > { %4477 = vst.msk [vmem:[%s8316_s24 + $0x18] sm:$0xff] %vm398_vm0, %v4413_v30  ;;  %v4412_v43 = vadd.f32 %v4348_v10, %v7809_v34  ;;  %6689 = vpow2.f32 %v5463_v41 }
 0x765   : > { %6691 = vrcp.f32 %v4160_v24  ;;  %v5965_v45 = vpop.f32.mrf.mxu0 }
 0x766   : > { %4476 = vst.msk [vmem:[%s8316_s24 + $0x10] sm:$0xff] %vm398_vm0, %v4412_v43  ;;  %v3709_v40 = vadd.f32 %v5965_v45, %v8297_v48 }
 0x767   : > { %v6678_v14 = vpop.eup %6677  ;;  %v3703_v25 = vpop.f32.mrf.mxu0 }
 0x768   : > { %v6680_v47 = vpop.eup %6679  ;;  %v4163_v56 = vadd.f32 1.0, %v6678_v14  ;;  %v5466_v13 = vmul.f32 -1.442695, %v3709_v40  ;;  %v3704_v38 = vadd.f32 %v8297_v48, %v3703_v25 }
 0x769   : > { %v6682_v52 = vpop.eup %6681  ;;  %v4351_v33 = vmul.f32 %v6680_v47, %v8309_v2 }
 0x76a   : > { %v6684_v34 = vpop.eup %6683  ;;  %6693 = vrcp.f32 %v4163_v56  ;;  %v4162_v44 = vadd.f32 1.0, %v6682_v52  ;;  %v5465_v11 = vmul.f32 -1.442695, %v3704_v38 }
 0x76b   : > { %v4415_v19 = vadd.f32 %v4351_v33, %v7763_v59  ;;  %v4350_v12 = vmul.f32 %v6684_v34, %v8309_v2  ;;  %6695 = vpow2.f32 %v5466_v13 }
 0x76c   : > { %6697 = vrcp.f32 %v4162_v44 }
 0x76d   : > { %4479 = vst.msk [vmem:[%s8316_s24 + $0x28] sm:$0xff] %vm398_vm0, %v4415_v19  ;;  %v4414_v60 = vadd.f32 %v4350_v12, %v7779_v50  ;;  %6699 = vpow2.f32 %v5465_v11  ;;  %v5968_v0 = vpop.f32.mrf.mxu0 }
 0x76e   : > { %v3719_v35 = vadd.f32 %v5968_v0, %v8297_v48 }
 0x76f   : > { %v6686_v49 = vpop.eup %6685  ;;  %4478 = vst.msk [vmem:[%s8316_s24 + $0x20] sm:$0xff] %vm398_vm0, %v4414_v60  ;;  %v3713_v16 = vpop.f32.mrf.mxu0 }
 0x770   : > { %v6688_v37 = vpop.eup %6687  ;;  %v4165_v55 = vadd.f32 1.0, %v6686_v49  ;;  %v5468_v15 = vmul.f32 -1.442695, %v3719_v35  ;;  %v3714_v59 = vadd.f32 %v8297_v48, %v3713_v16 }
 0x771   : > { %v6690_v8 = vpop.eup %6689  ;;  %v4353_v5 = vmul.f32 %v6688_v37, %v8309_v2  ;;  %v5971_v63 = vpop.f32.mrf.mxu0 }
 0x772   : > { %v6692_v30 = vpop.eup %6691  ;;  %6701 = vrcp.f32 %v4165_v55  ;;  %v4164_v50 = vadd.f32 1.0, %v6690_v8  ;;  %v5467_v10 = vmul.f32 -1.442695, %v3714_v59  ;;  %v3729_v41 = vadd.f32 %v5971_v63, %v8297_v48 }
 0x773   : > { %v4417_v24 = vadd.f32 %v4353_v5, %v7731_v1  ;;  %v4352_v43 = vmul.f32 %v6692_v30, %v8309_v2  ;;  %6703 = vpow2.f32 %v5468_v15  ;;  %v3723_v45 = vpop.f32.mrf.mxu0 }
 0x774   : > { %6705 = vrcp.f32 %v4164_v50  ;;  %v5470_v40 = vmul.f32 -1.442695, %v3729_v41  ;;  %v3724_v14 = vadd.f32 %v8297_v48, %v3723_v45 }
 0x775   : > { %4481 = vst.msk [vmem:[%s8316_s24 + $0x38] sm:$0xff] %vm398_vm0, %v4417_v24  ;;  %v4416_v25 = vadd.f32 %v4352_v43, %v7747_v28  ;;  %6707 = vpow2.f32 %v5467_v10  ;;  %v5974_v47 = vpop.f32.mrf.mxu0 }
 0x776   : > { %6709 = vpow2.f32 %v5470_v40  ;;  %v5469_v56 = vmul.f32 -1.442695, %v3724_v14  ;;  %v3739_v13 = vadd.f32 %v5974_v47, %v8297_v48 }
 0x777   : > { %v6694_v38 = vpop.eup %6693  ;;  %4480 = vst.msk [vmem:[%s8316_s24 + $0x30] sm:$0xff] %vm398_vm0, %v4416_v25  ;;  %v3733_v1 = vpop.f32.mrf.mxu0 }
 0x778   : > { %v6696_v52 = vpop.eup %6695  ;;  %v4355_v33 = vmul.f32 %v6694_v38, %v8309_v2  ;;  %6711 = vpow2.f32 %v5469_v56  ;;  %v5472_v34 = vmul.f32 -1.442695, %v3739_v13  ;;  %v3734_v44 = vadd.f32 %v8297_v48, %v3733_v1 }
 0x779   : > { %v6698_v11 = vpop.eup %6697  ;;  %v4167_v28 = vadd.f32 1.0, %v6696_v52  ;;  %v5977_v19 = vpop.f32.mrf.mxu0 }
 0x77a   : > { %v6700_v12 = vpop.eup %6699  ;;  %v4419_v60 = vadd.f32 %v4355_v33, %v7699_v54  ;;  %v4354_v0 = vmul.f32 %v6698_v11, %v8309_v2  ;;  %6713 = vpow2.f32 %v5472_v34  ;;  %v5471_v35 = vmul.f32 -1.442695, %v3734_v44 }
 0x77b   : > { %6715 = vrcp.f32 %v4167_v28  ;;  %v4166_v49 = vadd.f32 1.0, %v6700_v12  ;;  %v3749_v16 = vadd.f32 %v5977_v19, %v8297_v48  ;;  %v3743_v37 = vpop.f32.mrf.mxu0 }
 0x77c   : > { %4483 = vst.msk [vmem:[%s8316_s24 + $0x48] sm:$0xff] %vm398_vm0, %v4419_v60  ;;  %v4418_v55 = vadd.f32 %v4354_v0, %v7715_v32  ;;  %6717 = vpow2.f32 %v5471_v35  ;;  %v3744_v15 = vadd.f32 %v8297_v48, %v3743_v37 }
 0x77d   : > { %6719 = vrcp.f32 %v4166_v49  ;;  %v5474_v59 = vmul.f32 -1.442695, %v3749_v16  ;;  %v5980_v8 = vpop.f32.mrf.mxu0 }
 0x77e   : > { %4482 = vst.msk [vmem:[%s8316_s24 + $0x40] sm:$0xff] %vm398_vm0, %v4418_v55  ;;  %v5473_v54 = vmul.f32 -1.442695, %v3744_v15  ;;  %v3759_v5 = vadd.f32 %v5980_v8, %v8297_v48 }
 0x77f   : > { %v6702_v63 = vpop.eup %6701  ;;  %6721 = vpow2.f32 %v5474_v59  ;;  %v3753_v30 = vpop.f32.mrf.mxu0 }
 0x780   : > { %v6704_v50 = vpop.eup %6703  ;;  %v4357_v10 = vmul.f32 %v6702_v63, %v8309_v2  ;;  %6723 = vpow2.f32 %v5473_v54  ;;  %v5476_v32 = vmul.f32 -1.442695, %v3759_v5  ;;  %v3754_v41 = vadd.f32 %v8297_v48, %v3753_v30 }
 0x781   : > { %v6706_v24 = vpop.eup %6705  ;;  %v4169_v43 = vadd.f32 1.0, %v6704_v50  ;;  %v5983_v45 = vpop.f32.mrf.mxu0 }
 0x782   : > { %v6708_v40 = vpop.eup %6707  ;;  %v4421_v14 = vadd.f32 %v4357_v10, %v7664_v21  ;;  %v4356_v25 = vmul.f32 %v6706_v24, %v8309_v2  ;;  %6725 = vpow2.f32 %v5476_v32  ;;  %v5475_v47 = vmul.f32 -1.442695, %v3754_v41 }
 0x783   : > { %v6710_v56 = vpop.eup %6709  ;;  %6727 = vrcp.f32 %v4169_v43  ;;  %v4168_v13 = vadd.f32 1.0, %v6708_v40  ;;  %v3769_v38 = vadd.f32 %v5983_v45, %v8297_v48  ;;  %v3763_v1 = vpop.f32.mrf.mxu0 }
 0x784   : > { %4485 = vst.msk [vmem:[%s8316_s24 + $0x58] sm:$0xff] %vm398_vm0, %v4421_v14  ;;  %v4420_v52 = vadd.f32 %v4356_v25, %v7683_v46  ;;  %v4171_v33 = vadd.f32 1.0, %v6710_v56  ;;  %6729 = vpow2.f32 %v5475_v47  ;;  %v3764_v34 = vadd.f32 %v8297_v48, %v3763_v1 }
 0x785   : > { %v6712_v21 = vpop.eup %6711  ;;  %6731 = vrcp.f32 %v4168_v13  ;;  %v5478_v44 = vmul.f32 -1.442695, %v3769_v38  ;;  %v5986_v11 = vpop.f32.mrf.mxu0 }
 0x786   : > { %4484 = vst.msk [vmem:[%s8316_s24 + $0x50] sm:$0xff] %vm398_vm0, %v4420_v52  ;;  %6733 = vrcp.f32 %v4171_v33  ;;  %v4170_v28 = vadd.f32 1.0, %v6712_v21  ;;  %v5477_v19 = vmul.f32 -1.442695, %v3764_v34  ;;  %v3779_v12 = vadd.f32 %v5986_v11, %v8297_v48 }
 0x787   : > { %v6714_v60 = vpop.eup %6713  ;;  %6735 = vpow2.f32 %v5478_v44  ;;  %v3773_v0 = vpop.f32.mrf.mxu0 }
 0x788   : > { %v6716_v35 = vpop.eup %6715  ;;  %6737 = vrcp.f32 %v4170_v28  ;;  %v4173_v46 = vadd.f32 1.0, %v6714_v60  ;;  %v5480_v49 = vmul.f32 -1.442695, %v3779_v12  ;;  %v3774_v16 = vadd.f32 %v8297_v48, %v3773_v0 }
 0x789   : > { %v6718_v37 = vpop.eup %6717  ;;  %v4359_v55 = vmul.f32 %v6716_v35, %v8309_v2  ;;  %6739 = vpow2.f32 %v5477_v19  ;;  %v5989_v15 = vpop.f32.mrf.mxu0 }
 0x78a   : > { %v6720_v59 = vpop.eup %6719  ;;  %6741 = vrcp.f32 %v4173_v46  ;;  %v4172_v8 = vadd.f32 1.0, %v6718_v37  ;;  %v5479_v54 = vmul.f32 -1.442695, %v3774_v16  ;;  %v3789_v5 = vadd.f32 %v5989_v15, %v8297_v48 }
 0x78b   : > { %v4423_v63 = vadd.f32 %v4359_v55, %v7632_v39  ;;  %v4358_v30 = vmul.f32 %v6720_v59, %v8309_v2  ;;  %6743 = vpow2.f32 %v5480_v49  ;;  %v3783_v50 = vpop.f32.mrf.mxu0 }
 0x78c   : > { %v6722_v10 = vpop.eup %6721  ;;  %6745 = vrcp.f32 %v4172_v8  ;;  %v5482_v32 = vmul.f32 -1.442695, %v3789_v5  ;;  %v3784_v41 = vadd.f32 %v8297_v48, %v3783_v50 }
 0x78d   : > { %v6724_v24 = vpop.eup %6723  ;;  %4487 = vst.msk [vmem:[%s8316_s24 + $0x68] sm:$0xff] %vm398_vm0, %v4423_v63  ;;  %v4422_v43 = vadd.f32 %v4358_v30, %v7648_v7  ;;  %v4175_v45 = vadd.f32 1.0, %v6722_v10  ;;  %6747 = vpow2.f32 %v5479_v54  ;;  %v5992_v40 = vpop.f32.mrf.mxu0 }
 0x78e   : > { %v4174_v14 = vadd.f32 1.0, %v6724_v24  ;;  %6749 = vpow2.f32 %v5482_v32  ;;  %v5481_v39 = vmul.f32 -1.442695, %v3784_v41  ;;  %v3799_v25 = vadd.f32 %v5992_v40, %v8297_v48 }
 0x78f   : > { %v6726_v47 = vpop.eup %6725  ;;  %4486 = vst.msk [vmem:[%s8316_s24 + $0x60] sm:$0xff] %vm398_vm0, %v4422_v43  ;;  %6751 = vrcp.f32 %v4175_v45  ;;  %v3793_v56 = vpop.f32.mrf.mxu0 }
 0x790   : > { %v6728_v13 = vpop.eup %6727  ;;  %6753 = vrcp.f32 %v4174_v14  ;;  %v4177_v38 = vadd.f32 1.0, %v6726_v47  ;;  %v5484_v1 = vmul.f32 -1.442695, %v3799_v25  ;;  %v3794_v52 = vadd.f32 %v8297_v48, %v3793_v56 }
 0x791   : > { %v6730_v7 = vpop.eup %6729  ;;  %v4361_v33 = vmul.f32 %v6728_v13, %v8309_v2  ;;  %6755 = vpow2.f32 %v5481_v39 }
 0x792   : > { %v6732_v34 = vpop.eup %6731  ;;  %6757 = vrcp.f32 %v4177_v38  ;;  %v4176_v21 = vadd.f32 1.0, %v6730_v7  ;;  %v5483_v44 = vmul.f32 -1.442695, %v3794_v52 }
 0x793   : > { %v6734_v11 = vpop.eup %6733  ;;  %v4425_v28 = vadd.f32 %v4361_v33, %v7590_v6  ;;  %v4360_v19 = vmul.f32 %v6732_v34, %v8309_v2  ;;  %6759 = vpow2.f32 %v5484_v1 }
 0x794   : > { %v6736_v12 = vpop.eup %6735  ;;  %v4363_v60 = vmul.f32 %v6734_v11, %v8309_v2  ;;  %6761 = vrcp.f32 %v4176_v21  ;;  %v5995_v0 = vpop.f32.mrf.mxu0 }
 0x795   : > { %v6738_v35 = vpop.eup %6737  ;;  %4489 = vst.msk [vmem:[%s8316_s24 + $0x78] sm:$0xff] %vm398_vm0, %v4425_v28  ;;  %v4424_v46 = vadd.f32 %v4360_v19, %v7608_v20  ;;  %v4179_v49 = vadd.f32 1.0, %v6736_v12  ;;  %6763 = vpow2.f32 %v5483_v44  ;;  %v3809_v16 = vadd.f32 %v5995_v0, %v8297_v48 }
 0x796   : > { %v6740_v6 = vpop.eup %6739  ;;  %v4427_v37 = vadd.f32 %v4363_v60, %v7816_v62  ;;  %v4362_v55 = vmul.f32 %v6738_v35, %v8309_v2  ;;  %v3803_v15 = vpop.f32.mrf.mxu0 }
 0x797   : > { %v6742_v59 = vpop.eup %6741  ;;  %4488 = vst.msk [vmem:[%s8316_s24 + $0x70] sm:$0xff] %vm398_vm0, %v4424_v46  ;;  %6765 = vrcp.f32 %v4179_v49  ;;  %v4178_v8 = vadd.f32 1.0, %v6740_v6  ;;  %v5486_v54 = vmul.f32 -1.442695, %v3809_v16  ;;  %v3804_v5 = vadd.f32 %v8297_v48, %v3803_v15  ;;  %v8907_v46 = vld [vmem:[#allocation12_spill] sm:$0xff] }
 0x798   : > { %v6744_v20 = vpop.eup %6743  ;;  %4491 = vst.msk [vmem:[%s8316_s24 + $0x88] sm:$0xff] %vm398_vm0, %v4427_v37  ;;  %v4426_v63 = vadd.f32 %v4362_v55, %v7830_v17  ;;  %v4365_v62 = vmul.f32 %v6742_v59, %v8309_v2 }
 0x799   : > { %v6746_v30 = vpop.eup %6745  ;;  %6767 = vrcp.f32 %v4178_v8  ;;  %v4181_v50 = vadd.f32 1.0, %v6744_v20  ;;  %v5485_v10 = vmul.f32 -1.442695, %v3804_v5  ;;  %v8908_v8 = vld [vmem:[#allocation9_spill] sm:$0xff] }
 0x79a   : > { %v6748_v32 = vpop.eup %6747  ;;  %4490 = vst.msk [vmem:[%s8316_s24 + $0x80] sm:$0xff] %vm398_vm0, %v4426_v63  ;;  %v4429_v41 = vadd.f32 %v4365_v62, %v7783_v57  ;;  %v4364_v24 = vmul.f32 %v6746_v30, %v8309_v2  ;;  %6769 = vpow2.f32 %v5486_v54 }
 0x79b   : > { %v6750_v43 = vpop.eup %6749  ;;  %6771 = vrcp.f32 %v4181_v50  ;;  %v4180_v45 = vadd.f32 1.0, %v6748_v32 }
 0x79c   : > { %v6752_v40 = vpop.eup %6751  ;;  %4493 = vst.msk [vmem:[%s8316_s24 + $0x98] sm:$0xff] %vm398_vm0, %v4429_v41  ;;  %v4428_v17 = vadd.f32 %v4364_v24, %v7801_v9  ;;  %v4183_v14 = vadd.f32 1.0, %v6750_v43  ;;  %6773 = vpow2.f32 %v5485_v10  ;;  %v5998_v39 = vpop.f32.mrf.mxu0  ;;  %v8909_v10 = vld [vmem:[#allocation10_spill] sm:$0xff] }
 0x79d   : > { %v6754_v25 = vpop.eup %6753  ;;  %v4367_v47 = vmul.f32 %v6752_v40, %v8309_v2  ;;  %6775 = vrcp.f32 %v4180_v45  ;;  %v3819_v57 = vadd.f32 %v5998_v39, %v8297_v48 }
 0x79e   : > { %v6756_v56 = vpop.eup %6755  ;;  %4492 = vst.msk [vmem:[%s8316_s24 + $0x90] sm:$0xff] %vm398_vm0, %v4428_v17  ;;  %v4366_v13 = vmul.f32 %v6754_v25, %v8309_v2  ;;  %6777 = vrcp.f32 %v4183_v14  ;;  %v3813_v38 = vpop.f32.mrf.mxu0  ;;  %v8910_v17 = vld [vmem:[#allocation7_spill] sm:$0xff] }
 0x79f   : > { %v6758_v1 = vpop.eup %6757  ;;  %v4431_v9 = vadd.f32 %v4367_v47, %v7751_v51  ;;  %v4182_v52 = vadd.f32 1.0, %v6756_v56  ;;  %v5488_v7 = vmul.f32 -1.442695, %v3819_v57  ;;  %v3814_v33 = vadd.f32 %v8297_v48, %v3813_v38  ;;  %v8906_v51 = vld [vmem:[#allocation11_spill] sm:$0xff]  ;;  %v8911_v57 = vld [vmem:[#allocation8_spill] sm:$0xff] }
 0x7a0   : > { %v6760_v34 = vpop.eup %6759  ;;  %v4430_v21 = vadd.f32 %v4366_v13, %v7767_v27  ;;  %v4369_v44 = vmul.f32 %v6758_v1, %v8309_v2  ;;  %v8912_v1 = vld [vmem:[#allocation5_spill] sm:$0xff] }
 0x7a1   : > { %v6762_v11 = vpop.eup %6761  ;;  %4495 = vst.msk [vmem:[%s8316_s24 + $0xa8] sm:$0xff] %vm398_vm0, %v4431_v9  ;;  %6779 = vrcp.f32 %v4182_v52  ;;  %v4185_v28 = vadd.f32 1.0, %v6760_v34  ;;  %v5487_v19 = vmul.f32 -1.442695, %v3814_v33 }
 0x7a2   : > { %v6764_v12 = vpop.eup %6763  ;;  %4494 = vst.msk [vmem:[%s8316_s24 + $0xa0] sm:$0xff] %vm398_vm0, %v4430_v21  ;;  %v4433_v60 = vadd.f32 %v4369_v44, %v8906_v51  ;;  %v4368_v0 = vmul.f32 %v6762_v11, %v8309_v2  ;;  %6781 = vpow2.f32 %v5488_v7 }
 0x7a3   : > { %6783 = vrcp.f32 %v4185_v28  ;;  %v4184_v35 = vadd.f32 1.0, %v6764_v12 }
 0x7a4   : > { %v6766_v27 = vpop.eup %6765  ;;  %4497 = vst.msk [vmem:[%s8316_s24 + $0xb8] sm:$0xff] %vm398_vm0, %v4433_v60  ;;  %v4432_v49 = vadd.f32 %v4368_v0, %v8907_v46  ;;  %6785 = vpow2.f32 %v5487_v19  ;;  %v6001_v16 = vpop.f32.mrf.mxu0  ;;  %v8913_v19 = vld [vmem:[#allocation6_spill] sm:$0xff] }
 0x7a5   : > { %v4371_v6 = vmul.f32 %v6766_v27, %v8309_v2  ;;  %6787 = vrcp.f32 %v4184_v35  ;;  %v3829_v37 = vadd.f32 %v6001_v16, %v8297_v48  ;;  %v8914_v27 = vld [vmem:[#allocation3_spill] sm:$0xff] }
 0x7a6   : > { %v6768_v55 = vpop.eup %6767  ;;  %4496 = vst.msk [vmem:[%s8316_s24 + $0xb0] sm:$0xff] %vm398_vm0, %v4432_v49  ;;  %v3823_v15 = vpop.f32.mrf.mxu0 }
 0x7a7   : > { %v6770_v59 = vpop.eup %6769  ;;  %v4435_v54 = vadd.f32 %v4371_v6, %v8908_v8  ;;  %v4370_v5 = vmul.f32 %v6768_v55, %v8309_v2  ;;  %v5490_v20 = vmul.f32 -1.442695, %v3829_v37  ;;  %v3824_v63 = vadd.f32 %v8297_v48, %v3823_v15  ;;  %v8915_v6 = vld [vmem:[#allocation4_spill] sm:$0xff] }
 0x7a8   : > { %v6772_v62 = vpop.eup %6771  ;;  %v4187_v30 = vadd.f32 1.0, %v6770_v59 }
 0x7a9   : > { %v6774_v50 = vpop.eup %6773  ;;  %4499 = vst.msk [vmem:[%s8316_s24 + $0xc8] sm:$0xff] %vm398_vm0, %v4435_v54  ;;  %v4434_v32 = vadd.f32 %v4370_v5, %v8909_v10  ;;  %v4373_v41 = vmul.f32 %v6772_v62, %v8309_v2  ;;  %6789 = vpow2.f32 %v5490_v20  ;;  %v5489_v24 = vmul.f32 -1.442695, %v3824_v63 }
 0x7aa   : > { %v6776_v43 = vpop.eup %6775  ;;  %6791 = vrcp.f32 %v4187_v30  ;;  %v4186_v45 = vadd.f32 1.0, %v6774_v50 }
 0x7ab   : > { %v6778_v40 = vpop.eup %6777  ;;  %4498 = vst.msk [vmem:[%s8316_s24 + $0xc0] sm:$0xff] %vm398_vm0, %v4434_v32  ;;  %v4437_v14 = vadd.f32 %v4373_v41, %v8910_v17  ;;  %v4372_v39 = vmul.f32 %v6776_v43, %v8309_v2  ;;  %6793 = vpow2.f32 %v5489_v24 }
 0x7ac   : > { %v4375_v25 = vmul.f32 %v6778_v40, %v8309_v2  ;;  %6795 = vrcp.f32 %v4186_v45  ;;  %v6004_v47 = vpop.f32.mrf.mxu0 }
 0x7ad   : > { %4501 = vst.msk [vmem:[%s8316_s24 + $0xd8] sm:$0xff] %vm398_vm0, %v4437_v14  ;;  %v4436_v56 = vadd.f32 %v4372_v39, %v8911_v57  ;;  %v3839_v13 = vadd.f32 %v6004_v47, %v8297_v48 }
 0x7ae   : > { %v6780_v38 = vpop.eup %6779  ;;  %v4439_v9 = vadd.f32 %v4375_v25, %v8912_v1  ;;  %v3833_v52 = vpop.f32.mrf.mxu0 }
 0x7af   : > { %v6782_v7 = vpop.eup %6781  ;;  %4500 = vst.msk [vmem:[%s8316_s24 + $0xd0] sm:$0xff] %vm398_vm0, %v4436_v56  ;;  %v4374_v33 = vmul.f32 %v6780_v38, %v8309_v2  ;;  %v5492_v34 = vmul.f32 -1.442695, %v3839_v13  ;;  %v3834_v21 = vadd.f32 %v8297_v48, %v3833_v52 }
 0x7b0   : > { %v6784_v44 = vpop.eup %6783  ;;  %4503 = vst.msk [vmem:[%s8316_s24 + $0xe8] sm:$0xff] %vm398_vm0, %v4439_v9  ;;  %v4189_v11 = vadd.f32 1.0, %v6782_v7 }
 0x7b1   : > { %v6786_v28 = vpop.eup %6785  ;;  %v4438_v12 = vadd.f32 %v4374_v33, %v8913_v19  ;;  %v4377_v51 = vmul.f32 %v6784_v44, %v8309_v2  ;;  %6797 = vpow2.f32 %v5492_v34  ;;  %v5491_v60 = vmul.f32 -1.442695, %v3834_v21 }
 0x7b2   : > { %v6788_v0 = vpop.eup %6787  ;;  %6799 = vrcp.f32 %v4189_v11  ;;  %v4188_v35 = vadd.f32 1.0, %v6786_v28 }
 0x7b3   : > { %4502 = vst.msk [vmem:[%s8316_s24 + $0xe0] sm:$0xff] %vm398_vm0, %v4438_v12  ;;  %v4441_v46 = vadd.f32 %v4377_v51, %v8914_v27  ;;  %v4376_v49 = vmul.f32 %v6788_v0, %v8309_v2  ;;  %6801 = vpow2.f32 %v5491_v60 }
 0x7b4   : > { %6803 = vrcp.f32 %v4188_v35  ;;  %v6007_v16 = vpop.f32.mrf.mxu0 }
 0x7b5   : > { %4505 = vst.msk [vmem:[%s8316_s24 + $0xf8] sm:$0xff] %vm398_vm0, %v4441_v46  ;;  %v4440_v37 = vadd.f32 %v4376_v49, %v8915_v6  ;;  %v3849_v55 = vadd.f32 %v6007_v16, %v8297_v48 }
 0x7b6   : > { %v6790_v15 = vpop.eup %6789  ;;  %v3843_v59 = vpop.f32.mrf.mxu0 }
 0x7b7   : > { %v6792_v8 = vpop.eup %6791  ;;  %4504 = vst.msk [vmem:[%s8316_s24 + $0xf0] sm:$0xff] %vm398_vm0, %v4440_v37  ;;  %v4191_v54 = vadd.f32 1.0, %v6790_v15  ;;  %v5494_v5 = vmul.f32 -1.442695, %v3849_v55  ;;  %v3844_v20 = vadd.f32 %v8297_v48, %v3843_v59 }
 0x7b8   : > { %v6794_v63 = vpop.eup %6793  ;;  %v4379_v62 = vmul.f32 %v6792_v8, %v8309_v2 }
 0x7b9   : > { %v6796_v30 = vpop.eup %6795  ;;  %6805 = vrcp.f32 %v4191_v54  ;;  %v4190_v50 = vadd.f32 1.0, %v6794_v63  ;;  %v5493_v10 = vmul.f32 -1.442695, %v3844_v20 }
 0x7ba   : > { %v4443_v32 = vadd.f32 %v4379_v62, %v8096_v22  ;;  %v4378_v41 = vmul.f32 %v6796_v30, %v8309_v2  ;;  %6807 = vpow2.f32 %v5494_v5 }
 0x7bb   : > { %6809 = vrcp.f32 %v4190_v50 }
 0x7bc   : > { %4507 = vst.msk [vmem:[%s8316_s24 + $0x108] sm:$0xff] %vm398_vm0, %v4443_v32  ;;  %v4442_v24 = vadd.f32 %v4378_v41, %v8107_v61  ;;  %6811 = vpow2.f32 %v5493_v10  ;;  %v6010_v43 = vpop.f32.mrf.mxu0 }
 0x7bd   : > { %v3859_v45 = vadd.f32 %v6010_v43, %v8297_v48 }
 0x7be   : > { %v6798_v40 = vpop.eup %6797  ;;  %4506 = vst.msk [vmem:[%s8316_s24 + $0x100] sm:$0xff] %vm398_vm0, %v4442_v24  ;;  %v3853_v17 = vpop.f32.mrf.mxu0 }
 0x7bf   : > { %v6800_v14 = vpop.eup %6799  ;;  %v4193_v39 = vadd.f32 1.0, %v6798_v40  ;;  %v5496_v22 = vmul.f32 -1.442695, %v3859_v45  ;;  %v3854_v25 = vadd.f32 %v8297_v48, %v3853_v17 }
 0x7c0   : > { %v6802_v47 = vpop.eup %6801  ;;  %v4381_v57 = vmul.f32 %v6800_v14, %v8309_v2 }
 0x7c1   : > { %v6804_v56 = vpop.eup %6803  ;;  %6813 = vrcp.f32 %v4193_v39  ;;  %v4192_v61 = vadd.f32 1.0, %v6802_v47  ;;  %v5495_v13 = vmul.f32 -1.442695, %v3854_v25 }
 0x7c2   : > { %v4445_v38 = vadd.f32 %v4381_v57, %v8072_v58  ;;  %v4380_v1 = vmul.f32 %v6804_v56, %v8309_v2  ;;  %6815 = vpow2.f32 %v5496_v22 }
 0x7c3   : > { %6817 = vrcp.f32 %v4192_v61  ;;  %v8521_v61 = vld [vmem:[%s8842_s6 + $0x1] ss:$0 sm:$0xff] }
 0x7c4   : > { %4509 = vst.msk [vmem:[%s8316_s24 + $0x118] sm:$0xff] %vm398_vm0, %v4445_v38  ;;  %v4444_v9 = vadd.f32 %v4380_v1, %v8084_v42  ;;  %6819 = vpow2.f32 %v5495_v13  ;;  %v6013_v52 = vpop.f32.mrf.mxu0 }
 0x7c5   : > { %v3869_v7 = vadd.f32 %v6013_v52, %v8297_v48 }
 0x7c6   : > { %v6806_v33 = vpop.eup %6805  ;;  %4508 = vst.msk [vmem:[%s8316_s24 + $0x110] sm:$0xff] %vm398_vm0, %v4444_v9  ;;  %v3863_v34 = vpop.f32.mrf.mxu0 }
 0x7c7   : > { %v6808_v21 = vpop.eup %6807  ;;  %v4383_v58 = vmul.f32 %v6806_v33, %v8309_v2  ;;  %v5498_v44 = vmul.f32 -1.442695, %v3869_v7  ;;  %v3864_v11 = vadd.f32 %v8297_v48, %v3863_v34 }
 0x7c8   : > { %v6810_v28 = vpop.eup %6809  ;;  %v4195_v19 = vadd.f32 1.0, %v6808_v21 }
 0x7c9   : > { %v6812_v12 = vpop.eup %6811  ;;  %v4447_v42 = vadd.f32 %v4383_v58, %v8048_v31  ;;  %v4382_v51 = vmul.f32 %v6810_v28, %v8309_v2  ;;  %6821 = vpow2.f32 %v5498_v44  ;;  %v5497_v60 = vmul.f32 -1.442695, %v3864_v11 }
 0x7ca   : > { %6823 = vrcp.f32 %v4195_v19  ;;  %v4194_v0 = vadd.f32 1.0, %v6812_v12 }
 0x7cb   : > { %4511 = vst.msk [vmem:[%s8316_s24 + $0x128] sm:$0xff] %vm398_vm0, %v4447_v42  ;;  %v4446_v35 = vadd.f32 %v4382_v51, %v8060_v23  ;;  %6825 = vpow2.f32 %v5497_v60 }
 0x7cc   : > { %6827 = vrcp.f32 %v4194_v0  ;;  %v6016_v27 = vpop.f32.mrf.mxu0 }
 0x7cd   : > { %4510 = vst.msk [vmem:[%s8316_s24 + $0x120] sm:$0xff] %vm398_vm0, %v4446_v35  ;;  %v3879_v46 = vadd.f32 %v6016_v27, %v8297_v48 }
 0x7ce   : > { %v6814_v49 = vpop.eup %6813  ;;  %v3873_v16 = vpop.f32.mrf.mxu0 }
 0x7cf   : > { %v6816_v31 = vpop.eup %6815  ;;  %v4385_v6 = vmul.f32 %v6814_v49, %v8309_v2  ;;  %v5500_v37 = vmul.f32 -1.442695, %v3879_v46  ;;  %v3874_v55 = vadd.f32 %v8297_v48, %v3873_v16 }
 0x7d0   : > { %v6818_v15 = vpop.eup %6817  ;;  %v4197_v59 = vadd.f32 1.0, %v6816_v31  ;;  %v6019_v8 = vpop.f32.mrf.mxu0 }
 0x7d1   : > { %v6820_v23 = vpop.eup %6819  ;;  %v4449_v54 = vadd.f32 %v4385_v6, %v8024_v18  ;;  %v4384_v5 = vmul.f32 %v6818_v15, %v8309_v2  ;;  %6829 = vpow2.f32 %v5500_v37  ;;  %v5499_v20 = vmul.f32 -1.442695, %v3874_v55 }
 0x7d2   : > { %6831 = vrcp.f32 %v4197_v59  ;;  %v4196_v63 = vadd.f32 1.0, %v6820_v23  ;;  %v3889_v62 = vadd.f32 %v6019_v8, %v8297_v48  ;;  %v3883_v30 = vpop.f32.mrf.mxu0 }
 0x7d3   : > { %4513 = vst.msk [vmem:[%s8316_s24 + $0x138] sm:$0xff] %vm398_vm0, %v4449_v54  ;;  %v4448_v50 = vadd.f32 %v4384_v5, %v8036_v4  ;;  %6833 = vpow2.f32 %v5499_v20  ;;  %v3884_v10 = vadd.f32 %v8297_v48, %v3883_v30 }
 0x7d4   : > { %6835 = vrcp.f32 %v4196_v63  ;;  %v5502_v32 = vmul.f32 -1.442695, %v3889_v62  ;;  %v6022_v41 = vpop.f32.mrf.mxu0 }
 0x7d5   : > { %4512 = vst.msk [vmem:[%s8316_s24 + $0x130] sm:$0xff] %vm398_vm0, %v4448_v50  ;;  %v5501_v18 = vmul.f32 -1.442695, %v3884_v10  ;;  %v3899_v24 = vadd.f32 %v6022_v41, %v8297_v48 }
 0x7d6   : > { %v6822_v43 = vpop.eup %6821  ;;  %6837 = vpow2.f32 %v5502_v32  ;;  %v3893_v45 = vpop.f32.mrf.mxu0 }
 0x7d7   : > { %v6824_v40 = vpop.eup %6823  ;;  %v4199_v17 = vadd.f32 1.0, %v6822_v43  ;;  %6839 = vpow2.f32 %v5501_v18  ;;  %v5504_v14 = vmul.f32 -1.442695, %v3899_v24  ;;  %v3894_v4 = vadd.f32 %v8297_v48, %v3893_v45 }
 0x7d8   : > { %v6826_v39 = vpop.eup %6825  ;;  %v4387_v22 = vmul.f32 %v6824_v40, %v8309_v2  ;;  %v6025_v25 = vpop.f32.mrf.mxu0 }
 0x7d9   : > { %v6828_v47 = vpop.eup %6827  ;;  %6841 = vrcp.f32 %v4199_v17  ;;  %v4198_v57 = vadd.f32 1.0, %v6826_v39  ;;  %v5503_v56 = vmul.f32 -1.442695, %v3894_v4  ;;  %v3909_v13 = vadd.f32 %v8521_v61, %v6025_v25 }
 0x7da   : > { %v4451_v38 = vadd.f32 %v4387_v22, %v8000_v29  ;;  %v4386_v48 = vmul.f32 %v6828_v47, %v8309_v2  ;;  %6843 = vpow2.f32 %v5504_v14  ;;  %v3903_v1 = vpop.f32.mrf.mxu0  ;;  %v8916_v14 = vld [vmem:[#allocation19_spill] sm:$0xff] }
 0x7db   : > { %6845 = vrcp.f32 %v4198_v57  ;;  %v5506_v9 = vmul.f32 -1.442695, %v3909_v13  ;;  %v3904_v52 = vadd.f32 %v8521_v61, %v3903_v1 }
 0x7dc   : > { %4515 = vst.msk [vmem:[%s8316_s24 + $0x148] sm:$0xff] %vm398_vm0, %v4451_v38  ;;  %v4450_v7 = vadd.f32 %v4386_v48, %v8012_v3  ;;  %6847 = vpow2.f32 %v5503_v56  ;;  %v6028_v33 = vpop.f32.mrf.mxu0 }
 0x7dd   : > { %6849 = vpow2.f32 %v5506_v9  ;;  %v5505_v34 = vmul.f32 -1.442695, %v3904_v52  ;;  %v3919_v21 = vadd.f32 %v8521_v61, %v6028_v33 }
 0x7de   : > { %v6830_v58 = vpop.eup %6829  ;;  %4514 = vst.msk [vmem:[%s8316_s24 + $0x140] sm:$0xff] %vm398_vm0, %v4450_v7  ;;  %v3913_v29 = vpop.f32.mrf.mxu0 }
 0x7df   : > { %v6832_v44 = vpop.eup %6831  ;;  %v4201_v11 = vadd.f32 1.0, %v6830_v58  ;;  %6851 = vpow2.f32 %v5505_v34  ;;  %v5508_v28 = vmul.f32 -1.442695, %v3919_v21  ;;  %v3914_v19 = vadd.f32 %v8521_v61, %v3913_v29  ;;  %v8917_v58 = vld [vmem:[#allocation14_spill] sm:$0xff] }
 0x7e0   : > { %v6834_v12 = vpop.eup %6833  ;;  %v4389_v42 = vmul.f32 %v6832_v44, %v8309_v2  ;;  %v6031_v3 = vpop.f32.mrf.mxu0 }
 0x7e1   : > { %v6836_v51 = vpop.eup %6835  ;;  %6853 = vrcp.f32 %v4201_v11  ;;  %v4200_v60 = vadd.f32 1.0, %v6834_v12  ;;  %v5507_v0 = vmul.f32 -1.442695, %v3914_v19  ;;  %v3929_v35 = vadd.f32 %v8521_v61, %v6031_v3 }
 0x7e2   : > { %v4453_v27 = vadd.f32 %v4389_v42, %v7976_v26  ;;  %v4388_v46 = vmul.f32 %v6836_v51, %v8309_v2  ;;  %6855 = vpow2.f32 %v5508_v28  ;;  %v3923_v49 = vpop.f32.mrf.mxu0  ;;  %v8918_v42 = vld [vmem:[#allocation16_spill] sm:$0xff] }
 0x7e3   : > { %v6838_v16 = vpop.eup %6837  ;;  %6857 = vrcp.f32 %v4200_v60  ;;  %v5510_v31 = vmul.f32 -1.442695, %v3929_v35  ;;  %v3924_v6 = vadd.f32 %v8521_v61, %v3923_v49 }
 0x7e4   : > { %v6840_v37 = vpop.eup %6839  ;;  %4517 = vst.msk [vmem:[%s8316_s24 + $0x158] sm:$0xff] %vm398_vm0, %v4453_v27  ;;  %v4452_v55 = vadd.f32 %v4388_v46, %v7988_v53  ;;  %v4203_v15 = vadd.f32 1.0, %v6838_v16  ;;  %6859 = vpow2.f32 %v5507_v0  ;;  %v6034_v59 = vpop.f32.mrf.mxu0  ;;  %v8919_v46 = vld [vmem:[#allocation30_spill] sm:$0xff] }
 0x7e5   : > { %v4202_v8 = vadd.f32 1.0, %v6840_v37  ;;  %6861 = vpow2.f32 %v5510_v31  ;;  %v5509_v26 = vmul.f32 -1.442695, %v3924_v6  ;;  %v3939_v23 = vadd.f32 %v8521_v61, %v6034_v59  ;;  %v8920_v6 = vld [vmem:[#allocation31_spill] sm:$0xff] }
 0x7e6   : > { %v6842_v54 = vpop.eup %6841  ;;  %4516 = vst.msk [vmem:[%s8316_s24 + $0x150] sm:$0xff] %vm398_vm0, %v4452_v55  ;;  %6863 = vrcp.f32 %v4203_v15  ;;  %v3933_v5 = vpop.f32.mrf.mxu0 }
 0x7e7   : > { %v6844_v20 = vpop.eup %6843  ;;  %v4391_v63 = vmul.f32 %v6842_v54, %v8309_v2  ;;  %6865 = vrcp.f32 %v4202_v8  ;;  %v5512_v62 = vmul.f32 -1.442695, %v3939_v23  ;;  %v3934_v53 = vadd.f32 %v8521_v61, %v3933_v5  ;;  %v8921_v54 = vld [vmem:[#allocation28_spill] sm:$0xff] }
 0x7e8   : > { %v6846_v30 = vpop.eup %6845  ;;  %v4205_v50 = vadd.f32 1.0, %v6844_v20  ;;  %6867 = vpow2.f32 %v5509_v26  ;;  %v6037_v10 = vpop.f32.mrf.mxu0 }
 0x7e9   : > { %v6848_v32 = vpop.eup %6847  ;;  %v4455_v41 = vadd.f32 %v4391_v63, %v7951_v36  ;;  %v4390_v18 = vmul.f32 %v6846_v30, %v8309_v2  ;;  %6869 = vpow2.f32 %v5512_v62  ;;  %v5511_v24 = vmul.f32 -1.442695, %v3934_v53  ;;  %v8922_v30 = vld [vmem:[#allocation29_spill] sm:$0xff] }
 0x7ea   : > { %v6850_v43 = vpop.eup %6849  ;;  %6871 = vrcp.f32 %v4205_v50  ;;  %v4204_v45 = vadd.f32 1.0, %v6848_v32  ;;  %v3949_v40 = vadd.f32 %v8521_v61, %v6037_v10  ;;  %v3943_v17 = vpop.f32.mrf.mxu0 }
 0x7eb   : > { %4519 = vst.msk [vmem:[%s8316_s24 + $0x168] sm:$0xff] %vm398_vm0, %v4455_v41  ;;  %v4454_v4 = vadd.f32 %v4390_v18, %v8916_v14  ;;  %v4207_v39 = vadd.f32 1.0, %v6850_v43  ;;  %6873 = vpow2.f32 %v5511_v24  ;;  %v3944_v22 = vadd.f32 %v8521_v61, %v3943_v17  ;;  %v8923_v41 = vld [vmem:[#allocation26_spill] sm:$0xff]  ;;  %v8924_v17 = vld [vmem:[#allocation27_spill] sm:$0xff] }
 0x7ec   : > { %v6852_v36 = vpop.eup %6851  ;;  %6875 = vrcp.f32 %v4204_v45  ;;  %v5514_v25 = vmul.f32 -1.442695, %v3949_v40  ;;  %v6040_v47 = vpop.f32.mrf.mxu0 }
 0x7ed   : > { %4518 = vst.msk [vmem:[%s8316_s24 + $0x160] sm:$0xff] %vm398_vm0, %v4454_v4  ;;  %6877 = vrcp.f32 %v4207_v39  ;;  %v4206_v57 = vadd.f32 1.0, %v6852_v36  ;;  %v5513_v56 = vmul.f32 -1.442695, %v3944_v22  ;;  %v3959_v13 = vadd.f32 %v8521_v61, %v6040_v47 }
 0x7ee   : > { %v6854_v38 = vpop.eup %6853  ;;  %6879 = vpow2.f32 %v5514_v25  ;;  %v3953_v48 = vpop.f32.mrf.mxu0 }
 0x7ef   : > { %v6856_v1 = vpop.eup %6855  ;;  %v4393_v9 = vmul.f32 %v6854_v38, %v8309_v2  ;;  %6881 = vrcp.f32 %v4206_v57  ;;  %v5516_v52 = vmul.f32 -1.442695, %v3959_v13  ;;  %v3954_v7 = vadd.f32 %v8521_v61, %v3953_v48  ;;  %v8925_v57 = vld [vmem:[#allocation24_spill] sm:$0xff]  ;;  %v8926_v48 = vld [vmem:[#allocation25_spill] sm:$0xff] }
 0x7f0   : > { %v6858_v33 = vpop.eup %6857  ;;  %v4209_v34 = vadd.f32 1.0, %v6856_v1  ;;  %6883 = vpow2.f32 %v5513_v56 }
 0x7f1   : > { %v6860_v21 = vpop.eup %6859  ;;  %v4457_v29 = vadd.f32 %v4393_v9, %v8917_v58  ;;  %v4392_v44 = vmul.f32 %v6858_v33, %v8309_v2  ;;  %6885 = vpow2.f32 %v5516_v52  ;;  %v5515_v11 = vmul.f32 -1.442695, %v3954_v7  ;;  %v8927_v52 = vld [vmem:[#allocation22_spill] sm:$0xff] }
 0x7f2   : > { %v6862_v28 = vpop.eup %6861  ;;  %6887 = vrcp.f32 %v4209_v34  ;;  %v4208_v19 = vadd.f32 1.0, %v6860_v21 }
 0x7f3   : > { %v6864_v12 = vpop.eup %6863  ;;  %4521 = vst.msk [vmem:[%s8316_s24 + $0x178] sm:$0xff] %vm398_vm0, %v4457_v29  ;;  %v4456_v3 = vadd.f32 %v4392_v44, %v8918_v42  ;;  %v4211_v61 = vadd.f32 1.0, %v6862_v28  ;;  %6889 = vpow2.f32 %v5515_v11  ;;  %v8928_v29 = vld [vmem:[#allocation23_spill] sm:$0xff]  ;;  %v8929_v11 = vld [vmem:[#allocation20_spill] sm:$0xff]  ;;  %v8930_v42 = vld [vmem:[#allocation21_spill] sm:$0xff] }
 0x7f4   : > { %v6866_v51 = vpop.eup %6865  ;;  %v4395_v60 = vmul.f32 %v6864_v12, %v8309_v2  ;;  %6891 = vrcp.f32 %v4208_v19 }
 0x7f5   : > { %v6868_v0 = vpop.eup %6867  ;;  %4520 = vst.msk [vmem:[%s8316_s24 + $0x170] sm:$0xff] %vm398_vm0, %v4456_v3  ;;  %v4394_v35 = vmul.f32 %v6866_v51, %v8309_v2  ;;  %6893 = vrcp.f32 %v4211_v61 }
 0x7f6   : > { %v6870_v27 = vpop.eup %6869  ;;  %v4459_v49 = vadd.f32 %v4395_v60, %v8919_v46  ;;  %v4210_v16 = vadd.f32 1.0, %v6868_v0  ;;  %v8931_v0 = vld [vmem:[#allocation17_spill] sm:$0xff] }
 0x7f7   : > { %v6872_v31 = vpop.eup %6871  ;;  %v4458_v37 = vadd.f32 %v4394_v35, %v8920_v6  ;;  %v4213_v55 = vadd.f32 1.0, %v6870_v27  ;;  %v8933_v6 = vld [vmem:[#allocation13_spill] sm:$0xff] }
 0x7f8   : > { %v6874_v15 = vpop.eup %6873  ;;  %4523 = vst.msk [vmem:[%s8316_s24 + $0x188] sm:$0xff] %vm398_vm0, %v4459_v49  ;;  %v4397_v59 = vmul.f32 %v6872_v31, %v8309_v2  ;;  %6895 = vrcp.f32 %v4210_v16  ;;  %v8932_v16 = vld [vmem:[#allocation18_spill] sm:$0xff] }
 0x7f9   : > { %v6876_v8 = vpop.eup %6875  ;;  %4522 = vst.msk [vmem:[%s8316_s24 + $0x180] sm:$0xff] %vm398_vm0, %v4458_v37  ;;  %6897 = vrcp.f32 %v4213_v55  ;;  %v4212_v26 = vadd.f32 1.0, %v6874_v15  ;;  %v8934_v15 = vld [vmem:[#allocation15_spill] sm:$0xff] }
 0x7fa   : > { %v6878_v23 = vpop.eup %6877  ;;  %v4461_v5 = vadd.f32 %v4397_v59, %v8921_v54  ;;  %v4396_v20 = vmul.f32 %v6876_v8, %v8309_v2 }
 0x7fb   : > { %v6880_v63 = vpop.eup %6879  ;;  %v4399_v62 = vmul.f32 %v6878_v23, %v8309_v2  ;;  %6899 = vrcp.f32 %v4212_v26 }
 0x7fc   : > { %v6882_v53 = vpop.eup %6881  ;;  %4525 = vst.msk [vmem:[%s8316_s24 + $0x198] sm:$0xff] %vm398_vm0, %v4461_v5  ;;  %v4460_v50 = vadd.f32 %v4396_v20, %v8922_v30  ;;  %v4215_v10 = vadd.f32 1.0, %v6880_v63 }
 0x7fd   : > { %v6884_v32 = vpop.eup %6883  ;;  %v4463_v18 = vadd.f32 %v4399_v62, %v8923_v41  ;;  %v4398_v24 = vmul.f32 %v6882_v53, %v8309_v2 }
 0x7fe   : > { %v6886_v43 = vpop.eup %6885  ;;  %4524 = vst.msk [vmem:[%s8316_s24 + $0x190] sm:$0xff] %vm398_vm0, %v4460_v50  ;;  %6901 = vrcp.f32 %v4215_v10  ;;  %v4214_v45 = vadd.f32 1.0, %v6884_v32 }
 0x7ff   : > { %v6888_v40 = vpop.eup %6887  ;;  %4527 = vst.msk [vmem:[%s8316_s24 + $0x1a8] sm:$0xff] %vm398_vm0, %v4463_v18  ;;  %v4462_v14 = vadd.f32 %v4398_v24, %v8924_v17  ;;  %v4217_v4 = vadd.f32 1.0, %v6886_v43 }
 0x800   : > { %v6890_v39 = vpop.eup %6889  ;;  %v4401_v22 = vmul.f32 %v6888_v40, %v8309_v2  ;;  %6903 = vrcp.f32 %v4214_v45 }
 0x801   : > { %v6892_v36 = vpop.eup %6891  ;;  %4526 = vst.msk [vmem:[%s8316_s24 + $0x1a0] sm:$0xff] %vm398_vm0, %v4462_v14  ;;  %6905 = vrcp.f32 %v4217_v4  ;;  %v4216_v25 = vadd.f32 1.0, %v6890_v39 }
 0x802   : > { %v6894_v47 = vpop.eup %6893  ;;  %v4465_v56 = vadd.f32 %v4401_v22, %v8925_v57  ;;  %v4400_v13 = vmul.f32 %v6892_v36, %v8309_v2 }
 0x803   : > { %v4403_v38 = vmul.f32 %v6894_v47, %v8309_v2  ;;  %6907 = vrcp.f32 %v4216_v25 }
 0x804   : > { %4529 = vst.msk [vmem:[%s8316_s24 + $0x1b8] sm:$0xff] %vm398_vm0, %v4465_v56  ;;  %v4464_v1 = vadd.f32 %v4400_v13, %v8926_v48 }
 0x805   : > { %v6896_v9 = vpop.eup %6895  ;;  %v4467_v7 = vadd.f32 %v4403_v38, %v8927_v52 }
 0x806   : > { %v6898_v33 = vpop.eup %6897  ;;  %4528 = vst.msk [vmem:[%s8316_s24 + $0x1b0] sm:$0xff] %vm398_vm0, %v4464_v1  ;;  %v4402_v34 = vmul.f32 %v6896_v9, %v8309_v2 }
 0x807   : > { %4531 = vst.msk [vmem:[%s8316_s24 + $0x1c8] sm:$0xff] %vm398_vm0, %v4467_v7  ;;  %v4405_v21 = vmul.f32 %v6898_v33, %v8309_v2 }
 0x808   : > { %v6900_v58 = vpop.eup %6899  ;;  %v4466_v44 = vadd.f32 %v4402_v34, %v8928_v29 }
 0x809   : > { %v4469_v28 = vadd.f32 %v4405_v21, %v8929_v11  ;;  %v4404_v19 = vmul.f32 %v6900_v58, %v8309_v2 }
 0x80a   : > { %4530 = vst.msk [vmem:[%s8316_s24 + $0x1c0] sm:$0xff] %vm398_vm0, %v4466_v44 }
 0x80b   : > { %v6902_v12 = vpop.eup %6901  ;;  %4533 = vst.msk [vmem:[%s8316_s24 + $0x1d8] sm:$0xff] %vm398_vm0, %v4469_v28  ;;  %v4468_v3 = vadd.f32 %v4404_v19, %v8930_v42 }
 0x80c   : > { %v4407_v61 = vmul.f32 %v6902_v12, %v8309_v2 }
 0x80d   : > { %v6904_v51 = vpop.eup %6903  ;;  %4532 = vst.msk [vmem:[%s8316_s24 + $0x1d0] sm:$0xff] %vm398_vm0, %v4468_v3 }
 0x80e   : > { %v6906_v60 = vpop.eup %6905  ;;  %v4471_v35 = vadd.f32 %v4407_v61, %v8931_v0  ;;  %v4406_v27 = vmul.f32 %v6904_v51, %v8309_v2 }
 0x80f   : > { %v4409_v46 = vmul.f32 %v6906_v60, %v8309_v2 }
 0x810   : > { %v6908_v49 = vpop.eup %6907  ;;  %4535 = vst.msk [vmem:[%s8316_s24 + $0x1e8] sm:$0xff] %vm398_vm0, %v4471_v35  ;;  %v4470_v31 = vadd.f32 %v4406_v27, %v8932_v16 }
 0x811   : > { %v4473_v37 = vadd.f32 %v4409_v46, %v8933_v6  ;;  %v4408_v55 = vmul.f32 %v6908_v49, %v8309_v2  ;;  %4544 = sbr.rel (!%p7131_p4) target bundleno = 2134 (0x856), region = 52 }
 0x812   : > { %4534 = vst.msk [vmem:[%s8316_s24 + $0x1e0] sm:$0xff] %vm398_vm0, %v4470_v31 }
 0x813   : > { %4537 = vst.msk [vmem:[%s8316_s24 + $0x1f8] sm:$0xff] %vm398_vm0, %v4473_v37  ;;  %v4472_v59 = vadd.f32 %v4408_v55, %v8934_v15 }
 0x815   : > { %4536 = vst.msk [vmem:[%s8316_s24 + $0x1f0] sm:$0xff] %vm398_vm0, %v4472_v59 }
 0x816   : > { %s8944_s15 = smov (!%p4547_p8, %s4546_s15), 64 }
 0x817   : > { %s5519_s20 = sshll.u32 %s8944_s15, 7 }
 0x818   : > { %p5522_p9 = scmp.eq.s32.totalorder %s5519_s20, 0 }
 0x819   : > { %s8643_s21 = sshrl.u32 (!%p5522_p9), %s8944_s15, 6 }
 0x81a   : > { %4555 = sbr.rel (%p5522_p9) target bundleno = 2134 (0x856), region = 56  ;;  %p5523_p10 = scmp.le.s32.totalorder (!%p5522_p9), %s8643_s21, 0 }
 0x81f   : > { %4962 = sbr.rel (%p5523_p10) target bundleno = 2117 (0x845), region = 138  ;;  %s8935_s27 = smov (!%p5523_p10), %s8637_s19 }
 0x820   : > { %s8936_s9 = smov (!%p5523_p10), %s8316_s24  ;;  %s8652_s10 = smov (!%p5523_p10), 0  }
 0x821   : > { %s8654_s22 = smov (!%p5523_p10), 0  }
 0x824 LB: >> { %v4744_v2 = vld [vmem:[%s7038_s9] sm:$0xff]  ;;  %v4746_v8 = vld [vmem:[%s7038_s9 + $0x8] sm:$0xff]  ;;  %v4748_v26 = vld [vmem:[%s7038_s9 + $0x10] sm:$0xff]  ;;  %s4872_s23 = sadd.s32 1, %s7042_s10  ;;  %s4738_s22 = sadd.s32 1, %s7046_s22   ;;  %s7046_s22 = sphi %s8654_s22, %s4738_s22   ;;  %s7042_s10 = sphi %s8652_s10, %s8939_s10   ;;  %s7038_s9 = sphi %s8936_s9, %s8938_s9   ;;  %s7034_s27 = sphi %s8935_s27, %s8937_s27  }
 0x825   : >> { %4745 = vst [vmem:[%s7034_s27] sm:$0xff] %v4744_v2  ;;  %4747 = vst [vmem:[%s7034_s27 + $0x8] sm:$0xff] %v4746_v8  ;;  %v4750_v23 = vld [vmem:[%s7038_s9 + $0x18] sm:$0xff]  ;;  %v4752_v54 = vld [vmem:[%s7038_s9 + $0x20] sm:$0xff]  ;;  %p4873_p11 = scmp.ge.s32.totalorder %s4872_s23, %s8643_s21  ;;  %p4737_p12 = scmp.ge.s32.totalorder %s4738_s22, %s8643_s21 }
 0x826   : >> { %4749 = vst [vmem:[%s7034_s27 + $0x10] sm:$0xff] %v4748_v26  ;;  %v4754_v5 = vld [vmem:[%s7038_s9 + $0x28] sm:$0xff]  ;;  %4751 = vst [vmem:[%s7034_s27 + $0x18] sm:$0xff] %v4750_v23  ;;  %v4756_v20 = vld [vmem:[%s7038_s9 + $0x30] sm:$0xff] }
 0x827   : >> { %4753 = vst [vmem:[%s7034_s27 + $0x20] sm:$0xff] %v4752_v54  ;;  %4755 = vst [vmem:[%s7034_s27 + $0x28] sm:$0xff] %v4754_v5  ;;  %v4758_v63 = vld [vmem:[%s7038_s9 + $0x38] sm:$0xff]  ;;  %v4760_v62 = vld [vmem:[%s7038_s9 + $0x40] sm:$0xff]  ;;  %s8946_s23 = smov (%p4873_p11, %s4872_s23), 0 }
 0x828   : >> { %4757 = vst [vmem:[%s7034_s27 + $0x30] sm:$0xff] %v4756_v20  ;;  %4759 = vst [vmem:[%s7034_s27 + $0x38] sm:$0xff] %v4758_v63  ;;  %v4762_v53 = vld [vmem:[%s7038_s9 + $0x48] sm:$0xff]  ;;  %v4764_v30 = vld [vmem:[%s7038_s9 + $0x50] sm:$0xff]  ;;  %s5524_s26 = sshll.u32 %s8946_s23, 9  ;;  %s8939_s10 = smov %s8946_s23 }
 0x829   : >> { %4761 = vst [vmem:[%s7034_s27 + $0x40] sm:$0xff] %v4760_v62  ;;  %v4766_v50 = vld [vmem:[%s7038_s9 + $0x58] sm:$0xff]  ;;  %4763 = vst [vmem:[%s7034_s27 + $0x48] sm:$0xff] %v4762_v53  ;;  %v4768_v10 = vld [vmem:[%s7038_s9 + $0x60] sm:$0xff]  ;;  %s8710_s29 = scalar_lea.vmem %s8316_s24, %s5524_s26 [#allocation2]   ;;  %s8713_s30 = scalar_lea.vmem %s8637_s19, %s5524_s26  }
 0x82a   : >> { %4765 = vst [vmem:[%s7034_s27 + $0x50] sm:$0xff] %v4764_v30  ;;  %4767 = vst [vmem:[%s7034_s27 + $0x58] sm:$0xff] %v4766_v50  ;;  %v4770_v32 = vld [vmem:[%s7038_s9 + $0x68] sm:$0xff]  ;;  %v4772_v41 = vld [vmem:[%s7038_s9 + $0x70] sm:$0xff] }
 0x82b   : >> { %4769 = vst [vmem:[%s7034_s27 + $0x60] sm:$0xff] %v4768_v10  ;;  %4771 = vst [vmem:[%s7034_s27 + $0x68] sm:$0xff] %v4770_v32  ;;  %v4774_v18 = vld [vmem:[%s7038_s9 + $0x78] sm:$0xff]  ;;  %v4776_v24 = vld [vmem:[%s7038_s9 + $0x80] sm:$0xff] }
 0x82c   : >> { %4773 = vst [vmem:[%s7034_s27 + $0x70] sm:$0xff] %v4772_v41  ;;  %v4778_v43 = vld [vmem:[%s7038_s9 + $0x88] sm:$0xff]  ;;  %4775 = vst [vmem:[%s7034_s27 + $0x78] sm:$0xff] %v4774_v18  ;;  %v4780_v45 = vld [vmem:[%s7038_s9 + $0x90] sm:$0xff] }
 0x82d   : >> { %4777 = vst [vmem:[%s7034_s27 + $0x80] sm:$0xff] %v4776_v24  ;;  %4779 = vst [vmem:[%s7034_s27 + $0x88] sm:$0xff] %v4778_v43  ;;  %v4782_v40 = vld [vmem:[%s7038_s9 + $0x98] sm:$0xff]  ;;  %v4784_v17 = vld [vmem:[%s7038_s9 + $0xa0] sm:$0xff] }
 0x82e   : >> { %4781 = vst [vmem:[%s7034_s27 + $0x90] sm:$0xff] %v4780_v45  ;;  %4783 = vst [vmem:[%s7034_s27 + $0x98] sm:$0xff] %v4782_v40  ;;  %v4786_v14 = vld [vmem:[%s7038_s9 + $0xa8] sm:$0xff]  ;;  %v4788_v4 = vld [vmem:[%s7038_s9 + $0xb0] sm:$0xff] }
 0x82f   : >> { %4785 = vst [vmem:[%s7034_s27 + $0xa0] sm:$0xff] %v4784_v17  ;;  %v4790_v39 = vld [vmem:[%s7038_s9 + $0xb8] sm:$0xff]  ;;  %4787 = vst [vmem:[%s7034_s27 + $0xa8] sm:$0xff] %v4786_v14  ;;  %v4792_v22 = vld [vmem:[%s7038_s9 + $0xc0] sm:$0xff] }
 0x830   : >> { %4789 = vst [vmem:[%s7034_s27 + $0xb0] sm:$0xff] %v4788_v4  ;;  %4791 = vst [vmem:[%s7034_s27 + $0xb8] sm:$0xff] %v4790_v39  ;;  %v4794_v36 = vld [vmem:[%s7038_s9 + $0xc8] sm:$0xff]  ;;  %v4796_v25 = vld [vmem:[%s7038_s9 + $0xd0] sm:$0xff] }
 0x831   : >> { %4793 = vst [vmem:[%s7034_s27 + $0xc0] sm:$0xff] %v4792_v22  ;;  %4795 = vst [vmem:[%s7034_s27 + $0xc8] sm:$0xff] %v4794_v36  ;;  %v4798_v47 = vld [vmem:[%s7038_s9 + $0xd8] sm:$0xff]  ;;  %v4800_v57 = vld [vmem:[%s7038_s9 + $0xe0] sm:$0xff] }
 0x832   : >> { %4797 = vst [vmem:[%s7034_s27 + $0xd0] sm:$0xff] %v4796_v25  ;;  %v4802_v56 = vld [vmem:[%s7038_s9 + $0xe8] sm:$0xff]  ;;  %4799 = vst [vmem:[%s7034_s27 + $0xd8] sm:$0xff] %v4798_v47  ;;  %v4804_v13 = vld [vmem:[%s7038_s9 + $0xf0] sm:$0xff] }
 0x833   : >> { %4801 = vst [vmem:[%s7034_s27 + $0xe0] sm:$0xff] %v4800_v57  ;;  %4803 = vst [vmem:[%s7034_s27 + $0xe8] sm:$0xff] %v4802_v56  ;;  %v4806_v38 = vld [vmem:[%s7038_s9 + $0xf8] sm:$0xff]  ;;  %v4808_v48 = vld [vmem:[%s7038_s9 + $0x100] sm:$0xff] }
 0x834   : >> { %4805 = vst [vmem:[%s7034_s27 + $0xf0] sm:$0xff] %v4804_v13  ;;  %4807 = vst [vmem:[%s7034_s27 + $0xf8] sm:$0xff] %v4806_v38  ;;  %v4810_v1 = vld [vmem:[%s7038_s9 + $0x108] sm:$0xff]  ;;  %v4812_v9 = vld [vmem:[%s7038_s9 + $0x110] sm:$0xff] }
 0x835   : >> { %4809 = vst [vmem:[%s7034_s27 + $0x100] sm:$0xff] %v4808_v48  ;;  %v4814_v52 = vld [vmem:[%s7038_s9 + $0x118] sm:$0xff]  ;;  %4811 = vst [vmem:[%s7034_s27 + $0x108] sm:$0xff] %v4810_v1  ;;  %v4816_v7 = vld [vmem:[%s7038_s9 + $0x120] sm:$0xff] }
 0x836   : >> { %4813 = vst [vmem:[%s7034_s27 + $0x110] sm:$0xff] %v4812_v9  ;;  %4815 = vst [vmem:[%s7034_s27 + $0x118] sm:$0xff] %v4814_v52  ;;  %v4818_v33 = vld [vmem:[%s7038_s9 + $0x128] sm:$0xff]  ;;  %v4820_v34 = vld [vmem:[%s7038_s9 + $0x130] sm:$0xff] }
 0x837   : >> { %4817 = vst [vmem:[%s7034_s27 + $0x120] sm:$0xff] %v4816_v7  ;;  %4819 = vst [vmem:[%s7034_s27 + $0x128] sm:$0xff] %v4818_v33  ;;  %v4822_v21 = vld [vmem:[%s7038_s9 + $0x138] sm:$0xff]  ;;  %v4824_v58 = vld [vmem:[%s7038_s9 + $0x140] sm:$0xff] }
 0x838   : >> { %4821 = vst [vmem:[%s7034_s27 + $0x130] sm:$0xff] %v4820_v34  ;;  %v4826_v29 = vld [vmem:[%s7038_s9 + $0x148] sm:$0xff]  ;;  %4823 = vst [vmem:[%s7034_s27 + $0x138] sm:$0xff] %v4822_v21  ;;  %v4828_v44 = vld [vmem:[%s7038_s9 + $0x150] sm:$0xff] }
 0x839   : >> { %4825 = vst [vmem:[%s7034_s27 + $0x140] sm:$0xff] %v4824_v58  ;;  %4827 = vst [vmem:[%s7034_s27 + $0x148] sm:$0xff] %v4826_v29  ;;  %v4830_v11 = vld [vmem:[%s7038_s9 + $0x158] sm:$0xff]  ;;  %v4832_v28 = vld [vmem:[%s7038_s9 + $0x160] sm:$0xff] }
 0x83a   : >> { %4829 = vst [vmem:[%s7034_s27 + $0x150] sm:$0xff] %v4828_v44  ;;  %4831 = vst [vmem:[%s7034_s27 + $0x158] sm:$0xff] %v4830_v11  ;;  %v4834_v19 = vld [vmem:[%s7038_s9 + $0x168] sm:$0xff]  ;;  %v4836_v12 = vld [vmem:[%s7038_s9 + $0x170] sm:$0xff] }
 0x83b   : >> { %4833 = vst [vmem:[%s7034_s27 + $0x160] sm:$0xff] %v4832_v28  ;;  %v4838_v42 = vld [vmem:[%s7038_s9 + $0x178] sm:$0xff]  ;;  %4835 = vst [vmem:[%s7034_s27 + $0x168] sm:$0xff] %v4834_v19  ;;  %v4840_v3 = vld [vmem:[%s7038_s9 + $0x180] sm:$0xff] }
 0x83c   : >> { %4837 = vst [vmem:[%s7034_s27 + $0x170] sm:$0xff] %v4836_v12  ;;  %4839 = vst [vmem:[%s7034_s27 + $0x178] sm:$0xff] %v4838_v42  ;;  %v4842_v61 = vld [vmem:[%s7038_s9 + $0x188] sm:$0xff]  ;;  %v4844_v51 = vld [vmem:[%s7038_s9 + $0x190] sm:$0xff] }
 0x83d   : >> { %4841 = vst [vmem:[%s7034_s27 + $0x180] sm:$0xff] %v4840_v3  ;;  %4843 = vst [vmem:[%s7034_s27 + $0x188] sm:$0xff] %v4842_v61  ;;  %v4846_v60 = vld [vmem:[%s7038_s9 + $0x198] sm:$0xff]  ;;  %v4848_v0 = vld [vmem:[%s7038_s9 + $0x1a0] sm:$0xff] }
 0x83e   : >> { %4845 = vst [vmem:[%s7034_s27 + $0x190] sm:$0xff] %v4844_v51  ;;  %v4850_v35 = vld [vmem:[%s7038_s9 + $0x1a8] sm:$0xff]  ;;  %4847 = vst [vmem:[%s7034_s27 + $0x198] sm:$0xff] %v4846_v60  ;;  %v4852_v27 = vld [vmem:[%s7038_s9 + $0x1b0] sm:$0xff] }
 0x83f   : >> { %4849 = vst [vmem:[%s7034_s27 + $0x1a0] sm:$0xff] %v4848_v0  ;;  %4851 = vst [vmem:[%s7034_s27 + $0x1a8] sm:$0xff] %v4850_v35  ;;  %v4854_v46 = vld [vmem:[%s7038_s9 + $0x1b8] sm:$0xff]  ;;  %v4856_v49 = vld [vmem:[%s7038_s9 + $0x1c0] sm:$0xff] }
 0x840   : >> { %4853 = vst [vmem:[%s7034_s27 + $0x1b0] sm:$0xff] %v4852_v27  ;;  %4855 = vst [vmem:[%s7034_s27 + $0x1b8] sm:$0xff] %v4854_v46  ;;  %v4858_v16 = vld [vmem:[%s7038_s9 + $0x1c8] sm:$0xff]  ;;  %v4860_v31 = vld [vmem:[%s7038_s9 + $0x1d0] sm:$0xff]  ;;  %4740 = sbr.rel (!%p4737_p12) target bundleno = 2084 (0x824), region = 144 }
 0x841   : >> { %4857 = vst [vmem:[%s7034_s27 + $0x1c0] sm:$0xff] %v4856_v49  ;;  %v4862_v6 = vld [vmem:[%s7038_s9 + $0x1d8] sm:$0xff]  ;;  %4859 = vst [vmem:[%s7034_s27 + $0x1c8] sm:$0xff] %v4858_v16  ;;  %v4864_v37 = vld [vmem:[%s7038_s9 + $0x1e0] sm:$0xff] }
 0x842   : >> { %4861 = vst [vmem:[%s7034_s27 + $0x1d0] sm:$0xff] %v4860_v31  ;;  %4863 = vst [vmem:[%s7034_s27 + $0x1d8] sm:$0xff] %v4862_v6  ;;  %v4866_v55 = vld [vmem:[%s7038_s9 + $0x1e8] sm:$0xff]  ;;  %v4868_v15 = vld [vmem:[%s7038_s9 + $0x1f0] sm:$0xff] }
 0x843   : >> { %4865 = vst [vmem:[%s7034_s27 + $0x1e0] sm:$0xff] %v4864_v37  ;;  %4867 = vst [vmem:[%s7034_s27 + $0x1e8] sm:$0xff] %v4866_v55  ;;  %v4870_v59 = vld [vmem:[%s7038_s9 + $0x1f8] sm:$0xff]  ;;  %s8938_s9 = smov %s8710_s29 }
 0x844   : >> { %4869 = vst [vmem:[%s7034_s27 + $0x1f0] sm:$0xff] %v4868_v15  ;;  %4871 = vst [vmem:[%s7034_s27 + $0x1f8] sm:$0xff] %v4870_v59  ;;  %s8937_s27 = smov %s8713_s30 }
 0x845 PF: > { %s8818_s11 = sand.u32 63, %s8944_s15   ;;  %s5535_s12 = sshll.u32 %s8643_s21, 9 }
 0x846   : > { %s4883_s13 = scalar_lea.vmem %s8316_s24, %s5535_s12 [#allocation2]   ;;  %s4885_s14 = scalar_lea.vmem %s8637_s19, %s5535_s12  }
 0x847   : > { %p5529_p13 = scmp.le.s32.totalorder %s8818_s11, 0 }
 0x848   : > { %s7048_s16 = smov (!%p5529_p13), %s4885_s14   ;;  %s7052_s17 = smov (!%p5529_p13), %s4883_s13  }
 0x849   : > { %4976 = sbr.rel (%p5529_p13) target bundleno = 2134 (0x856), region = 149  ;;  %s7056_s18 = smov (!%p5529_p13), 0  }
 0x84a   : > { %s7060_s20 = smov (!%p5529_p13), 0  }
 0x84e LB: >> { %v4895_v2 = vld [vmem:[%s7054_s17] sm:$0xff]  ;;  %s4897_s15 = sadd.s32 1, %s7058_s18  ;;  %s4889_s20 = sadd.s32 1, %s7062_s20   ;;  %s7062_s20 = sphi %s7060_s20, %s4889_s20   ;;  %s7058_s18 = sphi %s7056_s18, %s7057_s18   ;;  %s7054_s17 = sphi %s7052_s17, %s4902_s17   ;;  %s7050_s16 = sphi %s7048_s16, %s4903_s16  }
 0x84f   : >> { %4896 = vst [vmem:[%s7050_s16] sm:$0xff] %v4895_v2  ;;  %p4898_p0 = scmp.ge.s32.totalorder %s4897_s15, %s8818_s11  ;;  %p4888_p1 = scmp.ge.s32.totalorder %s4889_s20, %s8818_s11 }
 0x851   : >> { %s8948_s15 = smov (%p4898_p0, %s4897_s15), 0  ;;  %4891 = sbr.rel (!%p4888_p1) target bundleno = 2126 (0x84e), region = 155 }
 0x852   : >> { %s5530_s24 = sshll.u32 %s8948_s15, 3  ;;  %s7057_s18 = smov %s8948_s15  }
 0x853   : >> { %s4902_s17 = scalar_lea.vmem %s4883_s13, %s5530_s24 [#allocation2]   ;;  %s4903_s16 = scalar_lea.vmem %s4885_s14, %s5530_s24  }
 0x856 PF: > { %p14_p2 = scmp.ge.s32.totalorder %s7121_s28, 4   ;;  %s8940_s24 = smov %s7026_s25 }
 0x857   : > { %s8941_s25 = smov %s7129_s8  ;;  %s8942_s26 = smov %s7121_s28 }
 0x858   :  { %16 = sbr.rel (!%p14_p2) target bundleno = 2 (0x2), region = 166 }

</bundles_post_ra>
